<compile_context>
chip_gen: v7x
topology: tpu7x:2x2x1
jax: 0.10.0
libtpu: 0.0.40
codegen_flags: <defaults>
</compile_context>

<pallas_src>
import functools

import jax
import jax.numpy as jnp
from jax.experimental import pallas as pl
from jax.experimental.pallas import tpu as pltpu

LEAKY_SLOPE = 0.01  # PyTorch default negative_slope for nn.LeakyReLU / F.leaky_relu


def _leaky(x):
    return jnp.where(x >= 0.0, x, LEAKY_SLOPE * x)


# ------------------------------ Pallas kernels ------------------------------

def _stage1_kernel(x_ref, w_ref, b_ref, m_ref, o_ref):
    """conv3x3(3->64, pad=1) + MaxPool2d(2,2) + LeakyReLU, phase/tap-packed.

    Per image (grid=(B,)):
      x_ref : [R, 128] bf16   rows enumerate the padded+quartered a1 grid (q, i, j);
                              lanes [32p:32p+32] hold the 27-value (padded to 32)
                              3x3x3 patch of pool phase p for that pixel.
      w_ref : [32, 64]  bf16  tap-major conv weight (27 rows + 5 zero rows).
      b_ref : [1, 64]   f32
      m_ref : [R, 1]    f32   1 for interior rows, 0 for the zero-pad halo rows.
      o_ref : [R, 64]   bf16  padded+quartered a1 activation (stage-2 input layout).
    """
    pooled = None
    for p in range(4):                     # 4 maxpool phases, one K=32 matmul each
        lhs = x_ref[:, 32 * p:32 * (p + 1)]
        acc = jnp.dot(lhs, w_ref[...], preferred_element_type=jnp.float32)
        pooled = acc if pooled is None else jnp.maximum(pooled, acc)
    act = _leaky(pooled + b_ref[...]) * m_ref[...]   # f32 epilogue; halo rows -> 0
    o_ref[...] = act.astype(o_ref.dtype)


def _stage2_kernel(xq_ref, w2_ref, b2_ref, w3_ref, b3_ref, o_ref, *, hh, wh):
    """conv3x3(64->64, pad=1) + MaxPool2d(2,2) + LeakyReLU + conv1x1(64->32) + LeakyReLU.

    Per image (grid=(B,)):
      xq_ref : [4, Hq2, Wq2, 64] bf16  stride-2 quarters of the zero-padded a1
                                       (quarter q = 2*qi + qj holds a1pad[qi::2, qj::2]).
      w2_ref : [2, 3, 256, 64]   bf16  K=256 lane-blocked conv weights, indexed by
                                       (pool col-phase dj, tap row ti); lane-block cc
                                       holds tap (ti, tj=cc-dj) (zeros elsewhere).
      b2_ref : [1, 64]  f32
      w3_ref : [64, 32] bf16           1x1 conv weight
      b3_ref : [1, 32]  f32
      o_ref  : [hh*wh, 32] bf16        a3 activation, row = y*wh + x (spatial-major).
    """
    M = hh * wh
    # Hoist the 16 distinct shifted views (loaded/reshaped exactly once).
    views = [[None] * 4 for _ in range(4)]
    for rr in range(4):
        i0 = rr // 2
        for cc in range(4):
            j0 = cc // 2
            q = 2 * (rr % 2) + (cc % 2)
            v = xq_ref[q, i0:i0 + hh, j0:j0 + wh, :]
            views[rr][cc] = v.reshape(M, 64)
    # K=256 LHS slabs: L[rr][:, 64*cc : 64*cc+64] = a1pad[2Y+rr, 2X+cc, :].
    L = [jnp.concatenate(views[rr], axis=-1) for rr in range(4)]

    pooled = None
    for di in range(2):            # maxpool phase rows
        for dj in range(2):        # maxpool phase cols
            acc = jnp.dot(L[di], w2_ref[dj, 0], preferred_element_type=jnp.float32)
            acc = acc + jnp.dot(L[di + 1], w2_ref[dj, 1], preferred_element_type=jnp.float32)
            acc = acc + jnp.dot(L[di + 2], w2_ref[dj, 2], preferred_element_type=jnp.float32)
            pooled = acc if pooled is None else jnp.maximum(pooled, acc)

    h = _leaky(pooled + b2_ref[...])                          # f32 epilogue
    a3 = jnp.dot(h.astype(w3_ref.dtype), w3_ref[...],
                 preferred_element_type=jnp.float32) + b3_ref[...]
    o_ref[...] = _leaky(a3).astype(o_ref.dtype)


def _fc_head_kernel(x_ref, w1_ref, b1_ref, w2_ref, b2_ref, f1_ref, f2_ref):
    """feat1 = x @ W1 + b1 ; feat2 = leaky(feat1) @ W2 + b2 (W1 has avgpool folded in)."""
    h = jnp.dot(x_ref[...], w1_ref[...], preferred_element_type=jnp.float32) + b1_ref[...]
    f1_ref[...] = h                                           # pre-activation, as in PyTorch
    f2_ref[...] = jnp.dot(_leaky(h).astype(w2_ref.dtype), w2_ref[...],
                          preferred_element_type=jnp.float32) + b2_ref[...]


# ------------------------------ host-side glue ------------------------------

def _stage1_pack(xh):
    """Pack stage-1 input patches, lane-dense, in the stage-2 quartered row order.

    xh: [B, H, W, 3] bf16 ->  [B, R, 128] with R = 4 * (H//4 + 1) * (W//4 + 1).
    Row (q=(qi,qj), i, j) corresponds to a1pad position (2i+qi, 2j+qj); its 128 lanes are
    the 4 pool-phase patches (27 values padded to 32) of pooled pixel (2i+qi-1, 2j+qj-1).
    Halo rows (outside the a1 grid) carry arbitrary (zero) patches; the kernel masks them.
    """
    B, H, W, C = xh.shape
    assert C == 3
    Hh, Wh = H // 2, W // 2
    xpad = jnp.pad(xh, ((0, 0), (1, 1), (1, 1), (0, 0)))
    # 27-channel patch at every conv-output pixel; channel order = (ti, tj, c).
    pat = jnp.concatenate(
        [xpad[:, ti:ti + H, tj:tj + W, :] for ti in range(3) for tj in range(3)], axis=-1)
    pat = jnp.pad(pat, ((0, 0), (0, 0), (0, 0), (0, 32 - 27)))        # 27 -> 32
    # Group the 4 pool phases into lanes: lanes [32*(2*di+dj):+32] = phase (di, dj).
    pat = (pat.reshape(B, Hh, 2, Wh, 2, 32)
              .transpose(0, 1, 3, 2, 4, 5)
              .reshape(B, Hh, Wh, 128))
    # Add the stage-2 zero-pad halo and quarter (= stage-2's quartered-a1pad row order).
    patp = jnp.pad(pat, ((0, 0), (1, 1), (1, 1), (0, 0)))             # [B, Hh+2, Wh+2, 128]
    x1 = jnp.stack([patp[:, qi::2, qj::2, :] for qi in (0, 1) for qj in (0, 1)], axis=1)
    Hq2, Wq2 = Hh // 2 + 1, Wh // 2 + 1
    return x1.reshape(B, 4 * Hq2 * Wq2, 128)


def _stage1_row_mask(H, W):
    """[R, 1] f32 mask: 1 for interior rows of the quartered a1pad grid, 0 for the halo."""
    Hh, Wh = H // 2, W // 2
    Hq2, Wq2 = Hh // 2 + 1, Wh // 2 + 1
    ii = jnp.arange(Hq2)
    jj = jnp.arange(Wq2)
    blocks = []
    for qi in (0, 1):
        for qj in (0, 1):
            vy = (2 * ii + qi - 1 >= 0) & (2 * ii + qi - 1 < Hh)
            vx = (2 * jj + qj - 1 >= 0) & (2 * jj + qj - 1 < Wh)
            blocks.append(vy[:, None] & vx[None, :])
    return jnp.stack(blocks, 0).reshape(4 * Hq2 * Wq2, 1).astype(jnp.float32)


def stage1(x_pack, w1, b1, mask):
    B, R, _ = x_pack.shape
    return pl.pallas_call(
        _stage1_kernel,
        grid=(B,),
        in_specs=[
            pl.BlockSpec((None, R, 128), lambda i: (i, 0, 0)),   # per-image packed patches
            pl.BlockSpec((32, 64), lambda i: (0, 0)),            # conv weight (resident)
            pl.BlockSpec((1, 64), lambda i: (0, 0)),             # bias
            pl.BlockSpec((R, 1), lambda i: (0, 0)),              # halo mask
        ],
        out_specs=pl.BlockSpec((None, R, 64), lambda i: (i, 0, 0)),
        out_shape=jax.ShapeDtypeStruct((B, R, 64), jnp.bfloat16),
        compiler_params=pltpu.CompilerParams(dimension_semantics=("parallel",)),
    )(x_pack, w1, b1, mask)


def stage2(a1q, w2k, b2, w3, b3, *, hh, wh):
    B, _, Hq2, Wq2, _ = a1q.shape
    return pl.pallas_call(
        functools.partial(_stage2_kernel, hh=hh, wh=wh),
        grid=(B,),
        in_specs=[
            pl.BlockSpec((None, 4, Hq2, Wq2, 64), lambda i: (i, 0, 0, 0, 0)),
            pl.BlockSpec((2, 3, 256, 64), lambda i: (0, 0, 0, 0)),
            pl.BlockSpec((1, 64), lambda i: (0, 0)),
            pl.BlockSpec((64, 32), lambda i: (0, 0)),
            pl.BlockSpec((1, 32), lambda i: (0, 0)),
        ],
        out_specs=pl.BlockSpec((None, hh * wh, 32), lambda i: (i, 0, 0)),
        out_shape=jax.ShapeDtypeStruct((B, hh * wh, 32), jnp.bfloat16),
        compiler_params=pltpu.CompilerParams(dimension_semantics=("parallel",)),
    )(a1q, w2k, b2, w3, b3)


def fc_head(x, w1, b1, w2, b2):
    B = x.shape[0]
    return pl.pallas_call(
        _fc_head_kernel,
        out_shape=(jax.ShapeDtypeStruct((B, w1.shape[1]), jnp.float32),
                   jax.ShapeDtypeStruct((B, w2.shape[1]), jnp.float32)),
    )(x, w1, b1, w2, b2)


# ------------------------------- full forward -------------------------------

def cnn_toy_forward(x, params):
    """x: [B, 3, H, W] float32 (NCHW). Returns (feat1, feat2) like CnnToyNet.forward."""
    B, C, H, W = x.shape
    assert C == 3 and H % 8 == 0 and W % 8 == 0
    hh, wh = H // 4, W // 4
    Hq2, Wq2 = hh + 1, wh + 1

    xh = jnp.transpose(x, (0, 2, 3, 1)).astype(jnp.bfloat16)   # NHWC bf16 (MXU inputs)

    # Stage 1: conv3x3(3,64) + maxpool + leaky; emits padded+quartered a1 for stage 2.
    x_pack = _stage1_pack(xh)
    mask = _stage1_row_mask(H, W)
    a1 = stage1(x_pack, params["w1"], params["b1"], mask)      # [B, 4*Hq2*Wq2, 64]
    a1q = a1.reshape(B, 4, Hq2, Wq2, 64)                       # free (row-major) reshape

    # Stage 2: conv3x3(64,64) + maxpool + leaky + conv1x1(64,32) + leaky.
    a3 = stage2(a1q, params["w2k"], params["b2"], params["w3"], params["b3"],
                hh=hh, wh=wh)                                  # [B, hh*wh, 32]

    # AvgPool2d(3,2,1) is folded into fc1's weight (exact); FC head reads lane-dense flat.
    flat = a3.reshape(B, hh * wh * 32)                         # free (row-major) reshape
    return fc_head(flat, params["fc1_wf"], params["fc1_b"],
                   params["fc2_w"], params["fc2_b"])


# ---------------------------- deterministic init ----------------------------

class KeyGen:
    def __init__(self, seed):
        self._key = jax.random.PRNGKey(seed)

    def __call__(self):
        self._key, sub = jax.random.split(self._key)
        return sub


def _fold_avgpool_into_fc1(fc1_w_pt, hh, wh):
    """Fold AvgPool2d(3,2,1, count_include_pad=True) into fc1 (both linear -> exact).

    fc1_w_pt: [32*ho*wo, 128], rows in the PyTorch NCHW flatten order (c, oy, ox).
    Returns   [hh*wh*32, 128], rows in the kernel's (y, x, c) order.
    """
    ho, wo = hh // 2, wh // 2
    w = fc1_w_pt.reshape(32, ho, wo, 128).astype(jnp.float32)
    y = jnp.arange(hh)[:, None]
    oy = jnp.arange(ho)[None, :]
    Py = ((y >= 2 * oy - 1) & (y <= 2 * oy + 1)).astype(jnp.float32)
    xx = jnp.arange(wh)[:, None]
    ox = jnp.arange(wo)[None, :]
    Px = ((xx >= 2 * ox - 1) & (xx <= 2 * ox + 1)).astype(jnp.float32)
    g = jnp.einsum("ya,xb,cabf->yxcf", Py, Px, w) / 9.0
    return g.reshape(hh * wh * 32, 128)


def init_params(num_classes, img_size, seed=1):
    """Deterministic init.  Returns (kernel-layout params, PyTorch-layout params).

    NOTE: this does not reproduce PyTorch's kaiming-uniform defaults; real PyTorch
    weights can be dropped in via the same layout conversions (which are exact).
    """
    assert img_size % 8 == 0
    kg = KeyGen(seed)
    hh = wh = img_size // 4
    ho = wo = img_size // 8
    fc_len = ho * wo * 32                     # == CnnToyNet._fc_len

    def conv_pt(cout, cin, k):
        fan_in = cin * k * k
        w = jax.random.normal(kg(), (cout, cin, k, k), jnp.float32) * (2.0 / fan_in) ** 0.5
        b = jax.random.normal(kg(), (1, cout), jnp.float32) * 0.01
        return w, b

    def linear_pt(cout, cin):
        w = jax.random.normal(kg(), (cout, cin), jnp.float32) * (1.0 / cin) ** 0.5
        b = jax.random.normal(kg(), (1, cout), jnp.float32) * 0.01
        return w, b

    w1_pt, b1 = conv_pt(64, 3, 3)
    w2_pt, b2 = conv_pt(64, 64, 3)
    w3_pt, b3 = conv_pt(32, 64, 1)
    fc1_pt, fc1_b = linear_pt(128, fc_len)    # PyTorch Linear weight [out, in]
    fc2_pt, fc2_b = linear_pt(num_classes, 128)

    # conv1: tap-major [27, 64] (row = 9*ti + 3*tj + c), zero-padded to K=32.
    w1p = jnp.transpose(w1_pt, (2, 3, 1, 0)).reshape(27, 64)
    w1p = jnp.pad(w1p, ((0, 5), (0, 0))).astype(jnp.bfloat16)

    # conv2: K=256 lane-blocked weight indexed by (pool col-phase dj, tap row ti);
    # lane-block cc = dj + tj holds tap (ti, tj), other blocks are zero.
    w2r = jnp.transpose(w2_pt, (2, 3, 1, 0))            # [3, 3, cin, cout]
    w2k = jnp.zeros((2, 3, 256, 64), jnp.float32)
    for dj in range(2):
        for ti in range(3):
            for tj in range(3):
                cc = dj + tj
                w2k = w2k.at[dj, ti, 64 * cc:64 * cc + 64, :].set(w2r[ti, tj])
    w2k = w2k.astype(jnp.bfloat16)

    w3 = jnp.transpose(w3_pt.reshape(32, 64), (1, 0)).astype(jnp.bfloat16)   # [cin, cout]

    fc1_wf = _fold_avgpool_into_fc1(fc1_pt.T, hh, wh).astype(jnp.bfloat16)   # [hh*wh*32,128]
    fc2_w = fc2_pt.T.astype(jnp.bfloat16)

    params = {
        "w1": w1p, "b1": b1,
        "w2k": w2k, "b2": b2,
        "w3": w3, "b3": b3,
        "fc1_wf": fc1_wf, "fc1_b": fc1_b,
        "fc2_w": fc2_w, "fc2_b": fc2_b,
    }
    params_pt = {
        "w1": w1_pt, "b1": b1, "w2": w2_pt, "b2": b2, "w3": w3_pt, "b3": b3,
        "fc1_w": fc1_pt, "fc1_b": fc1_b, "fc2_w": fc2_pt, "fc2_b": fc2_b,
    }
    return params, params_pt


# ------------------------- pure-JAX f32 reference ----------------------------

def reference_forward(x, pt):
    """Mirrors the PyTorch CnnToyNet.forward in f32 (for a tolerance check)."""
    def conv(h, w, b, pad):
        y = jax.lax.conv_general_dilated(
            h, w, window_strides=(1, 1), padding=[(pad, pad), (pad, pad)],
            dimension_numbers=("NCHW", "OIHW", "NCHW"))
        return y + b.reshape(1, -1, 1, 1)

    def maxpool2(h):
        return jax.lax.reduce_window(h, -jnp.inf, jax.lax.max,
                                     (1, 1, 2, 2), (1, 1, 2, 2), "VALID")

    def avgpool3(h):  # AvgPool2d(3, 2, 1), count_include_pad=True
        s = jax.lax.reduce_window(h, 0.0, jax.lax.add, (1, 1, 3, 3), (1, 1, 2, 2),
                                  [(0, 0), (0, 0), (1, 1), (1, 1)])
        return s / 9.0

    h = _leaky(maxpool2(conv(x, pt["w1"], pt["b1"], 1)))
    h = _leaky(maxpool2(conv(h, pt["w2"], pt["b2"], 1)))
    h = _leaky(conv(h, pt["w3"], pt["b3"], 0))
    h = avgpool3(h)
    flat = h.reshape(x.shape[0], -1)                       # NCHW flatten order
    feat1 = flat @ pt["fc1_w"].T + pt["fc1_b"]
    feat2 = _leaky(feat1) @ pt["fc2_w"].T + pt["fc2_b"]
    return feat1, feat2


# ----------------------------------- main -----------------------------------

if __name__ == "__main__":
    num_classes = 10
    B, img_size = 2, 32   # small; img_size must be divisible by the net's /8 reduction

    x = jax.random.normal(jax.random.PRNGKey(0), (B, 3, img_size, img_size), jnp.float32)
    params, params_pt = init_params(num_classes, img_size, seed=1)

    fwd = jax.jit(cnn_toy_forward)
    feat1, feat2 = fwd(x, params)
    jax.block_until_ready((feat1, feat2))

    assert feat1.shape == (B, 128)
    assert feat2.shape == (B, num_classes)
    assert bool(jnp.isfinite(feat1).all()) and bool(jnp.isfinite(feat2).all())

    # bf16 kernel path vs f32 reference: generous tolerance (10% of output scale).
    r1, r2 = reference_forward(x, params_pt)
    s1 = float(jnp.maximum(jnp.max(jnp.abs(r1)), 1.0))
    s2 = float(jnp.maximum(jnp.max(jnp.abs(r2)), 1.0))
    assert float(jnp.max(jnp.abs(feat1.astype(jnp.float32) - r1))) <= 0.1 * s1
    assert float(jnp.max(jnp.abs(feat2.astype(jnp.float32) - r2))) <= 0.1 * s2

    print("KERNEL_OK")
</pallas_src>

<mosaic_0001>
module attributes {stable_mosaic.version = 11 : i64} {
  func.func @_stage1_kernel(%arg0: i32, %arg1: memref<1x324x128xbf16, #tpu.memory_space<vmem>>, %arg2: memref<32x64xbf16, #tpu.memory_space<vmem>>, %arg3: memref<1x64xf32, #tpu.memory_space<vmem>>, %arg4: memref<324x1xf32, #tpu.memory_space<vmem>>, %arg5: memref<1x324x64xbf16, #tpu.memory_space<vmem>>) attributes {dimension_semantics = [#tpu.dimension_semantics<parallel>], iteration_bounds = array<i64: 2>, scalar_prefetch = 0 : i64, scratch_operands = 0 : i64, tpu.core_type = #tpu.core_type<tc>, window_params = [{transform_indices = @transform_0, window_bounds = array<i64: 1, 324, 128>}, {pipeline_mode = #tpu.pipeline_mode<synchronous>, transform_indices = @transform_1, window_bounds = array<i64: 32, 64>}, {pipeline_mode = #tpu.pipeline_mode<synchronous>, transform_indices = @transform_2, window_bounds = array<i64: 1, 64>}, {pipeline_mode = #tpu.pipeline_mode<synchronous>, transform_indices = @transform_3, window_bounds = array<i64: 324, 1>}, {transform_indices = @transform_4, window_bounds = array<i64: 1, 324, 64>}]} {
    %c0 = arith.constant 0 : index
    %c0_0 = arith.constant 0 : index
    %c0_1 = arith.constant 0 : index
    %0 = vector.load %arg1[%c0, %c0_0, %c0_1] : memref<1x324x128xbf16, #tpu.memory_space<vmem>>, vector<1x324x32xbf16>
    %1 = vector.shape_cast %0 : vector<1x324x32xbf16> to vector<324x32xbf16>
    %c0_2 = arith.constant 0 : index
    %c0_3 = arith.constant 0 : index
    %2 = vector.load %arg2[%c0_2, %c0_3] : memref<32x64xbf16, #tpu.memory_space<vmem>>, vector<32x64xbf16>
    %cst = arith.constant dense<0.000000e+00> : vector<324x64xf32>
    %3 = tpu.matmul %1, %2, %cst {dimension_numbers = #tpu.dot_dimension_numbers<[1], [0], [0], [1], [0, 0, 1, 1], [], []>} : vector<324x32xbf16>, vector<32x64xbf16>, vector<324x64xf32> -> vector<324x64xf32>
    %c0_4 = arith.constant 0 : index
    %c0_5 = arith.constant 0 : index
    %c32 = arith.constant 32 : index
    %4 = vector.load %arg1[%c0_4, %c0_5, %c32] : memref<1x324x128xbf16, #tpu.memory_space<vmem>>, vector<1x324x32xbf16>
    %5 = vector.shape_cast %4 : vector<1x324x32xbf16> to vector<324x32xbf16>
    %c0_6 = arith.constant 0 : index
    %c0_7 = arith.constant 0 : index
    %6 = vector.load %arg2[%c0_6, %c0_7] : memref<32x64xbf16, #tpu.memory_space<vmem>>, vector<32x64xbf16>
    %cst_8 = arith.constant dense<0.000000e+00> : vector<324x64xf32>
    %7 = tpu.matmul %5, %6, %cst_8 {dimension_numbers = #tpu.dot_dimension_numbers<[1], [0], [0], [1], [0, 0, 1, 1], [], []>} : vector<324x32xbf16>, vector<32x64xbf16>, vector<324x64xf32> -> vector<324x64xf32>
    %8 = arith.maximumf %3, %7 : vector<324x64xf32>
    %c0_9 = arith.constant 0 : index
    %c0_10 = arith.constant 0 : index
    %c64 = arith.constant 64 : index
    %9 = vector.load %arg1[%c0_9, %c0_10, %c64] : memref<1x324x128xbf16, #tpu.memory_space<vmem>>, vector<1x324x32xbf16>
    %10 = vector.shape_cast %9 : vector<1x324x32xbf16> to vector<324x32xbf16>
    %c0_11 = arith.constant 0 : index
    %c0_12 = arith.constant 0 : index
    %11 = vector.load %arg2[%c0_11, %c0_12] : memref<32x64xbf16, #tpu.memory_space<vmem>>, vector<32x64xbf16>
    %cst_13 = arith.constant dense<0.000000e+00> : vector<324x64xf32>
    %12 = tpu.matmul %10, %11, %cst_13 {dimension_numbers = #tpu.dot_dimension_numbers<[1], [0], [0], [1], [0, 0, 1, 1], [], []>} : vector<324x32xbf16>, vector<32x64xbf16>, vector<324x64xf32> -> vector<324x64xf32>
    %13 = arith.maximumf %8, %12 : vector<324x64xf32>
    %c0_14 = arith.constant 0 : index
    %c0_15 = arith.constant 0 : index
    %c96 = arith.constant 96 : index
    %14 = vector.load %arg1[%c0_14, %c0_15, %c96] : memref<1x324x128xbf16, #tpu.memory_space<vmem>>, vector<1x324x32xbf16>
    %15 = vector.shape_cast %14 : vector<1x324x32xbf16> to vector<324x32xbf16>
    %c0_16 = arith.constant 0 : index
    %c0_17 = arith.constant 0 : index
    %16 = vector.load %arg2[%c0_16, %c0_17] : memref<32x64xbf16, #tpu.memory_space<vmem>>, vector<32x64xbf16>
    %cst_18 = arith.constant dense<0.000000e+00> : vector<324x64xf32>
    %17 = tpu.matmul %15, %16, %cst_18 {dimension_numbers = #tpu.dot_dimension_numbers<[1], [0], [0], [1], [0, 0, 1, 1], [], []>} : vector<324x32xbf16>, vector<32x64xbf16>, vector<324x64xf32> -> vector<324x64xf32>
    %18 = arith.maximumf %13, %17 : vector<324x64xf32>
    %c0_19 = arith.constant 0 : index
    %c0_20 = arith.constant 0 : index
    %19 = vector.load %arg3[%c0_19, %c0_20] : memref<1x64xf32, #tpu.memory_space<vmem>>, vector<1x64xf32>
    %20 = vector.broadcast %19 : vector<1x64xf32> to vector<324x64xf32>
    %21 = arith.addf %18, %20 : vector<324x64xf32>
    %cst_21 = arith.constant 0.000000e+00 : f32
    %22 = vector.broadcast %cst_21 : f32 to vector<324x64xf32>
    %23 = arith.cmpf oge, %21, %22 : vector<324x64xf32>
    %cst_22 = arith.constant 0.00999999977 : f32
    %24 = vector.broadcast %cst_22 : f32 to vector<324x64xf32>
    %25 = arith.mulf %24, %21 : vector<324x64xf32>
    %26 = arith.select %23, %21, %25 : vector<324x64xi1>, vector<324x64xf32>
    %c0_23 = arith.constant 0 : index
    %c0_24 = arith.constant 0 : index
    %27 = vector.load %arg4[%c0_23, %c0_24] : memref<324x1xf32, #tpu.memory_space<vmem>>, vector<324x1xf32>
    %28 = vector.broadcast %27 : vector<324x1xf32> to vector<324x64xf32>
    %29 = arith.mulf %26, %28 : vector<324x64xf32>
    %30 = arith.truncf %29 : vector<324x64xf32> to vector<324x64xbf16>
    %c0_25 = arith.constant 0 : index
    %c0_26 = arith.constant 0 : index
    %c0_27 = arith.constant 0 : index
    %31 = vector.load %arg5[%c0_25, %c0_26, %c0_27] : memref<1x324x64xbf16, #tpu.memory_space<vmem>>, vector<1x324x64xbf16>
    %32 = vector.shape_cast %31 : vector<1x324x64xbf16> to vector<324x64xbf16>
    %33 = vector.shape_cast %30 : vector<324x64xbf16> to vector<1x324x64xbf16>
    tpu.vector_store %arg5[%c0_25, %c0_26, %c0_27], %33 {strides = array<i32>} : memref<1x324x64xbf16, #tpu.memory_space<vmem>>, vector<1x324x64xbf16>,
    return
  }
  func.func @transform_0(%arg0: i32) -> (i32, i32, i32) {
    %c0_i32 = arith.constant 0 : i32
    %c0_i32_0 = arith.constant 0 : i32
    %c0_i32_1 = arith.constant 0 : i32
    return %arg0, %c0_i32, %c0_i32_0 : i32, i32, i32
  }
  func.func @transform_1(%arg0: i32) -> (i32, i32) {
    %c0_i32 = arith.constant 0 : i32
    %c0_i32_0 = arith.constant 0 : i32
    %c0_i32_1 = arith.constant 0 : i32
    return %c0_i32, %c0_i32_0 : i32, i32
  }
  func.func @transform_2(%arg0: i32) -> (i32, i32) {
    %c0_i32 = arith.constant 0 : i32
    %c0_i32_0 = arith.constant 0 : i32
    %c0_i32_1 = arith.constant 0 : i32
    return %c0_i32, %c0_i32_0 : i32, i32
  }
  func.func @transform_3(%arg0: i32) -> (i32, i32) {
    %c0_i32 = arith.constant 0 : i32
    %c0_i32_0 = arith.constant 0 : i32
    %c0_i32_1 = arith.constant 0 : i32
    return %c0_i32, %c0_i32_0 : i32, i32
  }
  func.func @transform_4(%arg0: i32) -> (i32, i32, i32) {
    %c0_i32 = arith.constant 0 : i32
    %c0_i32_0 = arith.constant 0 : i32
    %c0_i32_1 = arith.constant 0 : i32
    return %arg0, %c0_i32, %c0_i32_0 : i32, i32, i32
  }
}

module attributes {stable_mosaic.version = 11 : i64} {
  func.func @_stage2_kernel(%arg0: i32, %arg1: memref<1x4x9x9x64xbf16, #tpu.memory_space<vmem>>, %arg2: memref<2x3x256x64xbf16, #tpu.memory_space<vmem>>, %arg3: memref<1x64xf32, #tpu.memory_space<vmem>>, %arg4: memref<64x32xbf16, #tpu.memory_space<vmem>>, %arg5: memref<1x32xf32, #tpu.memory_space<vmem>>, %arg6: memref<1x64x32xbf16, #tpu.memory_space<vmem>>) attributes {dimension_semantics = [#tpu.dimension_semantics<parallel>], iteration_bounds = array<i64: 2>, scalar_prefetch = 0 : i64, scratch_operands = 0 : i64, tpu.core_type = #tpu.core_type<tc>, window_params = [{transform_indices = @transform_0, window_bounds = array<i64: 1, 4, 9, 9, 64>}, {pipeline_mode = #tpu.pipeline_mode<synchronous>, transform_indices = @transform_1, window_bounds = array<i64: 2, 3, 256, 64>}, {pipeline_mode = #tpu.pipeline_mode<synchronous>, transform_indices = @transform_2, window_bounds = array<i64: 1, 64>}, {pipeline_mode = #tpu.pipeline_mode<synchronous>, transform_indices = @transform_3, window_bounds = array<i64: 64, 32>}, {pipeline_mode = #tpu.pipeline_mode<synchronous>, transform_indices = @transform_4, window_bounds = array<i64: 1, 32>}, {transform_indices = @transform_5, window_bounds = array<i64: 1, 64, 32>}]} {
    %c0 = arith.constant 0 : index
    %c0_0 = arith.constant 0 : index
    %c0_1 = arith.constant 0 : index
    %c0_2 = arith.constant 0 : index
    %c0_3 = arith.constant 0 : index
    %0 = vector.load %arg1[%c0, %c0_0, %c0_1, %c0_2, %c0_3] : memref<1x4x9x9x64xbf16, #tpu.memory_space<vmem>>, vector<1x1x8x8x64xbf16>
    %1 = vector.shape_cast %0 : vector<1x1x8x8x64xbf16> to vector<8x8x64xbf16>
    %2 = vector.shape_cast %1 : vector<8x8x64xbf16> to vector<64x64xbf16>
    %c0_4 = arith.constant 0 : index
    %c1 = arith.constant 1 : index
    %c0_5 = arith.constant 0 : index
    %c0_6 = arith.constant 0 : index
    %c0_7 = arith.constant 0 : index
    %3 = vector.load %arg1[%c0_4, %c1, %c0_5, %c0_6, %c0_7] : memref<1x4x9x9x64xbf16, #tpu.memory_space<vmem>>, vector<1x1x8x8x64xbf16>
    %4 = vector.shape_cast %3 : vector<1x1x8x8x64xbf16> to vector<8x8x64xbf16>
    %5 = vector.shape_cast %4 : vector<8x8x64xbf16> to vector<64x64xbf16>
    %c0_8 = arith.constant 0 : index
    %c0_9 = arith.constant 0 : index
    %c0_10 = arith.constant 0 : index
    %c1_11 = arith.constant 1 : index
    %c0_12 = arith.constant 0 : index
    %6 = vector.load %arg1[%c0_8, %c0_9, %c0_10, %c1_11, %c0_12] : memref<1x4x9x9x64xbf16, #tpu.memory_space<vmem>>, vector<1x1x8x8x64xbf16>
    %7 = vector.shape_cast %6 : vector<1x1x8x8x64xbf16> to vector<8x8x64xbf16>
    %8 = vector.shape_cast %7 : vector<8x8x64xbf16> to vector<64x64xbf16>
    %c0_13 = arith.constant 0 : index
    %c1_14 = arith.constant 1 : index
    %c0_15 = arith.constant 0 : index
    %c1_16 = arith.constant 1 : index
    %c0_17 = arith.constant 0 : index
    %9 = vector.load %arg1[%c0_13, %c1_14, %c0_15, %c1_16, %c0_17] : memref<1x4x9x9x64xbf16, #tpu.memory_space<vmem>>, vector<1x1x8x8x64xbf16>
    %10 = vector.shape_cast %9 : vector<1x1x8x8x64xbf16> to vector<8x8x64xbf16>
    %11 = vector.shape_cast %10 : vector<8x8x64xbf16> to vector<64x64xbf16>
    %c0_18 = arith.constant 0 : index
    %c2 = arith.constant 2 : index
    %c0_19 = arith.constant 0 : index
    %c0_20 = arith.constant 0 : index
    %c0_21 = arith.constant 0 : index
    %12 = vector.load %arg1[%c0_18, %c2, %c0_19, %c0_20, %c0_21] : memref<1x4x9x9x64xbf16, #tpu.memory_space<vmem>>, vector<1x1x8x8x64xbf16>
    %13 = vector.shape_cast %12 : vector<1x1x8x8x64xbf16> to vector<8x8x64xbf16>
    %14 = vector.shape_cast %13 : vector<8x8x64xbf16> to vector<64x64xbf16>
    %c0_22 = arith.constant 0 : index
    %c3 = arith.constant 3 : index
    %c0_23 = arith.constant 0 : index
    %c0_24 = arith.constant 0 : index
    %c0_25 = arith.constant 0 : index
    %15 = vector.load %arg1[%c0_22, %c3, %c0_23, %c0_24, %c0_25] : memref<1x4x9x9x64xbf16, #tpu.memory_space<vmem>>, vector<1x1x8x8x64xbf16>
    %16 = vector.shape_cast %15 : vector<1x1x8x8x64xbf16> to vector<8x8x64xbf16>
    %17 = vector.shape_cast %16 : vector<8x8x64xbf16> to vector<64x64xbf16>
    %c0_26 = arith.constant 0 : index
    %c2_27 = arith.constant 2 : index
    %c0_28 = arith.constant 0 : index
    %c1_29 = arith.constant 1 : index
    %c0_30 = arith.constant 0 : index
    %18 = vector.load %arg1[%c0_26, %c2_27, %c0_28, %c1_29, %c0_30] : memref<1x4x9x9x64xbf16, #tpu.memory_space<vmem>>, vector<1x1x8x8x64xbf16>
    %19 = vector.shape_cast %18 : vector<1x1x8x8x64xbf16> to vector<8x8x64xbf16>
    %20 = vector.shape_cast %19 : vector<8x8x64xbf16> to vector<64x64xbf16>
    %c0_31 = arith.constant 0 : index
    %c3_32 = arith.constant 3 : index
    %c0_33 = arith.constant 0 : index
    %c1_34 = arith.constant 1 : index
    %c0_35 = arith.constant 0 : index
    %21 = vector.load %arg1[%c0_31, %c3_32, %c0_33, %c1_34, %c0_35] : memref<1x4x9x9x64xbf16, #tpu.memory_space<vmem>>, vector<1x1x8x8x64xbf16>
    %22 = vector.shape_cast %21 : vector<1x1x8x8x64xbf16> to vector<8x8x64xbf16>
    %23 = vector.shape_cast %22 : vector<8x8x64xbf16> to vector<64x64xbf16>
    %c0_36 = arith.constant 0 : index
    %c0_37 = arith.constant 0 : index
    %c1_38 = arith.constant 1 : index
    %c0_39 = arith.constant 0 : index
    %c0_40 = arith.constant 0 : index
    %24 = vector.load %arg1[%c0_36, %c0_37, %c1_38, %c0_39, %c0_40] : memref<1x4x9x9x64xbf16, #tpu.memory_space<vmem>>, vector<1x1x8x8x64xbf16>
    %25 = vector.shape_cast %24 : vector<1x1x8x8x64xbf16> to vector<8x8x64xbf16>
    %26 = vector.shape_cast %25 : vector<8x8x64xbf16> to vector<64x64xbf16>
    %c0_41 = arith.constant 0 : index
    %c1_42 = arith.constant 1 : index
    %c1_43 = arith.constant 1 : index
    %c0_44 = arith.constant 0 : index
    %c0_45 = arith.constant 0 : index
    %27 = vector.load %arg1[%c0_41, %c1_42, %c1_43, %c0_44, %c0_45] : memref<1x4x9x9x64xbf16, #tpu.memory_space<vmem>>, vector<1x1x8x8x64xbf16>
    %28 = vector.shape_cast %27 : vector<1x1x8x8x64xbf16> to vector<8x8x64xbf16>
    %29 = vector.shape_cast %28 : vector<8x8x64xbf16> to vector<64x64xbf16>
    %c0_46 = arith.constant 0 : index
    %c0_47 = arith.constant 0 : index
    %c1_48 = arith.constant 1 : index
    %c1_49 = arith.constant 1 : index
    %c0_50 = arith.constant 0 : index
    %30 = vector.load %arg1[%c0_46, %c0_47, %c1_48, %c1_49, %c0_50] : memref<1x4x9x9x64xbf16, #tpu.memory_space<vmem>>, vector<1x1x8x8x64xbf16>
    %31 = vector.shape_cast %30 : vector<1x1x8x8x64xbf16> to vector<8x8x64xbf16>
    %32 = vector.shape_cast %31 : vector<8x8x64xbf16> to vector<64x64xbf16>
    %c0_51 = arith.constant 0 : index
    %c1_52 = arith.constant 1 : index
    %c1_53 = arith.constant 1 : index
    %c1_54 = arith.constant 1 : index
    %c0_55 = arith.constant 0 : index
    %33 = vector.load %arg1[%c0_51, %c1_52, %c1_53, %c1_54, %c0_55] : memref<1x4x9x9x64xbf16, #tpu.memory_space<vmem>>, vector<1x1x8x8x64xbf16>
    %34 = vector.shape_cast %33 : vector<1x1x8x8x64xbf16> to vector<8x8x64xbf16>
    %35 = vector.shape_cast %34 : vector<8x8x64xbf16> to vector<64x64xbf16>
    %c0_56 = arith.constant 0 : index
    %c2_57 = arith.constant 2 : index
    %c1_58 = arith.constant 1 : index
    %c0_59 = arith.constant 0 : index
    %c0_60 = arith.constant 0 : index
    %36 = vector.load %arg1[%c0_56, %c2_57, %c1_58, %c0_59, %c0_60] : memref<1x4x9x9x64xbf16, #tpu.memory_space<vmem>>, vector<1x1x8x8x64xbf16>
    %37 = vector.shape_cast %36 : vector<1x1x8x8x64xbf16> to vector<8x8x64xbf16>
    %38 = vector.shape_cast %37 : vector<8x8x64xbf16> to vector<64x64xbf16>
    %c0_61 = arith.constant 0 : index
    %c3_62 = arith.constant 3 : index
    %c1_63 = arith.constant 1 : index
    %c0_64 = arith.constant 0 : index
    %c0_65 = arith.constant 0 : index
    %39 = vector.load %arg1[%c0_61, %c3_62, %c1_63, %c0_64, %c0_65] : memref<1x4x9x9x64xbf16, #tpu.memory_space<vmem>>, vector<1x1x8x8x64xbf16>
    %40 = vector.shape_cast %39 : vector<1x1x8x8x64xbf16> to vector<8x8x64xbf16>
    %41 = vector.shape_cast %40 : vector<8x8x64xbf16> to vector<64x64xbf16>
    %c0_66 = arith.constant 0 : index
    %c2_67 = arith.constant 2 : index
    %c1_68 = arith.constant 1 : index
    %c1_69 = arith.constant 1 : index
    %c0_70 = arith.constant 0 : index
    %42 = vector.load %arg1[%c0_66, %c2_67, %c1_68, %c1_69, %c0_70] : memref<1x4x9x9x64xbf16, #tpu.memory_space<vmem>>, vector<1x1x8x8x64xbf16>
    %43 = vector.shape_cast %42 : vector<1x1x8x8x64xbf16> to vector<8x8x64xbf16>
    %44 = vector.shape_cast %43 : vector<8x8x64xbf16> to vector<64x64xbf16>
    %c0_71 = arith.constant 0 : index
    %c3_72 = arith.constant 3 : index
    %c1_73 = arith.constant 1 : index
    %c1_74 = arith.constant 1 : index
    %c0_75 = arith.constant 0 : index
    %45 = vector.load %arg1[%c0_71, %c3_72, %c1_73, %c1_74, %c0_75] : memref<1x4x9x9x64xbf16, #tpu.memory_space<vmem>>, vector<1x1x8x8x64xbf16>
    %46 = vector.shape_cast %45 : vector<1x1x8x8x64xbf16> to vector<8x8x64xbf16>
    %47 = vector.shape_cast %46 : vector<8x8x64xbf16> to vector<64x64xbf16>
    %48 = tpu.concatenate %2, %5, %8, %11 in 1 : vector<64x64xbf16>, vector<64x64xbf16>, vector<64x64xbf16>, vector<64x64xbf16> -> vector<64x256xbf16>
    %49 = tpu.concatenate %14, %17, %20, %23 in 1 : vector<64x64xbf16>, vector<64x64xbf16>, vector<64x64xbf16>, vector<64x64xbf16> -> vector<64x256xbf16>
    %50 = tpu.concatenate %26, %29, %32, %35 in 1 : vector<64x64xbf16>, vector<64x64xbf16>, vector<64x64xbf16>, vector<64x64xbf16> -> vector<64x256xbf16>
    %51 = tpu.concatenate %38, %41, %44, %47 in 1 : vector<64x64xbf16>, vector<64x64xbf16>, vector<64x64xbf16>, vector<64x64xbf16> -> vector<64x256xbf16>
    %c0_76 = arith.constant 0 : index
    %c0_77 = arith.constant 0 : index
    %c0_78 = arith.constant 0 : index
    %c0_79 = arith.constant 0 : index
    %52 = vector.load %arg2[%c0_76, %c0_77, %c0_78, %c0_79] : memref<2x3x256x64xbf16, #tpu.memory_space<vmem>>, vector<1x1x256x64xbf16>
    %53 = vector.shape_cast %52 : vector<1x1x256x64xbf16> to vector<256x64xbf16>
    %cst = arith.constant dense<0.000000e+00> : vector<64x64xf32>
    %54 = tpu.matmul %48, %53, %cst {dimension_numbers = #tpu.dot_dimension_numbers<[1], [0], [0], [1], [0, 0, 1, 1], [], []>} : vector<64x256xbf16>, vector<256x64xbf16>, vector<64x64xf32> -> vector<64x64xf32>
    %c0_80 = arith.constant 0 : index
    %c1_81 = arith.constant 1 : index
    %c0_82 = arith.constant 0 : index
    %c0_83 = arith.constant 0 : index
    %55 = vector.load %arg2[%c0_80, %c1_81, %c0_82, %c0_83] : memref<2x3x256x64xbf16, #tpu.memory_space<vmem>>, vector<1x1x256x64xbf16>
    %56 = vector.shape_cast %55 : vector<1x1x256x64xbf16> to vector<256x64xbf16>
    %cst_84 = arith.constant dense<0.000000e+00> : vector<64x64xf32>
    %57 = tpu.matmul %49, %56, %cst_84 {dimension_numbers = #tpu.dot_dimension_numbers<[1], [0], [0], [1], [0, 0, 1, 1], [], []>} : vector<64x256xbf16>, vector<256x64xbf16>, vector<64x64xf32> -> vector<64x64xf32>
    %58 = arith.addf %54, %57 : vector<64x64xf32>
    %c0_85 = arith.constant 0 : index
    %c2_86 = arith.constant 2 : index
    %c0_87 = arith.constant 0 : index
    %c0_88 = arith.constant 0 : index
    %59 = vector.load %arg2[%c0_85, %c2_86, %c0_87, %c0_88] : memref<2x3x256x64xbf16, #tpu.memory_space<vmem>>, vector<1x1x256x64xbf16>
    %60 = vector.shape_cast %59 : vector<1x1x256x64xbf16> to vector<256x64xbf16>
    %cst_89 = arith.constant dense<0.000000e+00> : vector<64x64xf32>
    %61 = tpu.matmul %50, %60, %cst_89 {dimension_numbers = #tpu.dot_dimension_numbers<[1], [0], [0], [1], [0, 0, 1, 1], [], []>} : vector<64x256xbf16>, vector<256x64xbf16>, vector<64x64xf32> -> vector<64x64xf32>
    %62 = arith.addf %58, %61 : vector<64x64xf32>
    %c1_90 = arith.constant 1 : index
    %c0_91 = arith.constant 0 : index
    %c0_92 = arith.constant 0 : index
    %c0_93 = arith.constant 0 : index
    %63 = vector.load %arg2[%c1_90, %c0_91, %c0_92, %c0_93] : memref<2x3x256x64xbf16, #tpu.memory_space<vmem>>, vector<1x1x256x64xbf16>
    %64 = vector.shape_cast %63 : vector<1x1x256x64xbf16> to vector<256x64xbf16>
    %cst_94 = arith.constant dense<0.000000e+00> : vector<64x64xf32>
    %65 = tpu.matmul %48, %64, %cst_94 {dimension_numbers = #tpu.dot_dimension_numbers<[1], [0], [0], [1], [0, 0, 1, 1], [], []>} : vector<64x256xbf16>, vector<256x64xbf16>, vector<64x64xf32> -> vector<64x64xf32>
    %c1_95 = arith.constant 1 : index
    %c1_96 = arith.constant 1 : index
    %c0_97 = arith.constant 0 : index
    %c0_98 = arith.constant 0 : index
    %66 = vector.load %arg2[%c1_95, %c1_96, %c0_97, %c0_98] : memref<2x3x256x64xbf16, #tpu.memory_space<vmem>>, vector<1x1x256x64xbf16>
    %67 = vector.shape_cast %66 : vector<1x1x256x64xbf16> to vector<256x64xbf16>
    %cst_99 = arith.constant dense<0.000000e+00> : vector<64x64xf32>
    %68 = tpu.matmul %49, %67, %cst_99 {dimension_numbers = #tpu.dot_dimension_numbers<[1], [0], [0], [1], [0, 0, 1, 1], [], []>} : vector<64x256xbf16>, vector<256x64xbf16>, vector<64x64xf32> -> vector<64x64xf32>
    %69 = arith.addf %65, %68 : vector<64x64xf32>
    %c1_100 = arith.constant 1 : index
    %c2_101 = arith.constant 2 : index
    %c0_102 = arith.constant 0 : index
    %c0_103 = arith.constant 0 : index
    %70 = vector.load %arg2[%c1_100, %c2_101, %c0_102, %c0_103] : memref<2x3x256x64xbf16, #tpu.memory_space<vmem>>, vector<1x1x256x64xbf16>
    %71 = vector.shape_cast %70 : vector<1x1x256x64xbf16> to vector<256x64xbf16>
    %cst_104 = arith.constant dense<0.000000e+00> : vector<64x64xf32>
    %72 = tpu.matmul %50, %71, %cst_104 {dimension_numbers = #tpu.dot_dimension_numbers<[1], [0], [0], [1], [0, 0, 1, 1], [], []>} : vector<64x256xbf16>, vector<256x64xbf16>, vector<64x64xf32> -> vector<64x64xf32>
    %73 = arith.addf %69, %72 : vector<64x64xf32>
    %74 = arith.maximumf %62, %73 : vector<64x64xf32>
    %c0_105 = arith.constant 0 : index
    %c0_106 = arith.constant 0 : index
    %c0_107 = arith.constant 0 : index
    %c0_108 = arith.constant 0 : index
    %75 = vector.load %arg2[%c0_105, %c0_106, %c0_107, %c0_108] : memref<2x3x256x64xbf16, #tpu.memory_space<vmem>>, vector<1x1x256x64xbf16>
    %76 = vector.shape_cast %75 : vector<1x1x256x64xbf16> to vector<256x64xbf16>
    %cst_109 = arith.constant dense<0.000000e+00> : vector<64x64xf32>
    %77 = tpu.matmul %49, %76, %cst_109 {dimension_numbers = #tpu.dot_dimension_numbers<[1], [0], [0], [1], [0, 0, 1, 1], [], []>} : vector<64x256xbf16>, vector<256x64xbf16>, vector<64x64xf32> -> vector<64x64xf32>
    %c0_110 = arith.constant 0 : index
    %c1_111 = arith.constant 1 : index
    %c0_112 = arith.constant 0 : index
    %c0_113 = arith.constant 0 : index
    %78 = vector.load %arg2[%c0_110, %c1_111, %c0_112, %c0_113] : memref<2x3x256x64xbf16, #tpu.memory_space<vmem>>, vector<1x1x256x64xbf16>
    %79 = vector.shape_cast %78 : vector<1x1x256x64xbf16> to vector<256x64xbf16>
    %cst_114 = arith.constant dense<0.000000e+00> : vector<64x64xf32>
    %80 = tpu.matmul %50, %79, %cst_114 {dimension_numbers = #tpu.dot_dimension_numbers<[1], [0], [0], [1], [0, 0, 1, 1], [], []>} : vector<64x256xbf16>, vector<256x64xbf16>, vector<64x64xf32> -> vector<64x64xf32>
    %81 = arith.addf %77, %80 : vector<64x64xf32>
    %c0_115 = arith.constant 0 : index
    %c2_116 = arith.constant 2 : index
    %c0_117 = arith.constant 0 : index
    %c0_118 = arith.constant 0 : index
    %82 = vector.load %arg2[%c0_115, %c2_116, %c0_117, %c0_118] : memref<2x3x256x64xbf16, #tpu.memory_space<vmem>>, vector<1x1x256x64xbf16>
    %83 = vector.shape_cast %82 : vector<1x1x256x64xbf16> to vector<256x64xbf16>
    %cst_119 = arith.constant dense<0.000000e+00> : vector<64x64xf32>
    %84 = tpu.matmul %51, %83, %cst_119 {dimension_numbers = #tpu.dot_dimension_numbers<[1], [0], [0], [1], [0, 0, 1, 1], [], []>} : vector<64x256xbf16>, vector<256x64xbf16>, vector<64x64xf32> -> vector<64x64xf32>
    %85 = arith.addf %81, %84 : vector<64x64xf32>
    %86 = arith.maximumf %74, %85 : vector<64x64xf32>
    %c1_120 = arith.constant 1 : index
    %c0_121 = arith.constant 0 : index
    %c0_122 = arith.constant 0 : index
    %c0_123 = arith.constant 0 : index
    %87 = vector.load %arg2[%c1_120, %c0_121, %c0_122, %c0_123] : memref<2x3x256x64xbf16, #tpu.memory_space<vmem>>, vector<1x1x256x64xbf16>
    %88 = vector.shape_cast %87 : vector<1x1x256x64xbf16> to vector<256x64xbf16>
    %cst_124 = arith.constant dense<0.000000e+00> : vector<64x64xf32>
    %89 = tpu.matmul %49, %88, %cst_124 {dimension_numbers = #tpu.dot_dimension_numbers<[1], [0], [0], [1], [0, 0, 1, 1], [], []>} : vector<64x256xbf16>, vector<256x64xbf16>, vector<64x64xf32> -> vector<64x64xf32>
    %c1_125 = arith.constant 1 : index
    %c1_126 = arith.constant 1 : index
    %c0_127 = arith.constant 0 : index
    %c0_128 = arith.constant 0 : index
    %90 = vector.load %arg2[%c1_125, %c1_126, %c0_127, %c0_128] : memref<2x3x256x64xbf16, #tpu.memory_space<vmem>>, vector<1x1x256x64xbf16>
    %91 = vector.shape_cast %90 : vector<1x1x256x64xbf16> to vector<256x64xbf16>
    %cst_129 = arith.constant dense<0.000000e+00> : vector<64x64xf32>
    %92 = tpu.matmul %50, %91, %cst_129 {dimension_numbers = #tpu.dot_dimension_numbers<[1], [0], [0], [1], [0, 0, 1, 1], [], []>} : vector<64x256xbf16>, vector<256x64xbf16>, vector<64x64xf32> -> vector<64x64xf32>
    %93 = arith.addf %89, %92 : vector<64x64xf32>
    %c1_130 = arith.constant 1 : index
    %c2_131 = arith.constant 2 : index
    %c0_132 = arith.constant 0 : index
    %c0_133 = arith.constant 0 : index
    %94 = vector.load %arg2[%c1_130, %c2_131, %c0_132, %c0_133] : memref<2x3x256x64xbf16, #tpu.memory_space<vmem>>, vector<1x1x256x64xbf16>
    %95 = vector.shape_cast %94 : vector<1x1x256x64xbf16> to vector<256x64xbf16>
    %cst_134 = arith.constant dense<0.000000e+00> : vector<64x64xf32>
    %96 = tpu.matmul %51, %95, %cst_134 {dimension_numbers = #tpu.dot_dimension_numbers<[1], [0], [0], [1], [0, 0, 1, 1], [], []>} : vector<64x256xbf16>, vector<256x64xbf16>, vector<64x64xf32> -> vector<64x64xf32>
    %97 = arith.addf %93, %96 : vector<64x64xf32>
    %98 = arith.maximumf %86, %97 : vector<64x64xf32>
    %c0_135 = arith.constant 0 : index
    %c0_136 = arith.constant 0 : index
    %99 = vector.load %arg3[%c0_135, %c0_136] : memref<1x64xf32, #tpu.memory_space<vmem>>, vector<1x64xf32>
    %100 = vector.broadcast %99 : vector<1x64xf32> to vector<64x64xf32>
    %101 = arith.addf %98, %100 : vector<64x64xf32>
    %cst_137 = arith.constant 0.000000e+00 : f32
    %102 = vector.broadcast %cst_137 : f32 to vector<64x64xf32>
    %103 = arith.cmpf oge, %101, %102 : vector<64x64xf32>
    %cst_138 = arith.constant 0.00999999977 : f32
    %104 = vector.broadcast %cst_138 : f32 to vector<64x64xf32>
    %105 = arith.mulf %104, %101 : vector<64x64xf32>
    %106 = arith.select %103, %101, %105 : vector<64x64xi1>, vector<64x64xf32>
    %107 = arith.truncf %106 : vector<64x64xf32> to vector<64x64xbf16>
    %c0_139 = arith.constant 0 : index
    %c0_140 = arith.constant 0 : index
    %108 = vector.load %arg4[%c0_139, %c0_140] : memref<64x32xbf16, #tpu.memory_space<vmem>>, vector<64x32xbf16>
    %cst_141 = arith.constant dense<0.000000e+00> : vector<64x32xf32>
    %109 = tpu.matmul %107, %108, %cst_141 {dimension_numbers = #tpu.dot_dimension_numbers<[1], [0], [0], [1], [0, 0, 1, 1], [], []>} : vector<64x64xbf16>, vector<64x32xbf16>, vector<64x32xf32> -> vector<64x32xf32>
    %c0_142 = arith.constant 0 : index
    %c0_143 = arith.constant 0 : index
    %110 = vector.load %arg5[%c0_142, %c0_143] : memref<1x32xf32, #tpu.memory_space<vmem>>, vector<1x32xf32>
    %111 = vector.broadcast %110 : vector<1x32xf32> to vector<64x32xf32>
    %112 = arith.addf %109, %111 : vector<64x32xf32>
    %cst_144 = arith.constant 0.000000e+00 : f32
    %113 = vector.broadcast %cst_144 : f32 to vector<64x32xf32>
    %114 = arith.cmpf oge, %112, %113 : vector<64x32xf32>
    %cst_145 = arith.constant 0.00999999977 : f32
    %115 = vector.broadcast %cst_145 : f32 to vector<64x32xf32>
    %116 = arith.mulf %115, %112 : vector<64x32xf32>
    %117 = arith.select %114, %112, %116 : vector<64x32xi1>, vector<64x32xf32>
    %118 = arith.truncf %117 : vector<64x32xf32> to vector<64x32xbf16>
    %c0_146 = arith.constant 0 : index
    %c0_147 = arith.constant 0 : index
    %c0_148 = arith.constant 0 : index
    %119 = vector.load %arg6[%c0_146, %c0_147, %c0_148] : memref<1x64x32xbf16, #tpu.memory_space<vmem>>, vector<1x64x32xbf16>
    %120 = vector.shape_cast %119 : vector<1x64x32xbf16> to vector<64x32xbf16>
    %121 = vector.shape_cast %118 : vector<64x32xbf16> to vector<1x64x32xbf16>
    tpu.vector_store %arg6[%c0_146, %c0_147, %c0_148], %121 {strides = array<i32>} : memref<1x64x32xbf16, #tpu.memory_space<vmem>>, vector<1x64x32xbf16>,
    return
  }
  func.func @transform_0(%arg0: i32) -> (i32, i32, i32, i32, i32) {
    %c0_i32 = arith.constant 0 : i32
    %c0_i32_0 = arith.constant 0 : i32
    %c0_i32_1 = arith.constant 0 : i32
    %c0_i32_2 = arith.constant 0 : i32
    %c0_i32_3 = arith.constant 0 : i32
    return %arg0, %c0_i32, %c0_i32_0, %c0_i32_1, %c0_i32_2 : i32, i32, i32, i32, i32
  }
  func.func @transform_1(%arg0: i32) -> (i32, i32, i32, i32) {
    %c0_i32 = arith.constant 0 : i32
    %c0_i32_0 = arith.constant 0 : i32
    %c0_i32_1 = arith.constant 0 : i32
    %c0_i32_2 = arith.constant 0 : i32
    %c0_i32_3 = arith.constant 0 : i32
    return %c0_i32, %c0_i32_0, %c0_i32_1, %c0_i32_2 : i32, i32, i32, i32
  }
  func.func @transform_2(%arg0: i32) -> (i32, i32) {
    %c0_i32 = arith.constant 0 : i32
    %c0_i32_0 = arith.constant 0 : i32
    %c0_i32_1 = arith.constant 0 : i32
    return %c0_i32, %c0_i32_0 : i32, i32
  }
  func.func @transform_3(%arg0: i32) -> (i32, i32) {
    %c0_i32 = arith.constant 0 : i32
    %c0_i32_0 = arith.constant 0 : i32
    %c0_i32_1 = arith.constant 0 : i32
    return %c0_i32, %c0_i32_0 : i32, i32
  }
  func.func @transform_4(%arg0: i32) -> (i32, i32) {
    %c0_i32 = arith.constant 0 : i32
    %c0_i32_0 = arith.constant 0 : i32
    %c0_i32_1 = arith.constant 0 : i32
    return %c0_i32, %c0_i32_0 : i32, i32
  }
  func.func @transform_5(%arg0: i32) -> (i32, i32, i32) {
    %c0_i32 = arith.constant 0 : i32
    %c0_i32_0 = arith.constant 0 : i32
    %c0_i32_1 = arith.constant 0 : i32
    return %arg0, %c0_i32, %c0_i32_0 : i32, i32, i32
  }
}

module attributes {stable_mosaic.version = 11 : i64} {
  func.func @_fc_head_kernel(%arg0: memref<2x2048xbf16, #tpu.memory_space<vmem>>, %arg1: memref<2048x128xbf16, #tpu.memory_space<vmem>>, %arg2: memref<1x128xf32, #tpu.memory_space<vmem>>, %arg3: memref<128x10xbf16, #tpu.memory_space<vmem>>, %arg4: memref<1x10xf32, #tpu.memory_space<vmem>>, %arg5: memref<2x128xf32, #tpu.memory_space<vmem>>, %arg6: memref<2x10xf32, #tpu.memory_space<vmem>>) attributes {dimension_semantics = [], scalar_prefetch = 0 : i64, scratch_operands = 0 : i64, tpu.core_type = #tpu.core_type<tc>} {
    %c0 = arith.constant 0 : index
    %c0_0 = arith.constant 0 : index
    %0 = vector.load %arg0[%c0, %c0_0] : memref<2x2048xbf16, #tpu.memory_space<vmem>>, vector<2x2048xbf16>
    %c0_1 = arith.constant 0 : index
    %c0_2 = arith.constant 0 : index
    %1 = vector.load %arg1[%c0_1, %c0_2] : memref<2048x128xbf16, #tpu.memory_space<vmem>>, vector<2048x128xbf16>
    %cst = arith.constant dense<0.000000e+00> : vector<2x128xf32>
    %2 = tpu.matmul %0, %1, %cst {dimension_numbers = #tpu.dot_dimension_numbers<[1], [0], [0], [1], [0, 0, 1, 1], [], []>} : vector<2x2048xbf16>, vector<2048x128xbf16>, vector<2x128xf32> -> vector<2x128xf32>
    %c0_3 = arith.constant 0 : index
    %c0_4 = arith.constant 0 : index
    %3 = vector.load %arg2[%c0_3, %c0_4] : memref<1x128xf32, #tpu.memory_space<vmem>>, vector<1x128xf32>
    %4 = vector.broadcast %3 : vector<1x128xf32> to vector<2x128xf32>
    %5 = arith.addf %2, %4 : vector<2x128xf32>
    %c0_5 = arith.constant 0 : index
    %c0_6 = arith.constant 0 : index
    %6 = vector.load %arg5[%c0_5, %c0_6] : memref<2x128xf32, #tpu.memory_space<vmem>>, vector<2x128xf32>
    tpu.vector_store %arg5[%c0_5, %c0_6], %5 {strides = array<i32>} : memref<2x128xf32, #tpu.memory_space<vmem>>, vector<2x128xf32>,
    %cst_7 = arith.constant 0.000000e+00 : f32
    %7 = vector.broadcast %cst_7 : f32 to vector<2x128xf32>
    %8 = arith.cmpf oge, %5, %7 : vector<2x128xf32>
    %cst_8 = arith.constant 0.00999999977 : f32
    %9 = vector.broadcast %cst_8 : f32 to vector<2x128xf32>
    %10 = arith.mulf %9, %5 : vector<2x128xf32>
    %11 = arith.select %8, %5, %10 : vector<2x128xi1>, vector<2x128xf32>
    %12 = arith.truncf %11 : vector<2x128xf32> to vector<2x128xbf16>
    %c0_9 = arith.constant 0 : index
    %c0_10 = arith.constant 0 : index
    %13 = vector.load %arg3[%c0_9, %c0_10] : memref<128x10xbf16, #tpu.memory_space<vmem>>, vector<128x10xbf16>
    %cst_11 = arith.constant dense<0.000000e+00> : vector<2x10xf32>
    %14 = tpu.matmul %12, %13, %cst_11 {dimension_numbers = #tpu.dot_dimension_numbers<[1], [0], [0], [1], [0, 0, 1, 1], [], []>} : vector<2x128xbf16>, vector<128x10xbf16>, vector<2x10xf32> -> vector<2x10xf32>
    %c0_12 = arith.constant 0 : index
    %c0_13 = arith.constant 0 : index
    %15 = vector.load %arg4[%c0_12, %c0_13] : memref<1x10xf32, #tpu.memory_space<vmem>>, vector<1x10xf32>
    %16 = vector.broadcast %15 : vector<1x10xf32> to vector<2x10xf32>
    %17 = arith.addf %14, %16 : vector<2x10xf32>
    %c0_14 = arith.constant 0 : index
    %c0_15 = arith.constant 0 : index
    %18 = vector.load %arg6[%c0_14, %c0_15] : memref<2x10xf32, #tpu.memory_space<vmem>>, vector<2x10xf32>
    tpu.vector_store %arg6[%c0_14, %c0_15], %17 {strides = array<i32>} : memref<2x10xf32, #tpu.memory_space<vmem>>, vector<2x10xf32>,
    return
  }
}

</mosaic_0001>

<bundles_post_ra>
// kernel: cnn_toy_forward.3
= control target key start
LH: loop header
LB: loop body
LE: loop exit
PB: predicated region body
PF: predicated region fallthrough
CT: control target
= control target key end

     0   :  { %s3104_s15 = smov 0   ;;  %s4317_s0 = inlined_call_operand.vmem [shape: bf16[2,324,128], index: 0, kind: input, shape index: {}]   ;;  %s4318_s1 = inlined_call_operand.vmem [shape: bf16[32,64], index: 1, kind: input, shape index: {}]   ;;  %s4319_s2 = inlined_call_operand.vmem [shape: f32[1,64], index: 2, kind: input, shape index: {}]   ;;  %s4320_s3 = inlined_call_operand.vmem [shape: f32[324,1], index: 3, kind: input, shape index: {}]   ;;  %s4321_s4 = inlined_call_operand.vmem [shape: bf16[2,324,64], index: 4, kind: output, shape index: {}]  }
   0x1 LB: > { %s2382_s16 = sadd.s32 4294967295, %s3071_s15   ;;  %p2386_p0 = scmp.ge.s32.totalorder %s3071_s15, 1  ;;  %s3071_s15 = sphi %s3104_s15, %s14_s15  }
   0x2   : > { %p162_p1 = scmp.lt.s32.totalorder %s3071_s15, 3 }
   0x4   : > { %p163_p2 = pnand %p2386_p0, %p162_p1 }
   0x6   : > { %166 = sbr.rel (%p163_p2) target bundleno = 688 (0x2b0), region = 36 }
   0xd   : > { %v3115_v0 = vld [vmem:[%s4318_s1] sm:$0xff]   ;;  %v3073_v1 = vmov 0.0   ;;  %v3123_v2 = vld [vmem:[%s4318_s1 + $0x8] sm:$0xff]   ;;  %vm3074_vm0 = vmmov 0   ;;  %p188_p3 = scmp.lt.s32.totalorder %s2382_s16, 1  ;;  %vm359_vm1 = vcmask 261120  }
   0xe   : > { %2673 = vmatprep.subr.bf16.mxu0 %v3073_v1  ;;  %2761 = vmatprep.subr.bf16.mxu1 %v3073_v1  ;;  %s3075_s25 = smov 96   ;;  %s3076_s26 = smov 64   ;;  %vm2284_vm4 = vcmask 519168  }
   0xf   : > { %2674 = vmatpush3.bf16.msra.mxu0 %v3115_v0  ;;  %2677 = vmatprep.mubr.msk.bf16.mxu0 %vm3074_vm0, %v3073_v1  ;;  %s4382_s16 = smov (!%p188_p3, %s2382_s16), 1  ;;  %s3077_s27 = smov 32  }
  0x10   : > { %2675 = vmatprep.subr.bf16.mxu0 %v3073_v1  ;;  %2762 = vmatpush3.bf16.msra.mxu1 %v3115_v0  ;;  %s3025_s21 = smul.u32 164, %s4382_s16 }
  0x11   : > { %2763 = vmatprep.subr.bf16.mxu1 %v3073_v1  ;;  %2765 = vmatprep.mubr.msk.bf16.mxu1 %vm3074_vm0, %v3073_v1 }
  0x12   : > { %s3143_s24 = scalar_lea.vmem %s4317_s0, %s3025_s21  ;;  %s4108_s22 = scalar_lea.vmem %s4321_s4, %s3025_s21 }
  0x13   : > { %2676 = vmatpush3.bf16.msra.mxu0 %v3123_v2  ;;  %v3044_v3 = vld [vmem:[%s3143_s24] sm:$0xff]   ;;  %v3148_v4 = vld [vmem:[%s3143_s24 + $0x8] sm:$0xff]   ;;  %v3046_v5 = vld [vmem:[%s3143_s24 + $0x10] sm:$0xff]  }
  0x14   : > { %2764 = vmatpush3.bf16.msra.mxu1 %v3123_v2  ;;  %2849 = vmatprep.subr.bf16.mxu0 %v3073_v1  ;;  %v3047_v6 = vld [vmem:[%s3143_s24 + $0x18] sm:$0xff]   ;;  %v3051_v7 = vld [vmem:[%s3143_s24 + $0x20] sm:$0xff]   ;;  %v3048_v8 = vld [vmem:[%s3143_s24 + $0x28] sm:$0xff]  }
  0x15   : > { %2937 = vmatprep.subr.bf16.mxu1 %v3073_v1  ;;  %623 = vrot.lane.b32.xlu0 %v3044_v3, %s3075_s25  ;;  %v3171_v9 = vld [vmem:[%s3143_s24 + $0x38] sm:$0xff]   ;;  %v3056_v10 = vld [vmem:[%s3143_s24 + $0x30] sm:$0xff]   ;;  %v3058_v11 = vld [vmem:[%s3143_s24 + $0x40] sm:$0xff]  }
  0x16   : > { %2678 = vmatmul.mubr.msk.bf16.vlgmr.msra.gmra.mrb[0].mxu0 %vm359_vm1, %v3044_v3  ;;  %627 = vrot.lane.b32.xlu1 %v3046_v5, %s3075_s25  ;;  %v3180_v12 = vld [vmem:[%s3143_s24 + $0x48] sm:$0xff]   ;;  %v3059_v13 = vld [vmem:[%s3143_s24 + $0x50] sm:$0xff]   ;;  %v3052_v14 = vld [vmem:[%s3143_s24 + $0x58] sm:$0xff]  }
  0x17   : > { %2681 = vmatprep.mubr.msk.bf16.mxu0 %vm3074_vm0, %v3073_v1  ;;  %2850 = vmatpush3.bf16.msra.mxu0 %v3115_v0  ;;  %v3192_v15 = vld [vmem:[%s3143_s24 + $0x60] sm:$0xff]   ;;  %v3196_v16 = vld [vmem:[%s3143_s24 + $0x68] sm:$0xff]   ;;  %v3202_v17 = vld [vmem:[%s3143_s24 + $0x70] sm:$0xff]  }
  0x18   : > { %2851 = vmatprep.subr.bf16.mxu0 %v3073_v1  ;;  %v3209_v18 = vld [vmem:[%s3143_s24 + $0x78] sm:$0xff]   ;;  %v3214_v19 = vld [vmem:[%s3143_s24 + $0x80] sm:$0xff]   ;;  %v3219_v20 = vld [vmem:[%s3143_s24 + $0x88] sm:$0xff]  }
  0x19   : > { %625 = vrot.lane.b32.xlu0 %v3148_v4, %s3075_s25  ;;  %v3225_v21 = vld [vmem:[%s3143_s24 + $0x90] sm:$0xff]   ;;  %v3232_v22 = vld [vmem:[%s3143_s24 + $0x98] sm:$0xff]   ;;  %v3237_v23 = vld [vmem:[%s3143_s24 + $0xa0] ss:$0 sps:$4 sm:$0x33]  }
  0x1a   : > { %629 = vrot.lane.b32.xlu1 %v3047_v6, %s3075_s25 }
  0x1b   : > { %2852 = vmatpush3.bf16.msra.mxu0 %v3123_v2 }
  0x1d   : > { %631 = vrot.lane.b32.xlu0 %v3051_v7, %s3075_s25 }
  0x1e   : > { %2682 = vmatmul.mubr.msk.bf16.gmra.mrb[4].mxu0 %vm359_vm1, %v3148_v4  ;;  %633 = vrot.lane.b32.xlu1 %v3048_v8, %s3075_s25 }
  0x1f   : > { %2685 = vmatprep.mubr.msk.bf16.mxu0 %vm3074_vm0, %v3073_v1 }
  0x21   : > { %635 = vrot.lane.b32.xlu0 %v3056_v10, %s3075_s25 }
  0x22   : > { %637 = vrot.lane.b32.xlu1 %v3171_v9, %s3075_s25 }
  0x25   : > { %639 = vrot.lane.b32.xlu0 %v3058_v11, %s3075_s25 }
  0x26   : > { %2686 = vmatmul.mubr.msk.bf16.gmra.mrb[8].mxu0 %vm359_vm1, %v3046_v5  ;;  %641 = vrot.lane.b32.xlu1 %v3180_v12, %s3075_s25 }
  0x27   : > { %2689 = vmatprep.mubr.msk.bf16.mxu0 %vm3074_vm0, %v3073_v1 }
  0x29   : > { %643 = vrot.lane.b32.xlu0 %v3059_v13, %s3075_s25 }
  0x2a   : > { %645 = vrot.lane.b32.xlu1 %v3052_v14, %s3075_s25 }
  0x2d   : > { %647 = vrot.lane.b32.xlu0 %v3192_v15, %s3075_s25 }
  0x2e   : > { %2690 = vmatmul.mubr.msk.bf16.gmra.mrb[12].mxu0 %vm359_vm1, %v3047_v6  ;;  %649 = vrot.lane.b32.xlu1 %v3196_v16, %s3075_s25 }
  0x2f   : > { %2693 = vmatprep.mubr.msk.bf16.mxu0 %vm3074_vm0, %v3073_v1 }
  0x31   : > { %651 = vrot.lane.b32.xlu0 %v3202_v17, %s3075_s25 }
  0x32   : > { %653 = vrot.lane.b32.xlu1 %v3209_v18, %s3075_s25 }
  0x35   : > { %655 = vrot.lane.b32.xlu0 %v3214_v19, %s3075_s25 }
  0x36   : > { %2694 = vmatmul.mubr.msk.bf16.gmra.mrb[16].mxu0 %vm359_vm1, %v3051_v7  ;;  %657 = vrot.lane.b32.xlu1 %v3219_v20, %s3075_s25 }
  0x37   : > { %2697 = vmatprep.mubr.msk.bf16.mxu0 %vm3074_vm0, %v3073_v1 }
  0x39   : > { %659 = vrot.lane.b32.xlu0 %v3225_v21, %s3075_s25 }
  0x3a   : > { %661 = vrot.lane.b32.xlu1 %v3232_v22, %s3075_s25 }
  0x3d   : > { %663 = vrot.lane.b32.xlu0 %v3237_v23, %s3075_s25 }
  0x3e   : > { %2698 = vmatmul.mubr.msk.bf16.gmra.mrb[20].mxu0 %vm359_vm1, %v3048_v8  ;;  %969 = vrot.lane.b32.xlu1 %v3044_v3, %s3076_s26 }
  0x3f   : > { %2701 = vmatprep.mubr.msk.bf16.mxu0 %vm3074_vm0, %v3073_v1 }
  0x41   : > { %1315 = vrot.lane.b32.xlu0 %v3044_v3, %s3077_s27 }
  0x42   : > { %971 = vrot.lane.b32.xlu1 %v3148_v4, %s3076_s26 }
  0x45   : > { %1317 = vrot.lane.b32.xlu0 %v3148_v4, %s3077_s27 }
  0x46   : > { %2702 = vmatmul.mubr.msk.bf16.gmra.mrb[24].mxu0 %vm359_vm1, %v3056_v10  ;;  %973 = vrot.lane.b32.xlu1 %v3046_v5, %s3076_s26 }
  0x47   : > { %2705 = vmatprep.mubr.msk.bf16.mxu0 %vm3074_vm0, %v3073_v1 }
  0x49   : > { %1319 = vrot.lane.b32.xlu0 %v3046_v5, %s3077_s27 }
  0x4a   : > { %975 = vrot.lane.b32.xlu1 %v3047_v6, %s3076_s26 }
  0x4d   : > { %1321 = vrot.lane.b32.xlu0 %v3047_v6, %s3077_s27 }
  0x4e   : > { %2706 = vmatmul.mubr.msk.bf16.gmra.mrb[28].mxu0 %vm359_vm1, %v3171_v9  ;;  %977 = vrot.lane.b32.xlu1 %v3051_v7, %s3076_s26 }
  0x4f   : > { %2709 = vmatprep.mubr.msk.bf16.mxu0 %vm3074_vm0, %v3073_v1 }
  0x51   : > { %1323 = vrot.lane.b32.xlu0 %v3051_v7, %s3077_s27  ;;  %v1832_v7 = vld [vmem:[%s4320_s3] sm:$0xff] }
  0x52   : > { %979 = vrot.lane.b32.xlu1 %v3048_v8, %s3076_s26 }
  0x55   : > { %1325 = vrot.lane.b32.xlu0 %v3048_v8, %s3077_s27 }
  0x56   : > { %2710 = vmatmul.mubr.msk.bf16.gmra.mrb[32].mxu0 %vm359_vm1, %v3058_v11  ;;  %981 = vrot.lane.b32.xlu1 %v3056_v10, %s3076_s26 }
  0x57   : > { %2713 = vmatprep.mubr.msk.bf16.mxu0 %vm3074_vm0, %v3073_v1 }
  0x59   : > { %1327 = vrot.lane.b32.xlu0 %v3056_v10, %s3077_s27 }
  0x5a   : > { %983 = vrot.lane.b32.xlu1 %v3171_v9, %s3076_s26 }
  0x5d   : > { %1329 = vrot.lane.b32.xlu0 %v3171_v9, %s3077_s27  ;;  %v3078_v9 = vmov 0  }
  0x5e   : > { %2714 = vmatmul.mubr.msk.bf16.gmra.mrb[36].mxu0 %vm359_vm1, %v3180_v12  ;;  %985 = vrot.lane.b32.xlu1 %v3058_v11, %s3076_s26 }
  0x5f   : > { %2717 = vmatprep.mubr.msk.bf16.mxu0 %vm3074_vm0, %v3073_v1  ;;  %3040 = vset.pattern.permute.xlu1 %v3078_v9 }
  0x60   : > { %3041 = vset.pattern.permute.xlu0 %v3078_v9 }
  0x61   : > { %1331 = vrot.lane.b32.xlu0 %v3058_v11, %s3077_s27 }
  0x62   : > { %987 = vrot.lane.b32.xlu1 %v3180_v12, %s3076_s26 }
  0x65   : > { %1333 = vrot.lane.b32.xlu0 %v3180_v12, %s3077_s27 }
  0x66   : > { %2718 = vmatmul.mubr.msk.bf16.gmra.mrb[40].mxu0 %vm359_vm1, %v3059_v13  ;;  %989 = vrot.lane.b32.xlu1 %v3059_v13, %s3076_s26 }
  0x67   : > { %2721 = vmatprep.mubr.msk.bf16.mxu0 %vm3074_vm0, %v3073_v1 }
  0x69   : > { %1335 = vrot.lane.b32.xlu0 %v3059_v13, %s3077_s27  ;;  %v1833_v13 = vld [vmem:[%s4320_s3 + $0x8] sm:$0xff] }
  0x6a   : > { %991 = vrot.lane.b32.xlu1 %v3052_v14, %s3076_s26 }
  0x6d   : > { %1337 = vrot.lane.b32.xlu0 %v3052_v14, %s3077_s27 }
  0x6e   : > { %2722 = vmatmul.mubr.msk.bf16.gmra.mrb[44].mxu0 %vm359_vm1, %v3052_v14  ;;  %993 = vrot.lane.b32.xlu1 %v3192_v15, %s3076_s26  ;;  %v1834_v14 = vld [vmem:[%s4320_s3 + $0x10] sm:$0xff] }
  0x6f   : > { %2725 = vmatprep.mubr.msk.bf16.mxu0 %vm3074_vm0, %v3073_v1 }
  0x71   : > { %1339 = vrot.lane.b32.xlu0 %v3192_v15, %s3077_s27 }
  0x72   : > { %995 = vrot.lane.b32.xlu1 %v3196_v16, %s3076_s26 }
  0x75   : > { %1341 = vrot.lane.b32.xlu0 %v3196_v16, %s3077_s27 }
  0x76   : > { %2726 = vmatmul.mubr.msk.bf16.gmra.mrb[48].mxu0 %vm359_vm1, %v3192_v15  ;;  %997 = vrot.lane.b32.xlu1 %v3202_v17, %s3076_s26 }
  0x77   : > { %2729 = vmatprep.mubr.msk.bf16.mxu0 %vm3074_vm0, %v3073_v1 }
  0x79   : > { %1343 = vrot.lane.b32.xlu0 %v3202_v17, %s3077_s27 }
  0x7a   : > { %999 = vrot.lane.b32.xlu1 %v3209_v18, %s3076_s26 }
  0x7d   : > { %1345 = vrot.lane.b32.xlu0 %v3209_v18, %s3077_s27 }
  0x7e   : > { %2730 = vmatmul.mubr.msk.bf16.gmra.mrb[52].mxu0 %vm359_vm1, %v3196_v16  ;;  %1001 = vrot.lane.b32.xlu1 %v3214_v19, %s3076_s26 }
  0x7f   : > { %2733 = vmatprep.mubr.msk.bf16.mxu0 %vm3074_vm0, %v3073_v1 }
  0x81   : > { %1347 = vrot.lane.b32.xlu0 %v3214_v19, %s3077_s27 }
  0x82   : > { %1003 = vrot.lane.b32.xlu1 %v3219_v20, %s3076_s26 }
  0x85   : > { %1349 = vrot.lane.b32.xlu0 %v3219_v20, %s3077_s27 }
  0x86   : > { %2734 = vmatmul.mubr.msk.bf16.gmra.mrb[56].mxu0 %vm359_vm1, %v3202_v17  ;;  %1005 = vrot.lane.b32.xlu1 %v3225_v21, %s3076_s26 }
  0x87   : > { %2737 = vmatprep.mubr.msk.bf16.mxu0 %vm3074_vm0, %v3073_v1  ;;  %v624_v24 = vpop.permute.xlu0 %623 }
  0x88   : > { %2766 = vmatmul.mubr.msk.bf16.vlgmr.msra.gmra.mrb[0].mxu1 %vm359_vm1, %v624_v24  ;;  %v628_v25 = vpop.permute.xlu1 %627 }
  0x89   : > { %2938 = vmatpush3.bf16.msra.mxu1 %v3115_v0  ;;  %2769 = vmatprep.mubr.msk.bf16.mxu1 %vm3074_vm0, %v3073_v1 }
  0x8a   : > { %2939 = vmatprep.subr.bf16.mxu1 %v3073_v1  ;;  %1351 = vrot.lane.b32.xlu0 %v3225_v21, %s3077_s27 }
  0x8b   : > { %1007 = vrot.lane.b32.xlu1 %v3232_v22, %s3076_s26  ;;  %v626_v26 = vpop.permute.xlu0 %625 }
  0x8c   : > { %v630_v27 = vpop.permute.xlu1 %629 }
  0x8d   : > { %2940 = vmatpush3.bf16.msra.mxu1 %v3123_v2 }
  0x8e   : > { %2738 = vmatmul.mubr.msk.bf16.gmra.mrb[60].mxu0 %vm359_vm1, %v3209_v18  ;;  %1353 = vrot.lane.b32.xlu0 %v3232_v22, %s3077_s27 }
  0x8f   : > { %2741 = vmatprep.mubr.msk.bf16.mxu0 %vm3074_vm0, %v3073_v1  ;;  %1009 = vrot.lane.b32.xlu1 %v3237_v23, %s3076_s26  ;;  %v632_v33 = vpop.permute.xlu0 %631 }
  0x90   : > { %2770 = vmatmul.mubr.msk.bf16.gmra.mrb[4].mxu1 %vm359_vm1, %v626_v26  ;;  %v634_v28 = vpop.permute.xlu1 %633 }
  0x91   : > { %2773 = vmatprep.mubr.msk.bf16.mxu1 %vm3074_vm0, %v3073_v1 }
  0x92   : > { %1355 = vrot.lane.b32.xlu0 %v3237_v23, %s3077_s27 }
  0x93   : > { %v636_v37 = vpop.permute.xlu0 %635  ;;  %1875 = vperm.xlu1 %3040, %v1832_v7   ;;  %v1853_v7 = vld [vmem:[%s4320_s3 + $0xa8] sm:$0xff] }
  0x94   : > { %v638_v29 = vpop.permute.xlu1 %637 }
  0x96   : > { %2742 = vmatmul.mubr.msk.bf16.gmra.mrb[64].mxu0 %vm359_vm1, %v3214_v19  ;;  %1880 = vperm.xlu0 %3041, %v1833_v13   ;;  %v1835_v19 = vld [vmem:[%s4320_s3 + $0x18] sm:$0xff] }
  0x97   : > { %2745 = vmatprep.mubr.msk.bf16.mxu0 %vm3074_vm0, %v3073_v1  ;;  %v640_v40 = vpop.permute.xlu0 %639  ;;  %1885 = vperm.xlu1 %3040, %v1834_v14   ;;  %v1855_v14 = vld [vmem:[%s4320_s3 + $0xb8] sm:$0xff] }
  0x98   : > { %2774 = vmatmul.mubr.msk.bf16.gmra.mrb[8].mxu1 %vm359_vm1, %v628_v25  ;;  %v642_v30 = vpop.permute.xlu1 %641 }
  0x99   : > { %2777 = vmatprep.mubr.msk.bf16.mxu1 %vm3074_vm0, %v3073_v1 }
  0x9b   : > { %v644_v43 = vpop.permute.xlu0 %643  ;;  %1890 = vperm.xlu1 %3040, %v1835_v19  }
  0x9c   : > { %v646_v31 = vpop.permute.xlu1 %645 }
  0x9e   : > { %2746 = vmatmul.mubr.msk.bf16.gmra.mrb[68].mxu0 %vm359_vm1, %v3219_v20 }
  0x9f   : > { %2749 = vmatprep.mubr.msk.bf16.mxu0 %vm3074_vm0, %v3073_v1  ;;  %v648_v46 = vpop.permute.xlu0 %647 }
  0xa0   : > { %2778 = vmatmul.mubr.msk.bf16.gmra.mrb[12].mxu1 %vm359_vm1, %v630_v27  ;;  %v650_v32 = vpop.permute.xlu1 %649 }
  0xa1   : > { %2781 = vmatprep.mubr.msk.bf16.mxu1 %vm3074_vm0, %v3073_v1 }
  0xa3   : > { %v652_v57 = vpop.permute.xlu0 %651 }
  0xa4   : > { %v3376_v34 = vpop.permute.xlu1 %653 }
  0xa6   : > { %2750 = vmatmul.mubr.msk.bf16.gmra.mrb[72].mxu0 %vm359_vm1, %v3225_v21 }
  0xa7   : > { %2753 = vmatprep.mubr.msk.bf16.mxu0 %vm3074_vm0, %v3073_v1  ;;  %v656_v5 = vpop.permute.xlu0 %655 }
  0xa8   : > { %2782 = vmatmul.mubr.msk.bf16.gmra.mrb[16].mxu1 %vm359_vm1, %v632_v33  ;;  %v3382_v35 = vpop.permute.xlu1 %657 }
  0xa9   : > { %2785 = vmatprep.mubr.msk.bf16.mxu1 %vm3074_vm0, %v3073_v1 }
  0xab   : > { %v660_v21 = vpop.permute.xlu0 %659 }
  0xac   : > { %v3389_v36 = vpop.permute.xlu1 %661 }
  0xae   : > { %2754 = vmatmul.mubr.msk.bf16.gmra.mrb[76].mxu0 %vm359_vm1, %v3232_v22  ;;  %v1837_v22 = vld [vmem:[%s4320_s3 + $0x28] sm:$0xff] }
  0xaf   : > { %2757 = vmatprep.mubr.msk.bf16.mxu0 %vm3074_vm0, %v3073_v1  ;;  %1900 = vperm.xlu1 %3040, %v1837_v22  }
  0xb0   : > { %2786 = vmatmul.mubr.msk.bf16.gmra.mrb[20].mxu1 %vm359_vm1, %v634_v28  ;;  %v970_v38 = vpop.permute.xlu1 %969  ;;  %v1839_v28 = vld [vmem:[%s4320_s3 + $0x38] sm:$0xff] }
  0xb1   : > { %2789 = vmatprep.mubr.msk.bf16.mxu1 %vm3074_vm0, %v3073_v1 }
  0xb3   : > { %1910 = vperm.xlu1 %3040, %v1839_v28   ;;  %v1859_v28 = vld [vmem:[%s4320_s3 + $0xd8] sm:$0xff] }
  0xb4   : > { %v972_v39 = vpop.permute.xlu1 %971 }
  0xb6   : > { %2758 = vmatmul.mubr.msk.bf16.gmra.mrb[80].mxu0 %vm359_vm1, %v3237_v23  ;;  %v1836_v23 = vld [vmem:[%s4320_s3 + $0x20] sm:$0xff] }
  0xb7   : > { %2853 = vmatprep.mubr.msk.bf16.mxu0 %vm3074_vm0, %v3073_v1  ;;  %1895 = vperm.xlu0 %3041, %v1836_v23  }
  0xb8   : > { %2790 = vmatmul.mubr.msk.bf16.gmra.mrb[24].mxu1 %vm359_vm1, %v636_v37  ;;  %v974_v41 = vpop.permute.xlu1 %973 }
  0xb9   : > { %2793 = vmatprep.mubr.msk.bf16.mxu1 %vm3074_vm0, %v3073_v1 }
  0xbc   : > { %v976_v42 = vpop.permute.xlu1 %975 }
  0xbe   : > { %2854 = vmatmul.mubr.msk.bf16.vlgmr.msra.gmra.mrb[84].mxu0 %vm359_vm1, %v970_v38  ;;  %v1843_v38 = vld [vmem:[%s4320_s3 + $0x58] sm:$0xff] }
  0xbf   : > { %2857 = vmatprep.mubr.msk.bf16.mxu0 %vm3074_vm0, %v3073_v1 }
  0xc0   : > { %2794 = vmatmul.mubr.msk.bf16.gmra.mrb[28].mxu1 %vm359_vm1, %v638_v29  ;;  %v978_v44 = vpop.permute.xlu1 %977  ;;  %v1838_v29 = vld [vmem:[%s4320_s3 + $0x30] sm:$0xff] }
  0xc1   : > { %2797 = vmatprep.mubr.msk.bf16.mxu1 %vm3074_vm0, %v3073_v1  ;;  %1905 = vperm.xlu0 %3041, %v1838_v29   ;;  %v1858_v29 = vld [vmem:[%s4320_s3 + $0xd0] sm:$0xff] }
  0xc4   : > { %v980_v45 = vpop.permute.xlu1 %979 }
  0xc6   : > { %2858 = vmatmul.mubr.msk.bf16.gmra.mrb[88].mxu0 %vm359_vm1, %v972_v39  ;;  %v1842_v39 = vld [vmem:[%s4320_s3 + $0x50] sm:$0xff] }
  0xc7   : > { %2861 = vmatprep.mubr.msk.bf16.mxu0 %vm3074_vm0, %v3073_v1 }
  0xc8   : > { %2798 = vmatmul.mubr.msk.bf16.gmra.mrb[32].mxu1 %vm359_vm1, %v640_v40  ;;  %v982_v49 = vpop.permute.xlu1 %981 }
  0xc9   : > { %2801 = vmatprep.mubr.msk.bf16.mxu1 %vm3074_vm0, %v3073_v1 }
  0xcc   : > { %v984_v54 = vpop.permute.xlu1 %983 }
  0xce   : > { %2862 = vmatmul.mubr.msk.bf16.gmra.mrb[92].mxu0 %vm359_vm1, %v974_v41  ;;  %v1845_v41 = vld [vmem:[%s4320_s3 + $0x68] sm:$0xff] }
  0xcf   : > { %2865 = vmatprep.mubr.msk.bf16.mxu0 %vm3074_vm0, %v3073_v1 }
  0xd0   : > { %2802 = vmatmul.mubr.msk.bf16.gmra.mrb[36].mxu1 %vm359_vm1, %v642_v30  ;;  %v986_v60 = vpop.permute.xlu1 %985 }
  0xd1   : > { %2805 = vmatprep.mubr.msk.bf16.mxu1 %vm3074_vm0, %v3073_v1 }
  0xd4   : > { %v988_v2 = vpop.permute.xlu1 %987 }
  0xd6   : > { %2866 = vmatmul.mubr.msk.bf16.gmra.mrb[96].mxu0 %vm359_vm1, %v976_v42  ;;  %v1844_v42 = vld [vmem:[%s4320_s3 + $0x60] sm:$0xff] }
  0xd7   : > { %2869 = vmatprep.mubr.msk.bf16.mxu0 %vm3074_vm0, %v3073_v1 }
  0xd8   : > { %2806 = vmatmul.mubr.msk.bf16.gmra.mrb[40].mxu1 %vm359_vm1, %v644_v43  ;;  %v990_v10 = vpop.permute.xlu1 %989 }
  0xd9   : > { %2809 = vmatprep.mubr.msk.bf16.mxu1 %vm3074_vm0, %v3073_v1 }
  0xdc   : > { %v992_v17 = vpop.permute.xlu1 %991 }
  0xde   : > { %2870 = vmatmul.mubr.msk.bf16.gmra.mrb[100].mxu0 %vm359_vm1, %v978_v44 }
  0xdf   : > { %2873 = vmatprep.mubr.msk.bf16.mxu0 %vm3074_vm0, %v3073_v1 }
  0xe0   : > { %2810 = vmatmul.mubr.msk.bf16.gmra.mrb[44].mxu1 %vm359_vm1, %v646_v31  ;;  %v994_v26 = vpop.permute.xlu1 %993  ;;  %v1841_v31 = vld [vmem:[%s4320_s3 + $0x48] sm:$0xff] }
  0xe1   : > { %2813 = vmatprep.mubr.msk.bf16.mxu1 %vm3074_vm0, %v3073_v1  ;;  %1920 = vperm.xlu1 %3040, %v1841_v31  }
  0xe5   : > { %1930 = vperm.xlu1 %3040, %v1843_v38  }
  0xe6   : > { %2874 = vmatmul.mubr.msk.bf16.gmra.mrb[104].mxu0 %vm359_vm1, %v980_v45 }
  0xe7   : > { %2877 = vmatprep.mubr.msk.bf16.mxu0 %vm3074_vm0, %v3073_v1 }
  0xe8   : > { %2814 = vmatmul.mubr.msk.bf16.gmra.mrb[48].mxu1 %vm359_vm1, %v648_v46 }
  0xe9   : > { %v3432_v47 = vpop.f32.mrb[0].mxu0  ;;  %2817 = vmatprep.mubr.msk.bf16.mxu1 %vm3074_vm0, %v3073_v1  ;;  %1940 = vperm.xlu1 %3040, %v1845_v41   ;;  %v1862_v41 = vld [vmem:[%s4320_s3 + $0xf0] sm:$0xff] }
  0xea   : > { %v2679_v48 = vpop.f32.mrb[1].mxu0 }
  0xeb   : > { %v3436_v50 = vpop.f32.mrb[2].mxu0  ;;  %v1847_v48 = vld [vmem:[%s4320_s3 + $0x78] sm:$0xff] }
  0xec   : > { %v2680_v51 = vpop.f32.mrb[3].mxu0 }
  0xed   : > { %1950 = vperm.xlu1 %3040, %v1847_v48   ;;  %v1864_v48 = vld [vmem:[%s4320_s3 + $0x100] sm:$0xff] }
  0xee   : > { %2878 = vmatmul.mubr.msk.bf16.gmra.mrb[108].mxu0 %vm359_vm1, %v982_v49  ;;  %v1846_v49 = vld [vmem:[%s4320_s3 + $0x70] sm:$0xff] }
  0xef   : > { %2881 = vmatprep.mubr.msk.bf16.mxu0 %vm3074_vm0, %v3073_v1 }
  0xf0   : > { %2818 = vmatmul.mubr.msk.bf16.gmra.mrb[52].mxu1 %vm359_vm1, %v650_v32  ;;  %v1840_v32 = vld [vmem:[%s4320_s3 + $0x40] sm:$0xff] }
  0xf1   : > { %v3442_v52 = vpop.f32.mrb[4].mxu0  ;;  %2821 = vmatprep.mubr.msk.bf16.mxu1 %vm3074_vm0, %v3073_v1  ;;  %1915 = vperm.xlu0 %3041, %v1840_v32   ;;  %v1861_v32 = vld [vmem:[%s4320_s3 + $0xe8] sm:$0xff] }
  0xf2   : > { %v2683_v53 = vpop.f32.mrb[5].mxu0 }
  0xf3   : > { %v3446_v55 = vpop.f32.mrb[6].mxu0 }
  0xf4   : > { %v2684_v56 = vpop.f32.mrb[7].mxu0 }
  0xf5   : > { %1925 = vperm.xlu0 %3041, %v1842_v39   ;;  %v1848_v56 = vld [vmem:[%s4320_s3 + $0x80] sm:$0xff] }
  0xf6   : > { %2882 = vmatmul.mubr.msk.bf16.gmra.mrb[112].mxu0 %vm359_vm1, %v984_v54  ;;  %v1849_v54 = vld [vmem:[%s4320_s3 + $0x88] sm:$0xff] }
  0xf7   : > { %2885 = vmatprep.mubr.msk.bf16.mxu0 %vm3074_vm0, %v3073_v1  ;;  %1960 = vperm.xlu1 %3040, %v1849_v54  }
  0xf8   : > { %2822 = vmatmul.mubr.msk.bf16.gmra.mrb[56].mxu1 %vm359_vm1, %v652_v57 }
  0xf9   : > { %v3452_v58 = vpop.f32.mrb[8].mxu0  ;;  %2825 = vmatprep.mubr.msk.bf16.mxu1 %vm3074_vm0, %v3073_v1  ;;  %1935 = vperm.xlu0 %3041, %v1844_v42  }
  0xfa   : > { %v2687_v59 = vpop.f32.mrb[9].mxu0 }
  0xfb   : > { %v3456_v61 = vpop.f32.mrb[10].mxu0 }
  0xfc   : > { %v2688_v62 = vpop.f32.mrb[11].mxu0 }
  0xfd   : > { %1945 = vperm.xlu0 %3041, %v1846_v49  }
  0xfe   : > { %2886 = vmatmul.mubr.msk.bf16.gmra.mrb[116].mxu0 %vm359_vm1, %v986_v60 }
  0xff   : > { %2889 = vmatprep.mubr.msk.bf16.mxu0 %vm3074_vm0, %v3073_v1 }
 0x100   : > { %2826 = vmatmul.mubr.msk.bf16.gmra.mrb[60].mxu1 %vm359_vm1, %v3376_v34 }
 0x101   : > { %v3463_v63 = vpop.f32.mrb[12].mxu0  ;;  %2829 = vmatprep.mubr.msk.bf16.mxu1 %vm3074_vm0, %v3073_v1  ;;  %1955 = vperm.xlu0 %3041, %v1848_v56   ;;  %v1867_v56 = vld [vmem:[%s4320_s3 + $0x118] sm:$0xff] }
 0x102   : > { %v2691_v0 = vpop.f32.mrb[13].mxu0 }
 0x103   : > { %v3467_v3 = vpop.f32.mrb[14].mxu0  ;;  %v1851_v0 = vld [vmem:[%s4320_s3 + $0x98] sm:$0xff] }
 0x104   : > { %v2692_v4 = vpop.f32.mrb[15].mxu0  ;;  %1970 = vperm.xlu1 %3040, %v1851_v0  }
 0x106   : > { %2890 = vmatmul.mubr.msk.bf16.gmra.mrb[120].mxu0 %vm359_vm1, %v988_v2  ;;  %v1850_v2 = vld [vmem:[%s4320_s3 + $0x90] sm:$0xff] }
 0x107   : > { %2893 = vmatprep.mubr.msk.bf16.mxu0 %vm3074_vm0, %v3073_v1  ;;  %1965 = vperm.xlu0 %3041, %v1850_v2   ;;  %v1869_v2 = vld [vmem:[%s4320_s3 + $0x128] sm:$0xff] }
 0x108   : > { %2830 = vmatmul.mubr.msk.bf16.gmra.mrb[64].mxu1 %vm359_vm1, %v656_v5  ;;  %1980 = vperm.xlu1 %3040, %v1853_v7  }
 0x109   : > { %v3473_v6 = vpop.f32.mrb[16].mxu0  ;;  %2833 = vmatprep.mubr.msk.bf16.mxu1 %vm3074_vm0, %v3073_v1 }
 0x10a   : > { %v2695_v8 = vpop.f32.mrb[17].mxu0 }
 0x10b   : > { %v3480_v11 = vpop.f32.mrb[18].mxu0  ;;  %v1852_v8 = vld [vmem:[%s4320_s3 + $0xa0] sm:$0xff] }
 0x10c   : > { %v2696_v12 = vpop.f32.mrb[19].mxu0  ;;  %1975 = vperm.xlu0 %3041, %v1852_v8   ;;  %1990 = vperm.xlu1 %3040, %v1855_v14   ;;  %v1870_v14 = vld [vmem:[%s4320_s3 + $0x130] sm:$0xff] }
 0x10e   : > { %2894 = vmatmul.mubr.msk.bf16.gmra.mrb[124].mxu0 %vm359_vm1, %v990_v10 }
 0x10f   : > { %2897 = vmatprep.mubr.msk.bf16.mxu0 %vm3074_vm0, %v3073_v1 }
 0x110   : > { %2834 = vmatmul.mubr.msk.bf16.gmra.mrb[68].mxu1 %vm359_vm1, %v3382_v35  ;;  %v996_v35 = vpop.permute.xlu1 %995 }
 0x111   : > { %v3493_v15 = vpop.f32.mrb[20].mxu0  ;;  %2837 = vmatprep.mubr.msk.bf16.mxu1 %vm3074_vm0, %v3073_v1 }
 0x112   : > { %v2699_v16 = vpop.f32.mrb[21].mxu0 }
 0x113   : > { %v3497_v18 = vpop.f32.mrb[22].mxu0  ;;  %v1854_v16 = vld [vmem:[%s4320_s3 + $0xb0] sm:$0xff] }
 0x114   : > { %v2700_v20 = vpop.f32.mrb[23].mxu0  ;;  %v998_v45 = vpop.permute.xlu1 %997  ;;  %1985 = vperm.xlu0 %3041, %v1854_v16  }
 0x115   : > { %v1857_v20 = vld [vmem:[%s4320_s3 + $0xc8] sm:$0xff] }
 0x116   : > { %2898 = vmatmul.mubr.msk.bf16.gmra.mrb[128].mxu0 %vm359_vm1, %v992_v17  ;;  %2000 = vperm.xlu1 %3040, %v1857_v20  }
 0x117   : > { %2901 = vmatprep.mubr.msk.bf16.mxu0 %vm3074_vm0, %v3073_v1 }
 0x118   : > { %2838 = vmatmul.mubr.msk.bf16.gmra.mrb[72].mxu1 %vm359_vm1, %v660_v21  ;;  %v1000_v60 = vpop.permute.xlu1 %999  ;;  %v1856_v21 = vld [vmem:[%s4320_s3 + $0xc0] sm:$0xff] }
 0x119   : > { %v3512_v24 = vpop.f32.mrb[24].mxu0  ;;  %2841 = vmatprep.mubr.msk.bf16.mxu1 %vm3074_vm0, %v3073_v1  ;;  %1995 = vperm.xlu0 %3041, %v1856_v21  }
 0x11a   : > { %v2703_v25 = vpop.f32.mrb[25].mxu0  ;;  %2010 = vperm.xlu1 %3040, %v1859_v28  }
 0x11b   : > { %v3516_v27 = vpop.f32.mrb[26].mxu0 }
 0x11c   : > { %v2704_v30 = vpop.f32.mrb[27].mxu0  ;;  %v1002_v12 = vpop.permute.xlu1 %1001 }
 0x11d   : > { %2005 = vperm.xlu0 %3041, %v1858_v29   ;;  %v1872_v29 = vld [vmem:[%s4320_s3 + $0x140] sm:$0xf] }
 0x11e   : > { %2902 = vmatmul.mubr.msk.bf16.gmra.mrb[132].mxu0 %vm359_vm1, %v994_v26  ;;  %2020 = vperm.xlu1 %3040, %v1861_v32  }
 0x11f   : > { %2905 = vmatprep.mubr.msk.bf16.mxu0 %vm3074_vm0, %v3073_v1 }
 0x120   : > { %2842 = vmatmul.mubr.msk.bf16.gmra.mrb[76].mxu1 %vm359_vm1, %v3389_v36  ;;  %v664_v36 = vpop.permute.xlu0 %663  ;;  %v1004_v25 = vpop.permute.xlu1 %1003 }
 0x121   : > { %v3535_v33 = vpop.f32.mrb[28].mxu0  ;;  %2845 = vmatprep.mubr.msk.bf16.mxu1 %vm3074_vm0, %v3073_v1 }
 0x122   : > { %v2707_v34 = vpop.f32.mrb[29].mxu0 }
 0x123   : > { %v3539_v37 = vpop.f32.mrb[30].mxu0  ;;  %v1860_v34 = vld [vmem:[%s4320_s3 + $0xe0] sm:$0xff] }
 0x124   : > { %v2708_v40 = vpop.f32.mrb[31].mxu0  ;;  %v1316_v53 = vpop.permute.xlu0 %1315  ;;  %2015 = vperm.xlu0 %3041, %v1860_v34  }
 0x125   : > { %v1006_v39 = vpop.permute.xlu1 %1005 }
 0x126   : > { %2906 = vmatmul.mubr.msk.bf16.gmra.mrb[136].mxu0 %vm359_vm1, %v996_v35 }
 0x127   : > { %2909 = vmatprep.mubr.msk.bf16.mxu0 %vm3074_vm0, %v3073_v1 }
 0x128   : > { %2846 = vmatmul.mubr.msk.bf16.gmra.mrb[80].mxu1 %vm359_vm1, %v664_v36  ;;  %v1318_v5 = vpop.permute.xlu0 %1317  ;;  %v1863_v36 = vld [vmem:[%s4320_s3 + $0xf8] sm:$0xff]  ;;  %2025 = vperm.xlu0 %3041, %v1862_v41  }
 0x129   : > { %v3557_v43 = vpop.f32.mrb[32].mxu0  ;;  %2941 = vmatprep.mubr.msk.bf16.mxu1 %vm3074_vm0, %v3073_v1  ;;  %2030 = vperm.xlu1 %3040, %v1863_v36  }
 0x12a   : > { %v2711_v44 = vpop.f32.mrb[33].mxu0 }
 0x12b   : > { %v3561_v46 = vpop.f32.mrb[34].mxu0 }
 0x12c   : > { %v2712_v51 = vpop.f32.mrb[35].mxu0  ;;  %v1320_v19 = vpop.permute.xlu0 %1319  ;;  %2035 = vperm.xlu0 %3041, %v1864_v48  }
 0x12e   : > { %2910 = vmatmul.mubr.msk.bf16.gmra.mrb[140].mxu0 %vm359_vm1, %v998_v45  ;;  %v1865_v45 = vld [vmem:[%s4320_s3 + $0x108] sm:$0xff] }
 0x12f   : > { %2913 = vmatprep.mubr.msk.bf16.mxu0 %vm3074_vm0, %v3073_v1  ;;  %2040 = vperm.xlu1 %3040, %v1865_v45  }
 0x130   : > { %2942 = vmatmul.mubr.msk.bf16.vlgmr.msra.gmra.mrb[84].mxu1 %vm359_vm1, %v1316_v53  ;;  %v1322_v31 = vpop.permute.xlu0 %1321  ;;  %v1008_v53 = vpop.permute.xlu1 %1007 }
 0x131   : > { %v3579_v57 = vpop.f32.mrb[36].mxu0  ;;  %2945 = vmatprep.mubr.msk.bf16.mxu1 %vm3074_vm0, %v3073_v1 }
 0x132   : > { %v2715_v59 = vpop.f32.mrb[37].mxu0 }
 0x133   : > { %v3583_v62 = vpop.f32.mrb[38].mxu0  ;;  %v1866_v59 = vld [vmem:[%s4320_s3 + $0x110] sm:$0xff]  ;;  %2050 = vperm.xlu1 %3040, %v1867_v56  }
 0x134   : > { %v2716_v4 = vpop.f32.mrb[39].mxu0  ;;  %v1324_v44 = vpop.permute.xlu0 %1323  ;;  %2045 = vperm.xlu0 %3041, %v1866_v59  }
 0x135   : > { %v1868_v4 = vld [vmem:[%s4320_s3 + $0x120] sm:$0xff]  ;;  %v1010_v8 = vpop.permute.xlu1 %1009 }
 0x136   : > { %2914 = vmatmul.mubr.msk.bf16.gmra.mrb[144].mxu0 %vm359_vm1, %v1000_v60 }
 0x137   : > { %2917 = vmatprep.mubr.msk.bf16.mxu0 %vm3074_vm0, %v3073_v1  ;;  %2060 = vperm.xlu1 %3040, %v1869_v2  }
 0x138   : > { %2946 = vmatmul.mubr.msk.bf16.gmra.mrb[88].mxu1 %vm359_vm1, %v1318_v5  ;;  %v1326_v0 = vpop.permute.xlu0 %1325  ;;  %2055 = vperm.xlu0 %3041, %v1868_v4  }
 0x139   : > { %v3601_v9 = vpop.f32.mrb[40].mxu0  ;;  %2949 = vmatprep.mubr.msk.bf16.mxu1 %vm3074_vm0, %v3073_v1 }
 0x13a   : > { %v2719_v10 = vpop.f32.mrb[41].mxu0 }
 0x13b   : > { %v3605_v13 = vpop.f32.mrb[42].mxu0 }
 0x13c   : > { %v2720_v17 = vpop.f32.mrb[43].mxu0  ;;  %2065 = vperm.xlu0 %3041, %v1870_v14  }
 0x13e   : > { %2918 = vmatmul.mubr.msk.bf16.gmra.mrb[148].mxu0 %vm359_vm1, %v1002_v12  ;;  %v1871_v12 = vld [vmem:[%s4320_s3 + $0x138] sm:$0xff] }
 0x13f   : > { %2921 = vmatprep.mubr.msk.bf16.mxu0 %vm3074_vm0, %v3073_v1  ;;  %2070 = vperm.xlu1 %3040, %v1871_v12  }
 0x140   : > { %2950 = vmatmul.mubr.msk.bf16.gmra.mrb[92].mxu1 %vm359_vm1, %v1320_v19  ;;  %2075 = vperm.xlu0 %3041, %v1872_v29  }
 0x141   : > { %v3623_v22 = vpop.f32.mrb[44].mxu0  ;;  %2953 = vmatprep.mubr.msk.bf16.mxu1 %vm3074_vm0, %v3073_v1 }
 0x142   : > { %v2723_v23 = vpop.f32.mrb[45].mxu0 }
 0x143   : > { %v3627_v26 = vpop.f32.mrb[46].mxu0  ;;  %v1328_v23 = vpop.permute.xlu0 %1327 }
 0x144   : > { %v2724_v30 = vpop.f32.mrb[47].mxu0 }
 0x146   : > { %2922 = vmatmul.mubr.msk.bf16.gmra.mrb[152].mxu0 %vm359_vm1, %v1004_v25 }
 0x147   : > { %2925 = vmatprep.mubr.msk.bf16.mxu0 %vm3074_vm0, %v3073_v1 }
 0x148   : > { %2954 = vmatmul.mubr.msk.bf16.gmra.mrb[96].mxu1 %vm359_vm1, %v1322_v31 }
 0x149   : > { %v3645_v35 = vpop.f32.mrb[48].mxu0  ;;  %2957 = vmatprep.mubr.msk.bf16.mxu1 %vm3074_vm0, %v3073_v1 }
 0x14a   : > { %v2727_v38 = vpop.f32.mrb[49].mxu0 }
 0x14b   : > { %v3649_v40 = vpop.f32.mrb[50].mxu0 }
 0x14c   : > { %v2728_v42 = vpop.f32.mrb[51].mxu0 }
 0x14d   : > { %v1330_v42 = vpop.permute.xlu0 %1329 }
 0x14e   : > { %2926 = vmatmul.mubr.msk.bf16.gmra.mrb[156].mxu0 %vm359_vm1, %v1006_v39 }
 0x14f   : > { %2929 = vmatprep.mubr.msk.bf16.mxu0 %vm3074_vm0, %v3073_v1 }
 0x150   : > { %2958 = vmatmul.mubr.msk.bf16.gmra.mrb[100].mxu1 %vm359_vm1, %v1324_v44 }
 0x151   : > { %v3667_v49 = vpop.f32.mrb[52].mxu0  ;;  %2961 = vmatprep.mubr.msk.bf16.mxu1 %vm3074_vm0, %v3073_v1  ;;  %v1332_v4 = vpop.permute.xlu0 %1331 }
 0x152   : > { %v2731_v51 = vpop.f32.mrb[53].mxu0 }
 0x153   : > { %v3671_v54 = vpop.f32.mrb[54].mxu0 }
 0x154   : > { %v2732_v60 = vpop.f32.mrb[55].mxu0 }
 0x156   : > { %2930 = vmatmul.mubr.msk.bf16.gmra.mrb[160].mxu0 %vm359_vm1, %v1008_v53 }
 0x157   : > { %2933 = vmatprep.mubr.msk.bf16.mxu0 %vm3074_vm0, %v3073_v1 }
 0x158   : > { %2962 = vmatmul.mubr.msk.bf16.gmra.mrb[104].mxu1 %vm359_vm1, %v1326_v0 }
 0x159   : > { %v3689_v5 = vpop.f32.mrb[56].mxu0  ;;  %2965 = vmatprep.mubr.msk.bf16.mxu1 %vm3074_vm0, %v3073_v1 }
 0x15a   : > { %v2735_v7 = vpop.f32.mrb[57].mxu0 }
 0x15b   : > { %v3693_v10 = vpop.f32.mrb[58].mxu0  ;;  %v3701_v16 = vpop.f32.mrb[0].mxu1 }
 0x15c   : > { %v2736_v17 = vpop.f32.mrb[59].mxu0  ;;  %v2767_v20 = vpop.f32.mrb[1].mxu1 }
 0x15d   : > { %v3705_v21 = vpop.f32.mrb[2].mxu1 }
 0x15e   : > { %2934 = vmatmul.mubr.msk.bf16.gmra.mrb[164].mxu0 %vm359_vm1, %v1010_v8  ;;  %v2768_v28 = vpop.f32.mrb[3].mxu1 }
 0x160   : > { %2966 = vmatmul.mubr.msk.bf16.gmra.mrb[108].mxu1 %vm359_vm1, %v1328_v23 }
 0x161   : > { %v3714_v30 = vpop.f32.mrb[60].mxu0  ;;  %2969 = vmatprep.mubr.msk.bf16.mxu1 %vm3074_vm0, %v3073_v1 }
 0x162   : > { %v2739_v31 = vpop.f32.mrb[61].mxu0 }
 0x163   : > { %v3718_v32 = vpop.f32.mrb[62].mxu0  ;;  %v3720_v34 = vpop.f32.mrb[4].mxu1 }
 0x164   : > { %v2740_v38 = vpop.f32.mrb[63].mxu0  ;;  %v2771_v36 = vpop.f32.mrb[5].mxu1 }
 0x165   : > { %v3724_v41 = vpop.f32.mrb[6].mxu1  ;;  %v1334_v38 = vpop.permute.xlu0 %1333 }
 0x166   : > { %v2772_v45 = vpop.f32.mrb[7].mxu1 }
 0x168   : > { %2970 = vmatmul.mubr.msk.bf16.gmra.mrb[112].mxu1 %vm359_vm1, %v1330_v42 }
 0x169   : > { %v3729_v48 = vpop.f32.mrb[64].mxu0  ;;  %2973 = vmatprep.mubr.msk.bf16.mxu1 %vm3074_vm0, %v3073_v1 }
 0x16a   : > { %v2743_v51 = vpop.f32.mrb[65].mxu0 }
 0x16b   : > { %v3733_v53 = vpop.f32.mrb[66].mxu0  ;;  %v3735_v56 = vpop.f32.mrb[8].mxu1 }
 0x16c   : > { %v2744_v59 = vpop.f32.mrb[67].mxu0  ;;  %v2775_v0 = vpop.f32.mrb[9].mxu1 }
 0x16d   : > { %v3739_v2 = vpop.f32.mrb[10].mxu1 }
 0x16e   : > { %v2776_v8 = vpop.f32.mrb[11].mxu1 }
 0x170   : > { %2974 = vmatmul.mubr.msk.bf16.gmra.mrb[116].mxu1 %vm359_vm1, %v1332_v4 }
 0x171   : > { %v3744_v12 = vpop.f32.mrb[68].mxu0  ;;  %2977 = vmatprep.mubr.msk.bf16.mxu1 %vm3074_vm0, %v3073_v1 }
 0x172   : > { %v2747_v14 = vpop.f32.mrb[69].mxu0 }
 0x173   : > { %v3748_v17 = vpop.f32.mrb[70].mxu0  ;;  %v3750_v20 = vpop.f32.mrb[12].mxu1 }
 0x174   : > { %v2748_v23 = vpop.f32.mrb[71].mxu0  ;;  %v2779_v29 = vpop.f32.mrb[13].mxu1 }
 0x175   : > { %v3754_v31 = vpop.f32.mrb[14].mxu1  ;;  %v1336_v29 = vpop.permute.xlu0 %1335 }
 0x176   : > { %v2780_v42 = vpop.f32.mrb[15].mxu1 }
 0x178   : > { %2978 = vmatmul.mubr.msk.bf16.gmra.mrb[120].mxu1 %vm359_vm1, %v1334_v38 }
 0x179   : > { %v3759_v45 = vpop.f32.mrb[72].mxu0  ;;  %2981 = vmatprep.mubr.msk.bf16.mxu1 %vm3074_vm0, %v3073_v1 }
 0x17a   : > { %v2751_v51 = vpop.f32.mrb[73].mxu0 }
 0x17b   : > { %v3763_v59 = vpop.f32.mrb[74].mxu0  ;;  %v3765_v0 = vpop.f32.mrb[16].mxu1 }
 0x17c   : > { %v2752_v4 = vpop.f32.mrb[75].mxu0  ;;  %v2783_v14 = vpop.f32.mrb[17].mxu1 }
 0x17d   : > { %v3769_v23 = vpop.f32.mrb[18].mxu1 }
 0x17e   : > { %v2784_v42 = vpop.f32.mrb[19].mxu1 }
 0x17f   : > { %v1338_v42 = vpop.permute.xlu0 %1337 }
 0x180   : > { %2982 = vmatmul.mubr.msk.bf16.gmra.mrb[124].mxu1 %vm359_vm1, %v1336_v29 }
 0x181   : > { %v3774_v36 = vpop.f32.mrb[76].mxu0  ;;  %2985 = vmatprep.mubr.msk.bf16.mxu1 %vm3074_vm0, %v3073_v1 }
 0x182   : > { %4325 = vst [vmem:[#allocation2_spill] sm:$0xff] %v3774_v36  ;;  %v2755_v51 = vpop.f32.mrb[77].mxu0 }
 0x183   : > { %v3778_v4 = vpop.f32.mrb[78].mxu0  ;;  %v3780_v28 = vpop.f32.mrb[20].mxu1 }
 0x184   : > { %4326 = vst [vmem:[#allocation3_spill] sm:$0xff] %v3778_v4  ;;  %v2756_v14 = vpop.f32.mrb[79].mxu0  ;;  %v2787_v7 = vpop.f32.mrb[21].mxu1 }
 0x185   : > { %v3784_v60 = vpop.f32.mrb[22].mxu1  ;;  %v1340_v29 = vpop.permute.xlu0 %1339  ;;  %v4329_v7 = vmax.f32 %v3436_v50, %v3705_v21  ;;  %v4330_v50 = vmax.f32 %v3442_v52, %v3720_v34 }
 0x186   : > { %v2788_v38 = vpop.f32.mrb[23].mxu1 }
 0x188   : > { %2986 = vmatmul.mubr.msk.bf16.gmra.mrb[128].mxu1 %vm359_vm1, %v1338_v42 }
 0x189   : > { %v3789_v44 = vpop.f32.mrb[80].mxu0  ;;  %2989 = vmatprep.mubr.msk.bf16.mxu1 %vm3074_vm0, %v3073_v1 }
 0x18a   : > { %4327 = vst [vmem:[#allocation4_spill] sm:$0xff] %v3789_v44  ;;  %v2759_v51 = vpop.f32.mrb[81].mxu0 }
 0x18b   : > { %v620_v14 = vpop.f32.mrb[82].mxu0  ;;  %v3793_v39 = vpop.f32.mrb[24].mxu1  ;;  %v4328_v51 = vmax.f32 %v3432_v47, %v3701_v16 }
 0x18c   : > { %v2760_v8 = vpop.f32.mrb[83].mxu0  ;;  %v2791_v25 = vpop.f32.mrb[25].mxu1 }
 0x18d   : > { %v3797_v19 = vpop.f32.mrb[26].mxu1  ;;  %v1342_v16 = vpop.permute.xlu0 %1341 }
 0x18e   : > { %v2792_v42 = vpop.f32.mrb[27].mxu1 }
 0x190   : > { %2990 = vmatmul.mubr.msk.bf16.gmra.mrb[132].mxu1 %vm359_vm1, %v1340_v29 }
 0x191   : > { %v1108_v44 = vpop.f32.mrb[84].mxu0  ;;  %2993 = vmatprep.mubr.msk.bf16.mxu1 %vm3074_vm0, %v3073_v1  ;;  %v1344_v34 = vpop.permute.xlu0 %1343 }
 0x192   : > { %v3805_v14 = vmax.f32 %v4328_v51, %v1108_v44  ;;  %v2855_v8 = vpop.f32.mrb[85].mxu0 }
 0x193   : > { %v1111_v25 = vpop.f32.mrb[86].mxu0  ;;  %v3814_v38 = vpop.f32.mrb[28].mxu1 }
 0x194   : > { %v3812_v4 = vmax.f32 %v4329_v7, %v1111_v25  ;;  %v2856_v42 = vpop.f32.mrb[87].mxu0  ;;  %v2795_v36 = vpop.f32.mrb[29].mxu1  ;;  %v4331_v25 = vmax.f32 %v3446_v55, %v3724_v41  ;;  %v4332_v55 = vmax.f32 %v3452_v58, %v3735_v56 }
 0x195   : > { %v3818_v47 = vpop.f32.mrb[30].mxu1  ;;  %v1346_v56 = vpop.permute.xlu0 %1345 }
 0x196   : > { %v2796_v51 = vpop.f32.mrb[31].mxu1 }
 0x198   : > { %2994 = vmatmul.mubr.msk.bf16.gmra.mrb[136].mxu1 %vm359_vm1, %v1342_v16 }
 0x199   : > { %v1116_v8 = vpop.f32.mrb[88].mxu0  ;;  %2997 = vmatprep.mubr.msk.bf16.mxu1 %vm3074_vm0, %v3073_v1 }
 0x19a   : > { %v3826_v21 = vmax.f32 %v4330_v50, %v1116_v8  ;;  %v2859_v7 = vpop.f32.mrb[89].mxu0 }
 0x19b   : > { %v1119_v36 = vpop.f32.mrb[90].mxu0  ;;  %v3835_v44 = vpop.f32.mrb[32].mxu1 }
 0x19c   : > { %v3833_v42 = vmax.f32 %v4331_v25, %v1119_v36  ;;  %v2860_v51 = vpop.f32.mrb[91].mxu0  ;;  %v2799_v29 = vpop.f32.mrb[33].mxu1  ;;  %v4333_v25 = vmax.f32 %v3456_v61, %v3739_v2  ;;  %v4334_v61 = vmax.f32 %v3463_v63, %v3750_v20 }
 0x19d   : > { %v3839_v52 = vpop.f32.mrb[34].mxu1  ;;  %v1348_v20 = vpop.permute.xlu0 %1347 }
 0x19e   : > { %v2800_v50 = vpop.f32.mrb[35].mxu1 }
 0x1a0   : > { %2998 = vmatmul.mubr.msk.bf16.gmra.mrb[140].mxu1 %vm359_vm1, %v1344_v34 }
 0x1a1   : > { %v1124_v7 = vpop.f32.mrb[92].mxu0  ;;  %3001 = vmatprep.mubr.msk.bf16.mxu1 %vm3074_vm0, %v3073_v1 }
 0x1a2   : > { %v3847_v41 = vmax.f32 %v4332_v55, %v1124_v7  ;;  %v2863_v36 = vpop.f32.mrb[93].mxu0 }
 0x1a3   : > { %v1127_v29 = vpop.f32.mrb[94].mxu0  ;;  %v3856_v8 = vpop.f32.mrb[36].mxu1 }
 0x1a4   : > { %v3854_v51 = vmax.f32 %v4333_v25, %v1127_v29  ;;  %v2864_v50 = vpop.f32.mrb[95].mxu0  ;;  %v2803_v16 = vpop.f32.mrb[37].mxu1  ;;  %v4335_v25 = vmax.f32 %v3467_v3, %v3754_v31  ;;  %v4336_v3 = vmax.f32 %v3473_v6, %v3765_v0 }
 0x1a5   : > { %v3860_v58 = vpop.f32.mrb[38].mxu1  ;;  %v1350_v0 = vpop.permute.xlu0 %1349 }
 0x1a6   : > { %v2804_v55 = vpop.f32.mrb[39].mxu1 }
 0x1a8   : > { %3002 = vmatmul.mubr.msk.bf16.gmra.mrb[144].mxu1 %vm359_vm1, %v1346_v56 }
 0x1a9   : > { %v1132_v36 = vpop.f32.mrb[96].mxu0  ;;  %3005 = vmatprep.mubr.msk.bf16.mxu1 %vm3074_vm0, %v3073_v1 }
 0x1aa   : > { %v3868_v2 = vmax.f32 %v4334_v61, %v1132_v36  ;;  %v2867_v29 = vpop.f32.mrb[97].mxu0 }
 0x1ab   : > { %v1135_v16 = vpop.f32.mrb[98].mxu0  ;;  %v3877_v7 = vpop.f32.mrb[40].mxu1 }
 0x1ac   : > { %v3875_v50 = vmax.f32 %v4335_v25, %v1135_v16  ;;  %v2868_v55 = vpop.f32.mrb[99].mxu0  ;;  %v2807_v34 = vpop.f32.mrb[41].mxu1  ;;  %v4337_v25 = vmax.f32 %v3480_v11, %v3769_v23  ;;  %v4338_v11 = vmax.f32 %v3493_v15, %v3780_v28 }
 0x1ad   : > { %v3881_v63 = vpop.f32.mrb[42].mxu1  ;;  %v1352_v28 = vpop.permute.xlu0 %1351 }
 0x1ae   : > { %v2808_v61 = vpop.f32.mrb[43].mxu1 }
 0x1b0   : > { %3006 = vmatmul.mubr.msk.bf16.gmra.mrb[148].mxu1 %vm359_vm1, %v1348_v20 }
 0x1b1   : > { %v1140_v29 = vpop.f32.mrb[100].mxu0  ;;  %3009 = vmatprep.mubr.msk.bf16.mxu1 %vm3074_vm0, %v3073_v1 }
 0x1b2   : > { %v3889_v31 = vmax.f32 %v4336_v3, %v1140_v29  ;;  %v2871_v16 = vpop.f32.mrb[101].mxu0 }
 0x1b3   : > { %v1143_v34 = vpop.f32.mrb[102].mxu0  ;;  %v3898_v36 = vpop.f32.mrb[44].mxu1 }
 0x1b4   : > { %v3896_v55 = vmax.f32 %v4337_v25, %v1143_v34  ;;  %v2872_v61 = vpop.f32.mrb[103].mxu0  ;;  %v2811_v56 = vpop.f32.mrb[45].mxu1  ;;  %v4339_v25 = vmax.f32 %v3497_v18, %v3784_v60  ;;  %v4340_v18 = vmax.f32 %v3512_v24, %v3793_v39 }
 0x1b5   : > { %v3902_v6 = vpop.f32.mrb[46].mxu1  ;;  %v1354_v39 = vpop.permute.xlu0 %1353 }
 0x1b6   : > { %v2812_v3 = vpop.f32.mrb[47].mxu1 }
 0x1b8   : > { %3010 = vmatmul.mubr.msk.bf16.gmra.mrb[152].mxu1 %vm359_vm1, %v1350_v0 }
 0x1b9   : > { %v1148_v16 = vpop.f32.mrb[104].mxu0  ;;  %3013 = vmatprep.mubr.msk.bf16.mxu1 %vm3074_vm0, %v3073_v1 }
 0x1ba   : > { %v3910_v23 = vmax.f32 %v4338_v11, %v1148_v16  ;;  %v2875_v34 = vpop.f32.mrb[105].mxu0 }
 0x1bb   : > { %v1151_v56 = vpop.f32.mrb[106].mxu0  ;;  %v3919_v29 = vpop.f32.mrb[48].mxu1 }
 0x1bc   : > { %v3917_v61 = vmax.f32 %v4339_v25, %v1151_v56  ;;  %v2876_v3 = vpop.f32.mrb[107].mxu0  ;;  %v2815_v20 = vpop.f32.mrb[49].mxu1  ;;  %v4341_v25 = vmax.f32 %v3516_v27, %v3797_v19  ;;  %v4342_v27 = vmax.f32 %v3535_v33, %v3814_v38 }
 0x1bd   : > { %v3923_v15 = vpop.f32.mrb[50].mxu1  ;;  %v1356_v38 = vpop.permute.xlu0 %1355 }
 0x1be   : > { %v2816_v11 = vpop.f32.mrb[51].mxu1 }
 0x1c0   : > { %3014 = vmatmul.mubr.msk.bf16.gmra.mrb[156].mxu1 %vm359_vm1, %v1352_v28 }
 0x1c1   : > { %v1156_v34 = vpop.f32.mrb[108].mxu0  ;;  %3017 = vmatprep.mubr.msk.bf16.mxu1 %vm3074_vm0, %v3073_v1 }
 0x1c2   : > { %v3931_v60 = vmax.f32 %v4340_v18, %v1156_v34  ;;  %v2879_v56 = vpop.f32.mrb[109].mxu0 }
 0x1c3   : > { %v1159_v20 = vpop.f32.mrb[110].mxu0  ;;  %v3940_v16 = vpop.f32.mrb[52].mxu1 }
 0x1c4   : > { %v3938_v3 = vmax.f32 %v4341_v25, %v1159_v20  ;;  %v2880_v11 = vpop.f32.mrb[111].mxu0  ;;  %v2819_v0 = vpop.f32.mrb[53].mxu1  ;;  %v4343_v25 = vmax.f32 %v3539_v37, %v3818_v47  ;;  %v4344_v37 = vmax.f32 %v3557_v43, %v3835_v44 }
 0x1c5   : > { %v3944_v24 = vpop.f32.mrb[54].mxu1 }
 0x1c6   : > { %v2820_v18 = vpop.f32.mrb[55].mxu1 }
 0x1c8   : > { %3018 = vmatmul.mubr.msk.bf16.gmra.mrb[160].mxu1 %vm359_vm1, %v1354_v39 }
 0x1c9   : > { %v1164_v56 = vpop.f32.mrb[112].mxu0  ;;  %3021 = vmatprep.mubr.msk.bf16.mxu1 %vm3074_vm0, %v3073_v1 }
 0x1ca   : > { %v3952_v19 = vmax.f32 %v4342_v27, %v1164_v56  ;;  %v2883_v20 = vpop.f32.mrb[113].mxu0 }
 0x1cb   : > { %v1167_v0 = vpop.f32.mrb[114].mxu0  ;;  %v3961_v34 = vpop.f32.mrb[56].mxu1 }
 0x1cc   : > { %v3959_v11 = vmax.f32 %v4343_v25, %v1167_v0  ;;  %v2884_v18 = vpop.f32.mrb[115].mxu0  ;;  %v2823_v28 = vpop.f32.mrb[57].mxu1 }
 0x1cd   : > { %v3965_v33 = vpop.f32.mrb[58].mxu1  ;;  %v4345_v28 = vmax.f32 %v3561_v46, %v3839_v52 }
 0x1ce   : > { %v2824_v1 = vpop.f32.mrb[59].mxu1 }
 0x1d0   : > { %3022 = vmatmul.mubr.msk.bf16.gmra.mrb[164].mxu1 %vm359_vm1, %v1356_v38 }
 0x1d1   : > { %v1172_v27 = vpop.f32.mrb[116].mxu0 }
 0x1d2   : > { %v3973_v47 = vmax.f32 %v4344_v37, %v1172_v27  ;;  %v2887_v20 = vpop.f32.mrb[117].mxu0  ;;  %v4346_v37 = vmax.f32 %v3579_v57, %v3856_v8 }
 0x1d3   : > { %v1175_v0 = vpop.f32.mrb[118].mxu0  ;;  %v3980_v18 = vpop.f32.mrb[60].mxu1 }
 0x1d4   : > { %v3978_v25 = vmax.f32 %v4345_v28, %v1175_v0  ;;  %v2888_v39 = vpop.f32.mrb[119].mxu0  ;;  %v2827_v56 = vpop.f32.mrb[61].mxu1 }
 0x1d5   : > { %v3984_v38 = vpop.f32.mrb[62].mxu1  ;;  %v4347_v39 = vmax.f32 %v3583_v62, %v3860_v58 }
 0x1d6   : > { %v2828_v44 = vpop.f32.mrb[63].mxu1 }
 0x1d9   : > { %v1180_v27 = vpop.f32.mrb[120].mxu0 }
 0x1da   : > { %v3991_v46 = vmax.f32 %v4346_v37, %v1180_v27  ;;  %v2891_v52 = vpop.f32.mrb[121].mxu0  ;;  %v4348_v37 = vmax.f32 %v3601_v9, %v3877_v7  ;;  %v4359_v9 = vld [vmem:[#allocation2_spill] sm:$0xff] }
 0x1db   : > { %v1183_v20 = vpop.f32.mrb[122].mxu0  ;;  %v3998_v56 = vpop.f32.mrb[64].mxu1 }
 0x1dc   : > { %v3996_v0 = vmax.f32 %v4347_v39, %v1183_v20  ;;  %v2892_v28 = vpop.f32.mrb[123].mxu0  ;;  %v2831_v44 = vpop.f32.mrb[65].mxu1  ;;  %v4349_v20 = vmax.f32 %v3605_v13, %v3881_v63 }
 0x1dd   : > { %v4002_v1 = vpop.f32.mrb[66].mxu1 }
 0x1de   : > { %v2832_v8 = vpop.f32.mrb[67].mxu1 }
 0x1e1   : > { %v1188_v27 = vpop.f32.mrb[124].mxu0 }
 0x1e2   : > { %v4009_v62 = vmax.f32 %v4348_v37, %v1188_v27  ;;  %v2895_v58 = vpop.f32.mrb[125].mxu0  ;;  %v4351_v37 = vmax.f32 %v3623_v22, %v3898_v36 }
 0x1e3   : > { %v1191_v52 = vpop.f32.mrb[126].mxu0  ;;  %v4016_v28 = vpop.f32.mrb[68].mxu1 }
 0x1e4   : > { %v4014_v39 = vmax.f32 %v4349_v20, %v1191_v52  ;;  %v2896_v44 = vpop.f32.mrb[127].mxu0  ;;  %v2835_v8 = vpop.f32.mrb[69].mxu1  ;;  %v4353_v52 = vmax.f32 %v3627_v26, %v3902_v6 }
 0x1e5   : > { %v4020_v43 = vpop.f32.mrb[70].mxu1 }
 0x1e6   : > { %4350 = vst [vmem:[#allocation5_spill] sm:$0xff] %v4014_v39  ;;  %v2836_v7 = vpop.f32.mrb[71].mxu1 }
 0x1e9   : > { %v1196_v27 = vpop.f32.mrb[128].mxu0 }
 0x1ea   : > { %v4027_v13 = vmax.f32 %v4351_v37, %v1196_v27  ;;  %v2899_v63 = vpop.f32.mrb[129].mxu0  ;;  %v4355_v37 = vmax.f32 %v3645_v35, %v3919_v29  ;;  %v4360_v35 = vld [vmem:[#allocation3_spill] sm:$0xff] }
 0x1eb   : > { %v1199_v58 = vpop.f32.mrb[130].mxu0  ;;  %v4034_v44 = vpop.f32.mrb[72].mxu1 }
 0x1ec   : > { %4352 = vst [vmem:[#allocation6_spill] sm:$0xff] %v4027_v13  ;;  %v4032_v20 = vmax.f32 %v4353_v52, %v1199_v58  ;;  %v2900_v8 = vpop.f32.mrb[131].mxu0  ;;  %v2839_v7 = vpop.f32.mrb[73].mxu1  ;;  %v4357_v58 = vmax.f32 %v3649_v40, %v3923_v15 }
 0x1ed   : > { %v4038_v57 = vpop.f32.mrb[74].mxu1 }
 0x1ee   : > { %4354 = vst [vmem:[#allocation7_spill] sm:$0xff] %v4032_v20  ;;  %v2840_v36 = vpop.f32.mrb[75].mxu1 }
 0x1f1   : > { %v1204_v27 = vpop.f32.mrb[132].mxu0 }
 0x1f2   : > { %v4045_v26 = vmax.f32 %v4355_v37, %v1204_v27  ;;  %v2903_v6 = vpop.f32.mrb[133].mxu0 }
 0x1f3   : > { %v1207_v63 = vpop.f32.mrb[134].mxu0  ;;  %v4052_v8 = vpop.f32.mrb[76].mxu1  ;;  %v4361_v6 = vmax.f32 %v3667_v49, %v3940_v16  ;;  %v4364_v49 = vmax.f32 %v3689_v5, %v3961_v34 }
 0x1f4   : > { %4356 = vst [vmem:[#allocation8_spill] sm:$0xff] %v4045_v26  ;;  %v4050_v52 = vmax.f32 %v4357_v58, %v1207_v63  ;;  %v2904_v7 = vpop.f32.mrb[135].mxu0  ;;  %v2843_v36 = vpop.f32.mrb[77].mxu1  ;;  %v4362_v58 = vmax.f32 %v3671_v54, %v3944_v24  ;;  %v4365_v54 = vmax.f32 %v3693_v10, %v3965_v33 }
 0x1f5   : > { %v4056_v20 = vpop.f32.mrb[78].mxu1 }
 0x1f6   : > { %4358 = vst [vmem:[#allocation9_spill] sm:$0xff] %v4050_v52  ;;  %v2844_v27 = vpop.f32.mrb[79].mxu1  ;;  %v4363_v52 = vld [vmem:[#allocation4_spill] sm:$0xff] }
 0x1f9   : > { %v1212_v37 = vpop.f32.mrb[136].mxu0 }
 0x1fa   : > { %v4063_v40 = vmax.f32 %v4361_v6, %v1212_v37  ;;  %v2907_v15 = vpop.f32.mrb[137].mxu0 }
 0x1fb   : > { %v1215_v63 = vpop.f32.mrb[138].mxu0  ;;  %v4070_v36 = vpop.f32.mrb[80].mxu1  ;;  %v4087_v15 = vld [vmem:[%s4319_s2] ss:$0 sm:$0xff] }
 0x1fc   : > { %v4068_v7 = vmax.f32 %v4362_v58, %v1215_v63  ;;  %v2908_v22 = vpop.f32.mrb[139].mxu0  ;;  %v968_v29 = vmax.f32 %v4363_v52, %v4070_v36  ;;  %v2847_v27 = vpop.f32.mrb[81].mxu1 }
 0x1fd   : > { %v925_v26 = vpop.f32.mrb[82].mxu1  ;;  %v1876_v27 = vpop.permute.xlu1 %1875 }
 0x1fe   : > { %v2848_v13 = vpop.f32.mrb[83].mxu1 }
 0x201   : > { %v1220_v39 = vpop.f32.mrb[140].mxu0 }
 0x202   : > { %v4077_v16 = vmax.f32 %v4364_v49, %v1220_v39  ;;  %v2911_v37 = vpop.f32.mrb[141].mxu0 }
 0x203   : > { %v1223_v6 = vpop.f32.mrb[142].mxu0  ;;  %v1454_v22 = vpop.f32.mrb[84].mxu1  ;;  %v4366_v37 = vmax.f32 %v3714_v30, %v3980_v18 }
 0x204   : > { %v4082_v24 = vmax.f32 %v4365_v54, %v1223_v6  ;;  %v2912_v13 = vpop.f32.mrb[143].mxu0  ;;  %v1620_v26 = vmax.f32 %v3805_v14, %v1454_v22  ;;  %v2943_v63 = vpop.f32.mrb[85].mxu1 }
 0x205   : > { %v1457_v5 = vpop.f32.mrb[86].mxu1  ;;  %v1881_v13 = vpop.permute.xlu0 %1880  ;;  %v4367_v63 = vmax.f32 %v3718_v32, %v3984_v38 }
 0x206   : > { %v1668_v34 = vadd.f32 %v4087_v15, %v1620_v26  ;;  %v1621_v39 = vmax.f32 %v3812_v4, %v1457_v5  ;;  %v2944_v58 = vpop.f32.mrb[87].mxu1 }
 0x208   : > { %v1669_v10 = vadd.f32 %v4087_v15, %v1621_v39  ;;  %vm1709_vm2 = vcmp.ge.f32.partialorder %v1668_v34, 0.0  ;;  %v1750_v49 = vmul.f32 0.01, %v1668_v34 }
 0x209   : > { %v1228_v33 = vpop.f32.mrb[144].mxu0 }
 0x20a   : > { %v4096_v6 = vmax.f32 %v4366_v37, %v1228_v33  ;;  %v2915_v14 = vpop.f32.mrb[145].mxu0  ;;  %v1791_v54 = vsel %vm1709_vm2, %v1668_v34, %v1750_v49  ;;  %vm1710_vm3 = vcmp.ge.f32.partialorder %v1669_v10, 0.0  ;;  %v1751_v26 = vmul.f32 0.01, %v1669_v10  ;;  %v1886_v37 = vpop.permute.xlu1 %1885 }
 0x20b   : > { %v1231_v22 = vpop.f32.mrb[146].mxu0  ;;  %v2078_v4 = vmul.f32 %v1876_v27, %v1791_v54  ;;  %v1462_v39 = vpop.f32.mrb[88].mxu1 }
 0x20c   : > { %v4101_v5 = vmax.f32 %v4367_v63, %v1231_v22  ;;  %v2916_v58 = vpop.f32.mrb[147].mxu0  ;;  %v1622_v30 = vmax.f32 %v3826_v21, %v1462_v39  ;;  %v2947_v18 = vpop.f32.mrb[89].mxu1  ;;  %v1792_v34 = vsel %vm1710_vm3, %v1669_v10, %v1751_v26  ;;  %v4368_v10 = vmax.f32 %v3729_v48, %v3998_v56 }
 0x20d   : > { %v2540_v33 = vpack.c.bf16 %v2078_v4, %v2078_v4  ;;  %v2079_v27 = vmul.f32 %v1881_v13, %v1792_v34  ;;  %v1465_v32 = vpop.f32.mrb[90].mxu1 }
 0x20e   : > { %v1670_v38 = vadd.f32 %v4087_v15, %v1622_v30  ;;  %v1623_v49 = vmax.f32 %v3833_v42, %v1465_v32  ;;  %v2948_v14 = vpop.f32.mrb[91].mxu1  ;;  %v4369_v30 = vmax.f32 %v3733_v53, %v4002_v1 }
 0x20f   : > { %2285 = vst.msk [vmem:[%s4108_s22] sm:$0xf] %vm2284_vm4, %v2540_v33  ;;  %v2541_v54 = vpack.c.bf16 %v2079_v27, %v2079_v27  ;;  %v1891_v27 = vpop.permute.xlu1 %1890 }
 0x210   : > { %v1671_v22 = vadd.f32 %v4087_v15, %v1623_v49  ;;  %vm1711_vm5 = vcmp.ge.f32.partialorder %v1670_v38, 0.0  ;;  %v1752_v63 = vmul.f32 0.01, %v1670_v38 }
 0x211   : > { %v1236_v21 = vpop.f32.mrb[148].mxu0  ;;  %2286 = vst.msk [vmem:[%s4108_s22 + $0x4] sm:$0xf] %vm2284_vm4, %v2541_v54 }
 0x212   : > { %v4121_v13 = vmax.f32 %v4368_v10, %v1236_v21  ;;  %v2919_v26 = vpop.f32.mrb[149].mxu0  ;;  %v1793_v4 = vsel %vm1711_vm5, %v1670_v38, %v1752_v63  ;;  %vm1712_vm6 = vcmp.ge.f32.partialorder %v1671_v22, 0.0  ;;  %v1753_v42 = vmul.f32 0.01, %v1671_v22 }
 0x213   : > { %v1239_v39 = vpop.f32.mrb[150].mxu0  ;;  %v2080_v58 = vmul.f32 %v1886_v37, %v1793_v4  ;;  %v1470_v34 = vpop.f32.mrb[92].mxu1 }
 0x214   : > { %v4126_v18 = vmax.f32 %v4369_v30, %v1239_v39  ;;  %v2920_v33 = vpop.f32.mrb[151].mxu0  ;;  %v1794_v32 = vsel %vm1712_vm6, %v1671_v22, %v1753_v42  ;;  %v1624_v48 = vmax.f32 %v3847_v41, %v1470_v34  ;;  %v2951_v56 = vpop.f32.mrb[93].mxu1  ;;  %v4370_v41 = vmax.f32 %v3744_v12, %v4016_v28 }
 0x215   : > { %v2542_v49 = vpack.c.bf16 %v2080_v58, %v2080_v58  ;;  %v2081_v38 = vmul.f32 %v1891_v27, %v1794_v32  ;;  %v1473_v14 = vpop.f32.mrb[94].mxu1  ;;  %v4371_v30 = vmax.f32 %v3748_v17, %v4020_v43  ;;  %v1901_v32 = vpop.permute.xlu1 %1900 }
 0x216   : > { %v1672_v54 = vadd.f32 %v4087_v15, %v1624_v48  ;;  %v1625_v37 = vmax.f32 %v3854_v51, %v1473_v14  ;;  %v2952_v63 = vpop.f32.mrb[95].mxu1  ;;  %v1896_v51 = vpop.permute.xlu0 %1895 }
 0x217   : > { %2287 = vst.msk [vmem:[%s4108_s22 + $0x8] sm:$0xf] %vm2284_vm4, %v2542_v49  ;;  %v2543_v53 = vpack.c.bf16 %v2081_v38, %v2081_v38 }
 0x218   : > { %v1673_v1 = vadd.f32 %v4087_v15, %v1625_v37  ;;  %vm1713_vm7 = vcmp.ge.f32.partialorder %v1672_v54, 0.0  ;;  %v1754_v21 = vmul.f32 0.01, %v1672_v54 }
 0x219   : > { %v1244_v10 = vpop.f32.mrb[152].mxu0  ;;  %2288 = vst.msk [vmem:[%s4108_s22 + $0xc] sm:$0xf] %vm2284_vm4, %v2543_v53 }
 0x21a   : > { %v4139_v22 = vmax.f32 %v4370_v41, %v1244_v10  ;;  %v2923_v26 = vpop.f32.mrb[153].mxu0  ;;  %vm1714_vm8 = vcmp.ge.f32.partialorder %v1673_v1, 0.0  ;;  %v1755_v4 = vmul.f32 0.01, %v1673_v1  ;;  %v1795_v42 = vsel %vm1713_vm7, %v1672_v54, %v1754_v21  ;;  %v1906_v10 = vpop.permute.xlu0 %1905 }
 0x21b   : > { %v1247_v39 = vpop.f32.mrb[154].mxu0  ;;  %v2082_v58 = vmul.f32 %v1896_v51, %v1795_v42  ;;  %v1478_v33 = vpop.f32.mrb[96].mxu1  ;;  %v4373_v51 = vmax.f32 %v3763_v59, %v4038_v57 }
 0x21c   : > { %v4144_v34 = vmax.f32 %v4371_v30, %v1247_v39  ;;  %v2924_v27 = vpop.f32.mrb[155].mxu0  ;;  %v1796_v12 = vsel %vm1714_vm8, %v1673_v1, %v1755_v4  ;;  %v1626_v28 = vmax.f32 %v3868_v2, %v1478_v33  ;;  %v2955_v48 = vpop.f32.mrb[97].mxu1  ;;  %v4372_v2 = vmax.f32 %v3759_v45, %v4034_v44 }
 0x21d   : > { %v2083_v56 = vmul.f32 %v1901_v32, %v1796_v12  ;;  %v2544_v49 = vpack.c.bf16 %v2082_v58, %v2082_v58  ;;  %v1481_v38 = vpop.f32.mrb[98].mxu1  ;;  %v1911_v30 = vpop.permute.xlu1 %1910 }
 0x21e   : > { %v1674_v14 = vadd.f32 %v4087_v15, %v1626_v28  ;;  %v1627_v54 = vmax.f32 %v3875_v50, %v1481_v38  ;;  %v2956_v37 = vpop.f32.mrb[99].mxu1 }
 0x21f   : > { %v2545_v63 = vpack.c.bf16 %v2083_v56, %v2083_v56  ;;  %2289 = vst.msk [vmem:[%s4108_s22 + $0x10] sm:$0xf] %vm2284_vm4, %v2544_v49  ;;  %v1916_v37 = vpop.permute.xlu0 %1915 }
 0x220   : > { %vm1715_vm9 = vcmp.ge.f32.partialorder %v1674_v14, 0.0  ;;  %v1756_v17 = vmul.f32 0.01, %v1674_v14  ;;  %v1675_v43 = vadd.f32 %v4087_v15, %v1627_v54 }
 0x221   : > { %v1252_v53 = vpop.f32.mrb[156].mxu0  ;;  %2290 = vst.msk [vmem:[%s4108_s22 + $0x14] sm:$0xf] %vm2284_vm4, %v2545_v63 }
 0x222   : > { %v4157_v1 = vmax.f32 %v4372_v2, %v1252_v53  ;;  %v2927_v21 = vpop.f32.mrb[157].mxu0  ;;  %v1797_v41 = vsel %vm1715_vm9, %v1674_v14, %v1756_v17  ;;  %vm1716_vm10 = vcmp.ge.f32.partialorder %v1675_v43, 0.0  ;;  %v1757_v50 = vmul.f32 0.01, %v1675_v43 }
 0x223   : > { %v1255_v26 = vpop.f32.mrb[158].mxu0  ;;  %v2084_v4 = vmul.f32 %v1906_v10, %v1797_v41  ;;  %v1486_v39 = vpop.f32.mrb[100].mxu1  ;;  %v4375_v53 = vmax.f32 %v4360_v35, %v4056_v20 }
 0x224   : > { %v4162_v42 = vmax.f32 %v4373_v51, %v1255_v26  ;;  %v2928_v58 = vpop.f32.mrb[159].mxu0  ;;  %v1798_v45 = vsel %vm1716_vm10, %v1675_v43, %v1757_v50  ;;  %v1628_v44 = vmax.f32 %v3889_v31, %v1486_v39  ;;  %v2959_v33 = vpop.f32.mrb[101].mxu1  ;;  %v4374_v31 = vmax.f32 %v4359_v9, %v4052_v8 }
 0x225   : > { %v2546_v27 = vpack.c.bf16 %v2084_v4, %v2084_v4  ;;  %v2085_v32 = vmul.f32 %v1911_v30, %v1798_v45  ;;  %v1489_v12 = vpop.f32.mrb[102].mxu1  ;;  %v1921_v41 = vpop.permute.xlu1 %1920 }
 0x226   : > { %v1676_v28 = vadd.f32 %v4087_v15, %v1628_v44  ;;  %v1629_v48 = vmax.f32 %v3896_v55, %v1489_v12  ;;  %v2960_v56 = vpop.f32.mrb[103].mxu1 }
 0x227   : > { %2291 = vst.msk [vmem:[%s4108_s22 + $0x18] sm:$0xf] %vm2284_vm4, %v2546_v27  ;;  %v2547_v59 = vpack.c.bf16 %v2085_v32, %v2085_v32  ;;  %v1926_v27 = vpop.permute.xlu0 %1925 }
 0x228   : > { %vm1717_vm11 = vcmp.ge.f32.partialorder %v1676_v28, 0.0  ;;  %v1758_v57 = vmul.f32 0.01, %v1676_v28  ;;  %v1677_v49 = vadd.f32 %v4087_v15, %v1629_v48 }
 0x229   : > { %v1260_v38 = vpop.f32.mrb[160].mxu0  ;;  %2292 = vst.msk [vmem:[%s4108_s22 + $0x1c] sm:$0xf] %vm2284_vm4, %v2547_v59  ;;  %v1931_v59 = vpop.permute.xlu1 %1930 }
 0x22a   : > { %v4175_v14 = vmax.f32 %v4374_v31, %v1260_v38  ;;  %v2931_v54 = vpop.f32.mrb[161].mxu0  ;;  %v1799_v63 = vsel %vm1717_vm11, %v1676_v28, %v1758_v57  ;;  %vm1718_vm12 = vcmp.ge.f32.partialorder %v1677_v49, 0.0  ;;  %v1759_v55 = vmul.f32 0.01, %v1677_v49 }
 0x22b   : > { %v1263_v17 = vpop.f32.mrb[162].mxu0  ;;  %v2086_v43 = vmul.f32 %v1916_v37, %v1799_v63  ;;  %v1494_v21 = vpop.f32.mrb[104].mxu1 }
 0x22c   : > { %v4180_v2 = vmax.f32 %v4375_v53, %v1263_v17  ;;  %v2932_v10 = vpop.f32.mrb[163].mxu0  ;;  %v1800_v9 = vsel %vm1718_vm12, %v1677_v49, %v1759_v55  ;;  %v1630_v8 = vmax.f32 %v3910_v23, %v1494_v21  ;;  %v2963_v50 = vpop.f32.mrb[105].mxu1 }
 0x22d   : > { %v2548_v26 = vpack.c.bf16 %v2086_v43, %v2086_v43  ;;  %v2087_v4 = vmul.f32 %v1921_v41, %v1800_v9  ;;  %v1497_v51 = vpop.f32.mrb[106].mxu1  ;;  %v1936_v43 = vpop.permute.xlu0 %1935 }
 0x22e   : > { %v1678_v39 = vadd.f32 %v4087_v15, %v1630_v8  ;;  %v1631_v58 = vmax.f32 %v3917_v61, %v1497_v51  ;;  %v2964_v30 = vpop.f32.mrb[107].mxu1  ;;  %v1941_v41 = vpop.permute.xlu1 %1940 }
 0x22f   : > { %2293 = vst.msk [vmem:[%s4108_s22 + $0x20] sm:$0xf] %vm2284_vm4, %v2548_v26  ;;  %v2549_v20 = vpack.c.bf16 %v2087_v4, %v2087_v4 }
 0x230   : > { %vm1719_vm13 = vcmp.ge.f32.partialorder %v1678_v39, 0.0  ;;  %v1760_v35 = vmul.f32 0.01, %v1678_v39  ;;  %v1679_v45 = vadd.f32 %v4087_v15, %v1631_v58 }
 0x231   : > { %v1268_v44 = vpop.f32.mrb[164].mxu0  ;;  %2294 = vst.msk [vmem:[%s4108_s22 + $0x24] sm:$0xf] %vm2284_vm4, %v2549_v20 }
 0x232   : > { %v4193_v23 = vmax.f32 %v968_v29, %v1268_v44  ;;  %v2935_v33 = vpop.f32.mrb[165].mxu0  ;;  %v1801_v32 = vsel %vm1719_vm13, %v1678_v39, %v1760_v35  ;;  %vm1720_vm14 = vcmp.ge.f32.partialorder %v1679_v45, 0.0  ;;  %v1761_v61 = vmul.f32 0.01, %v1679_v45 }
 0x233   : > { %v1271_v12 = vpop.f32.mrb[166].mxu0  ;;  %v2088_v28 = vmul.f32 %v1926_v27, %v1801_v32  ;;  %v1502_v48 = vpop.f32.mrb[108].mxu1 }
 0x234   : > { %v2936_v56 = vpop.f32.mrb[167].mxu0  ;;  %v1802_v57 = vsel %vm1720_vm14, %v1679_v45, %v1761_v61  ;;  %v1632_v49 = vmax.f32 %v3931_v60, %v1502_v48  ;;  %v2967_v38 = vpop.f32.mrb[109].mxu1 }
 0x235   : > { %v2550_v31 = vpack.c.bf16 %v2088_v28, %v2088_v28  ;;  %v2089_v52 = vmul.f32 %v1931_v59, %v1802_v57  ;;  %v1505_v29 = vpop.f32.mrb[110].mxu1  ;;  %v1946_v45 = vpop.permute.xlu0 %1945 }
 0x236   : > { %v1680_v36 = vadd.f32 %v4087_v15, %v1632_v49  ;;  %v1633_v54 = vmax.f32 %v3938_v3, %v1505_v29  ;;  %v2968_v37 = vpop.f32.mrb[111].mxu1  ;;  %v1951_v32 = vpop.permute.xlu1 %1950 }
 0x237   : > { %2295 = vst.msk [vmem:[%s4108_s22 + $0x28] sm:$0xf] %vm2284_vm4, %v2550_v31  ;;  %v2551_v63 = vpack.c.bf16 %v2089_v52, %v2089_v52 }
 0x238   : > { %vm1721_vm15 = vcmp.ge.f32.partialorder %v1680_v36, 0.0  ;;  %v1762_v55 = vmul.f32 0.01, %v1680_v36  ;;  %v1681_v17 = vadd.f32 %v4087_v15, %v1633_v54 }
 0x239   : > { %2296 = vst.msk [vmem:[%s4108_s22 + $0x2c] sm:$0xf] %vm2284_vm4, %v2551_v63  ;;  %v1956_v29 = vpop.permute.xlu0 %1955 }
 0x23a   : > { %v1803_v60 = vsel %vm1721_vm15, %v1680_v36, %v1762_v55  ;;  %vm1722_vm0 = vcmp.ge.f32.partialorder %v1681_v17, 0.0  ;;  %v1763_v53 = vmul.f32 0.01, %v1681_v17  ;;  %v1961_v63 = vpop.permute.xlu1 %1960 }
 0x23b   : > { %v2090_v21 = vmul.f32 %v1936_v43, %v1803_v60  ;;  %v1510_v10 = vpop.f32.mrb[112].mxu1 }
 0x23c   : > { %v1804_v3 = vsel %vm1722_vm0, %v1681_v17, %v1763_v53  ;;  %v1634_v9 = vmax.f32 %v3952_v19, %v1510_v10  ;;  %v2971_v8 = vpop.f32.mrb[113].mxu1 }
 0x23d   : > { %v2552_v50 = vpack.c.bf16 %v2090_v21, %v2090_v21  ;;  %v2091_v26 = vmul.f32 %v1941_v41, %v1804_v3  ;;  %v1513_v4 = vpop.f32.mrb[114].mxu1 }
 0x23e   : > { %v1682_v51 = vadd.f32 %v4087_v15, %v1634_v9  ;;  %v1635_v39 = vmax.f32 %v3959_v11, %v1513_v4  ;;  %v2972_v58 = vpop.f32.mrb[115].mxu1 }
 0x23f   : > { %2297 = vst.msk [vmem:[%s4108_s22 + $0x30] sm:$0xf] %vm2284_vm4, %v2552_v50  ;;  %v2553_v30 = vpack.c.bf16 %v2091_v26, %v2091_v26  ;;  %v1966_v50 = vpop.permute.xlu0 %1965 }
 0x240   : > { %vm1723_vm1 = vcmp.ge.f32.partialorder %v1682_v51, 0.0  ;;  %v1764_v20 = vmul.f32 0.01, %v1682_v51  ;;  %v1683_v35 = vadd.f32 %v4087_v15, %v1635_v39  ;;  %v1971_v39 = vpop.permute.xlu1 %1970 }
 0x241   : > { %2298 = vst.msk [vmem:[%s4108_s22 + $0x34] sm:$0xf] %vm2284_vm4, %v2553_v30 }
 0x242   : > { %v1805_v19 = vsel %vm1723_vm1, %v1682_v51, %v1764_v20  ;;  %vm1724_vm2 = vcmp.ge.f32.partialorder %v1683_v35, 0.0  ;;  %v1765_v44 = vmul.f32 0.01, %v1683_v35 }
 0x243   : > { %v2092_v33 = vmul.f32 %v1946_v45, %v1805_v19  ;;  %v1518_v27 = vpop.f32.mrb[116].mxu1 }
 0x244   : > { %v1806_v11 = vsel %vm1724_vm2, %v1683_v35, %v1765_v44  ;;  %v1636_v61 = vmax.f32 %v3973_v47, %v1518_v27  ;;  %v2975_v12 = vpop.f32.mrb[117].mxu1  ;;  %v4376_v44 = vld [vmem:[#allocation5_spill] sm:$0xff] }
 0x245   : > { %v2554_v28 = vpack.c.bf16 %v2092_v33, %v2092_v33  ;;  %v2093_v48 = vmul.f32 %v1951_v32, %v1806_v11  ;;  %v1521_v56 = vpop.f32.mrb[118].mxu1  ;;  %v1976_v12 = vpop.permute.xlu0 %1975 }
 0x246   : > { %v1684_v59 = vadd.f32 %v4087_v15, %v1636_v61  ;;  %v1637_v57 = vmax.f32 %v3978_v25, %v1521_v56  ;;  %v2976_v49 = vpop.f32.mrb[119].mxu1 }
 0x247   : > { %2299 = vst.msk [vmem:[%s4108_s22 + $0x38] sm:$0xf] %vm2284_vm4, %v2554_v28  ;;  %v2555_v38 = vpack.c.bf16 %v2093_v48, %v2093_v48  ;;  %v4377_v49 = vld [vmem:[#allocation6_spill] sm:$0xff] }
 0x248   : > { %vm1725_vm3 = vcmp.ge.f32.partialorder %v1684_v59, 0.0  ;;  %v1766_v31 = vmul.f32 0.01, %v1684_v59  ;;  %v1685_v52 = vadd.f32 %v4087_v15, %v1637_v57 }
 0x249   : > { %2300 = vst.msk [vmem:[%s4108_s22 + $0x3c] sm:$0xf] %vm2284_vm4, %v2555_v38 }
 0x24a   : > { %v1807_v47 = vsel %vm1725_vm3, %v1684_v59, %v1766_v31  ;;  %vm1726_vm5 = vcmp.ge.f32.partialorder %v1685_v52, 0.0  ;;  %v1767_v36 = vmul.f32 0.01, %v1685_v52  ;;  %v1981_v59 = vpop.permute.xlu1 %1980 }
 0x24b   : > { %v2094_v54 = vmul.f32 %v1956_v29, %v1807_v47  ;;  %v1526_v37 = vpop.f32.mrb[120].mxu1 }
 0x24c   : > { %v1808_v25 = vsel %vm1726_vm5, %v1685_v52, %v1767_v36  ;;  %v1638_v55 = vmax.f32 %v3991_v46, %v1526_v37  ;;  %v2979_v17 = vpop.f32.mrb[121].mxu1 }
 0x24d   : > { %v2556_v43 = vpack.c.bf16 %v2094_v54, %v2094_v54  ;;  %v2095_v60 = vmul.f32 %v1961_v63, %v1808_v25  ;;  %v1529_v53 = vpop.f32.mrb[122].mxu1  ;;  %v4378_v54 = vld [vmem:[#allocation7_spill] sm:$0xff] }
 0x24e   : > { %v1686_v21 = vadd.f32 %v4087_v15, %v1638_v55  ;;  %v1639_v10 = vmax.f32 %v3996_v0, %v1529_v53  ;;  %v2980_v41 = vpop.f32.mrb[123].mxu1 }
 0x24f   : > { %2301 = vst.msk [vmem:[%s4108_s22 + $0x40] sm:$0xf] %vm2284_vm4, %v2556_v43  ;;  %v2557_v3 = vpack.c.bf16 %v2095_v60, %v2095_v60  ;;  %v1986_v43 = vpop.permute.xlu0 %1985  ;;  %v1991_v41 = vpop.permute.xlu1 %1990 }
 0x250   : > { %vm1727_vm6 = vcmp.ge.f32.partialorder %v1686_v21, 0.0  ;;  %v1768_v9 = vmul.f32 0.01, %v1686_v21  ;;  %v1687_v8 = vadd.f32 %v4087_v15, %v1639_v10 }
 0x251   : > { %2302 = vst.msk [vmem:[%s4108_s22 + $0x44] sm:$0xf] %vm2284_vm4, %v2557_v3 }
 0x252   : > { %v1809_v46 = vsel %vm1727_vm6, %v1686_v21, %v1768_v9  ;;  %vm1728_vm7 = vcmp.ge.f32.partialorder %v1687_v8, 0.0  ;;  %v1769_v26 = vmul.f32 0.01, %v1687_v8  ;;  %v4379_v9 = vld [vmem:[#allocation8_spill] sm:$0xff] }
 0x253   : > { %v2096_v4 = vmul.f32 %v1966_v50, %v1809_v46  ;;  %v1534_v51 = vpop.f32.mrb[124].mxu1 }
 0x254   : > { %v1810_v0 = vsel %vm1728_vm7, %v1687_v8, %v1769_v26  ;;  %v1640_v58 = vmax.f32 %v4009_v62, %v1534_v51  ;;  %v2983_v30 = vpop.f32.mrb[125].mxu1 }
 0x255   : > { %v2558_v20 = vpack.c.bf16 %v2096_v4, %v2096_v4  ;;  %v2097_v35 = vmul.f32 %v1971_v39, %v1810_v0  ;;  %v1537_v45 = vpop.f32.mrb[126].mxu1  ;;  %v4380_v39 = vld [vmem:[#allocation9_spill] sm:$0xff] }
 0x256   : > { %v1688_v19 = vadd.f32 %v4087_v15, %v1640_v58  ;;  %v1641_v33 = vmax.f32 %v4376_v44, %v1537_v45  ;;  %v2984_v27 = vpop.f32.mrb[127].mxu1  ;;  %v1996_v45 = vpop.permute.xlu0 %1995 }
 0x257   : > { %2303 = vst.msk [vmem:[%s4108_s22 + $0x48] sm:$0xf] %vm2284_vm4, %v2558_v20  ;;  %v2559_v32 = vpack.c.bf16 %v2097_v35, %v2097_v35 }
 0x258   : > { %vm1729_vm8 = vcmp.ge.f32.partialorder %v1688_v19, 0.0  ;;  %v1770_v11 = vmul.f32 0.01, %v1688_v19  ;;  %v1689_v61 = vadd.f32 %v4087_v15, %v1641_v33 }
 0x259   : > { %2304 = vst.msk [vmem:[%s4108_s22 + $0x4c] sm:$0xf] %vm2284_vm4, %v2559_v32  ;;  %v2001_v32 = vpop.permute.xlu1 %2000 }
 0x25a   : > { %v1811_v62 = vsel %vm1729_vm8, %v1688_v19, %v1770_v11  ;;  %vm1730_vm9 = vcmp.ge.f32.partialorder %v1689_v61, 0.0  ;;  %v1771_v28 = vmul.f32 0.01, %v1689_v61 }
 0x25b   : > { %v2098_v48 = vmul.f32 %v1976_v12, %v1811_v62  ;;  %v1542_v56 = vpop.f32.mrb[128].mxu1 }
 0x25c   : > { %v1812_v57 = vsel %vm1730_vm9, %v1689_v61, %v1771_v28  ;;  %v1642_v38 = vmax.f32 %v4377_v49, %v1542_v56  ;;  %v2987_v31 = vpop.f32.mrb[129].mxu1 }
 0x25d   : > { %v2560_v52 = vpack.c.bf16 %v2098_v48, %v2098_v48  ;;  %v2099_v29 = vmul.f32 %v1981_v59, %v1812_v57  ;;  %v1545_v47 = vpop.f32.mrb[130].mxu1 }
 0x25e   : > { %v1690_v36 = vadd.f32 %v4087_v15, %v1642_v38  ;;  %v1643_v37 = vmax.f32 %v4378_v54, %v1545_v47  ;;  %v2988_v63 = vpop.f32.mrb[131].mxu1  ;;  %v2011_v54 = vpop.permute.xlu1 %2010 }
 0x25f   : > { %2305 = vst.msk [vmem:[%s4108_s22 + $0x50] sm:$0xf] %vm2284_vm4, %v2560_v52  ;;  %v2561_v25 = vpack.c.bf16 %v2099_v29, %v2099_v29  ;;  %v2006_v52 = vpop.permute.xlu0 %2005 }
 0x260   : > { %vm1731_vm10 = vcmp.ge.f32.partialorder %v1690_v36, 0.0  ;;  %v1772_v55 = vmul.f32 0.01, %v1690_v36  ;;  %v1691_v17 = vadd.f32 %v4087_v15, %v1643_v37 }
 0x261   : > { %2306 = vst.msk [vmem:[%s4108_s22 + $0x54] sm:$0xf] %vm2284_vm4, %v2561_v25 }
 0x262   : > { %v1813_v60 = vsel %vm1731_vm10, %v1690_v36, %v1772_v55  ;;  %vm1732_vm11 = vcmp.ge.f32.partialorder %v1691_v17, 0.0  ;;  %v1773_v53 = vmul.f32 0.01, %v1691_v17 }
 0x263   : > { %v2100_v21 = vmul.f32 %v1986_v43, %v1813_v60  ;;  %v1550_v10 = vpop.f32.mrb[132].mxu1 }
 0x264   : > { %v1814_v3 = vsel %vm1732_vm11, %v1691_v17, %v1773_v53  ;;  %v1644_v8 = vmax.f32 %v4379_v9, %v1550_v10  ;;  %v2991_v50 = vpop.f32.mrb[133].mxu1 }
 0x265   : > { %v2562_v46 = vpack.c.bf16 %v2100_v21, %v2100_v21  ;;  %v2101_v26 = vmul.f32 %v1991_v41, %v1814_v3  ;;  %v1553_v4 = vpop.f32.mrb[134].mxu1  ;;  %v2016_v3 = vpop.permute.xlu0 %2015 }
 0x266   : > { %v1692_v51 = vadd.f32 %v4087_v15, %v1644_v8  ;;  %v1645_v0 = vmax.f32 %v4380_v39, %v1553_v4  ;;  %v2992_v58 = vpop.f32.mrb[135].mxu1 }
 0x267   : > { %2307 = vst.msk [vmem:[%s4108_s22 + $0x58] sm:$0xf] %vm2284_vm4, %v2562_v46  ;;  %v2563_v30 = vpack.c.bf16 %v2101_v26, %v2101_v26  ;;  %v2021_v46 = vpop.permute.xlu1 %2020 }
 0x268   : > { %vm1733_vm12 = vcmp.ge.f32.partialorder %v1692_v51, 0.0  ;;  %v1774_v20 = vmul.f32 0.01, %v1692_v51  ;;  %v1693_v35 = vadd.f32 %v4087_v15, %v1645_v0 }
 0x269   : > { %2308 = vst.msk [vmem:[%s4108_s22 + $0x5c] sm:$0xf] %vm2284_vm4, %v2563_v30 }
 0x26a   : > { %v1815_v19 = vsel %vm1733_vm12, %v1692_v51, %v1774_v20  ;;  %vm1734_vm13 = vcmp.ge.f32.partialorder %v1693_v35, 0.0  ;;  %v1775_v44 = vmul.f32 0.01, %v1693_v35 }
 0x26b   : > { %v2102_v33 = vmul.f32 %v1996_v45, %v1815_v19  ;;  %v1558_v27 = vpop.f32.mrb[136].mxu1 }
 0x26c   : > { %v1816_v11 = vsel %vm1734_vm13, %v1693_v35, %v1775_v44  ;;  %v1646_v61 = vmax.f32 %v4063_v40, %v1558_v27  ;;  %v2995_v12 = vpop.f32.mrb[137].mxu1  ;;  %v2026_v44 = vpop.permute.xlu0 %2025 }
 0x26d   : > { %v2564_v62 = vpack.c.bf16 %v2102_v33, %v2102_v33  ;;  %v2103_v28 = vmul.f32 %v2001_v32, %v1816_v11  ;;  %v1561_v48 = vpop.f32.mrb[138].mxu1  ;;  %v2031_v11 = vpop.permute.xlu1 %2030 }
 0x26e   : > { %v1694_v56 = vadd.f32 %v4087_v15, %v1646_v61  ;;  %v1647_v59 = vmax.f32 %v4068_v7, %v1561_v48  ;;  %v2996_v57 = vpop.f32.mrb[139].mxu1 }
 0x26f   : > { %2309 = vst.msk [vmem:[%s4108_s22 + $0x60] sm:$0xf] %vm2284_vm4, %v2564_v62  ;;  %v2565_v49 = vpack.c.bf16 %v2103_v28, %v2103_v28 }
 0x270   : > { %vm1735_vm14 = vcmp.ge.f32.partialorder %v1694_v56, 0.0  ;;  %v1776_v38 = vmul.f32 0.01, %v1694_v56  ;;  %v1695_v31 = vadd.f32 %v4087_v15, %v1647_v59 }
 0x271   : > { %2310 = vst.msk [vmem:[%s4108_s22 + $0x64] sm:$0xf] %vm2284_vm4, %v2565_v49 }
 0x272   : > { %v1817_v40 = vsel %vm1735_vm14, %v1694_v56, %v1776_v38  ;;  %vm1736_vm15 = vcmp.ge.f32.partialorder %v1695_v31, 0.0  ;;  %v1777_v29 = vmul.f32 0.01, %v1695_v31  ;;  %vm2325_vm14 = vcmask 517120  }
 0x273   : > { %v2104_v47 = vmul.f32 %v2006_v52, %v1817_v40  ;;  %v1566_v36 = vpop.f32.mrb[140].mxu1  ;;  %v2036_v52 = vpop.permute.xlu0 %2035 }
 0x274   : > { %v1818_v7 = vsel %vm1736_vm15, %v1695_v31, %v1777_v29  ;;  %v1648_v37 = vmax.f32 %v4077_v16, %v1566_v36  ;;  %v2999_v63 = vpop.f32.mrb[141].mxu1  ;;  %v2041_v36 = vpop.permute.xlu1 %2040 }
 0x275   : > { %v2566_v25 = vpack.c.bf16 %v2104_v47, %v2104_v47  ;;  %v2105_v55 = vmul.f32 %v2011_v54, %v1818_v7  ;;  %v1569_v17 = vpop.f32.mrb[142].mxu1 }
 0x276   : > { %v1696_v43 = vadd.f32 %v4087_v15, %v1648_v37  ;;  %v1649_v60 = vmax.f32 %v4082_v24, %v1569_v17  ;;  %v3000_v53 = vpop.f32.mrb[143].mxu1 }
 0x277   : > { %2311 = vst.msk [vmem:[%s4108_s22 + $0x68] sm:$0xf] %vm2284_vm4, %v2566_v25  ;;  %v2567_v21 = vpack.c.bf16 %v2105_v55, %v2105_v55 }
 0x278   : > { %vm1737_vm0 = vcmp.ge.f32.partialorder %v1696_v43, 0.0  ;;  %v1778_v10 = vmul.f32 0.01, %v1696_v43  ;;  %v1697_v41 = vadd.f32 %v4087_v15, %v1649_v60 }
 0x279   : > { %2312 = vst.msk [vmem:[%s4108_s22 + $0x6c] sm:$0xf] %vm2284_vm4, %v2567_v21 }
 0x27a   : > { %v1819_v16 = vsel %vm1737_vm0, %v1696_v43, %v1778_v10  ;;  %vm1738_vm1 = vcmp.ge.f32.partialorder %v1697_v41, 0.0  ;;  %v1779_v9 = vmul.f32 0.01, %v1697_v41  ;;  %v2046_v10 = vpop.permute.xlu0 %2045 }
 0x27b   : > { %v2106_v8 = vmul.f32 %v2016_v3, %v1819_v16  ;;  %v1574_v50 = vpop.f32.mrb[144].mxu1 }
 0x27c   : > { %v1820_v24 = vsel %vm1738_vm1, %v1697_v41, %v1779_v9  ;;  %v1650_v26 = vmax.f32 %v4096_v6, %v1574_v50  ;;  %v3003_v4 = vpop.f32.mrb[145].mxu1  ;;  %v2051_v9 = vpop.permute.xlu1 %2050 }
 0x27d   : > { %v2568_v51 = vpack.c.bf16 %v2106_v8, %v2106_v8  ;;  %v2107_v39 = vmul.f32 %v2021_v46, %v1820_v24  ;;  %v1577_v0 = vpop.f32.mrb[146].mxu1 }
 0x27e   : > { %v1698_v58 = vadd.f32 %v4087_v15, %v1650_v26  ;;  %v1651_v30 = vmax.f32 %v4101_v5, %v1577_v0  ;;  %v3004_v20 = vpop.f32.mrb[147].mxu1 }
 0x27f   : > { %2313 = vst.msk [vmem:[%s4108_s22 + $0x70] sm:$0xf] %vm2284_vm4, %v2568_v51  ;;  %v2569_v35 = vpack.c.bf16 %v2107_v39, %v2107_v39  ;;  %v2056_v20 = vpop.permute.xlu0 %2055 }
 0x280   : > { %vm1739_vm2 = vcmp.ge.f32.partialorder %v1698_v58, 0.0  ;;  %v1780_v45 = vmul.f32 0.01, %v1698_v58  ;;  %v1699_v19 = vadd.f32 %v4087_v15, %v1651_v30 }
 0x281   : > { %2314 = vst.msk [vmem:[%s4108_s22 + $0x74] sm:$0xf] %vm2284_vm4, %v2569_v35 }
 0x282   : > { %v1821_v6 = vsel %vm1739_vm2, %v1698_v58, %v1780_v45  ;;  %vm1740_vm3 = vcmp.ge.f32.partialorder %v1699_v19, 0.0  ;;  %v1781_v33 = vmul.f32 0.01, %v1699_v19 }
 0x283   : > { %v2108_v27 = vmul.f32 %v2026_v44, %v1821_v6  ;;  %v1582_v32 = vpop.f32.mrb[148].mxu1  ;;  %v2061_v44 = vpop.permute.xlu1 %2060 }
 0x284   : > { %v1822_v5 = vsel %vm1740_vm3, %v1699_v19, %v1781_v33  ;;  %v1652_v61 = vmax.f32 %v4121_v13, %v1582_v32  ;;  %v3007_v12 = vpop.f32.mrb[149].mxu1 }
 0x285   : > { %v2570_v62 = vpack.c.bf16 %v2108_v27, %v2108_v27  ;;  %v2109_v28 = vmul.f32 %v2031_v11, %v1822_v5  ;;  %v1585_v48 = vpop.f32.mrb[150].mxu1 }
 0x286   : > { %v1700_v56 = vadd.f32 %v4087_v15, %v1652_v61  ;;  %v1653_v59 = vmax.f32 %v4126_v18, %v1585_v48  ;;  %v3008_v57 = vpop.f32.mrb[151].mxu1 }
 0x287   : > { %2315 = vst.msk [vmem:[%s4108_s22 + $0x78] sm:$0xf] %vm2284_vm4, %v2570_v62  ;;  %v2571_v49 = vpack.c.bf16 %v2109_v28, %v2109_v28 }
 0x288   : > { %vm1741_vm5 = vcmp.ge.f32.partialorder %v1700_v56, 0.0  ;;  %v1782_v38 = vmul.f32 0.01, %v1700_v56  ;;  %v1701_v31 = vadd.f32 %v4087_v15, %v1653_v59 }
 0x289   : > { %2316 = vst.msk [vmem:[%s4108_s22 + $0x7c] sm:$0xf] %vm2284_vm4, %v2571_v49 }
 0x28a   : > { %v1823_v13 = vsel %vm1741_vm5, %v1700_v56, %v1782_v38  ;;  %vm1742_vm6 = vcmp.ge.f32.partialorder %v1701_v31, 0.0  ;;  %v1783_v40 = vmul.f32 0.01, %v1701_v31  ;;  %v2071_v38 = vpop.permute.xlu1 %2070 }
 0x28b   : > { %v2110_v29 = vmul.f32 %v2036_v52, %v1823_v13  ;;  %v1590_v47 = vpop.f32.mrb[152].mxu1 }
 0x28c   : > { %v1824_v18 = vsel %vm1742_vm6, %v1701_v31, %v1783_v40  ;;  %v1654_v54 = vmax.f32 %v4139_v22, %v1590_v47  ;;  %v3011_v7 = vpop.f32.mrb[153].mxu1 }
 0x28d   : > { %v2572_v37 = vpack.c.bf16 %v2110_v29, %v2110_v29  ;;  %v2111_v63 = vmul.f32 %v2041_v36, %v1824_v18  ;;  %v1593_v25 = vpop.f32.mrb[154].mxu1 }
 0x28e   : > { %v1702_v55 = vadd.f32 %v4087_v15, %v1654_v54  ;;  %v1655_v17 = vmax.f32 %v4144_v34, %v1593_v25  ;;  %v3012_v43 = vpop.f32.mrb[155].mxu1 }
 0x28f   : > { %2317 = vst.msk [vmem:[%s4108_s22 + $0x80] sm:$0xf] %vm2284_vm4, %v2572_v37  ;;  %v2573_v60 = vpack.c.bf16 %v2111_v63, %v2111_v63 }
 0x290   : > { %vm1743_vm7 = vcmp.ge.f32.partialorder %v1702_v55, 0.0  ;;  %v1784_v53 = vmul.f32 0.01, %v1702_v55  ;;  %v1703_v21 = vadd.f32 %v4087_v15, %v1655_v17 }
 0x291   : > { %2318 = vst.msk [vmem:[%s4108_s22 + $0x84] sm:$0xf] %vm2284_vm4, %v2573_v60 }
 0x292   : > { %v1825_v22 = vsel %vm1743_vm7, %v1702_v55, %v1784_v53  ;;  %vm1744_vm8 = vcmp.ge.f32.partialorder %v1703_v21, 0.0  ;;  %v1785_v41 = vmul.f32 0.01, %v1703_v21 }
 0x293   : > { %v2112_v3 = vmul.f32 %v2046_v10, %v1825_v22  ;;  %v1598_v16 = vpop.f32.mrb[156].mxu1 }
 0x294   : > { %v1826_v34 = vsel %vm1744_vm8, %v1703_v21, %v1785_v41  ;;  %v1656_v8 = vmax.f32 %v4157_v1, %v1598_v16  ;;  %v3015_v50 = vpop.f32.mrb[157].mxu1 }
 0x295   : > { %v2574_v46 = vpack.c.bf16 %v2112_v3, %v2112_v3  ;;  %v2113_v24 = vmul.f32 %v2051_v9, %v1826_v34  ;;  %v1601_v26 = vpop.f32.mrb[158].mxu1 }
 0x296   : > { %v1704_v4 = vadd.f32 %v4087_v15, %v1656_v8  ;;  %v1657_v51 = vmax.f32 %v4162_v42, %v1601_v26  ;;  %v3016_v39 = vpop.f32.mrb[159].mxu1 }
 0x297   : > { %2319 = vst.msk [vmem:[%s4108_s22 + $0x88] sm:$0xf] %vm2284_vm4, %v2574_v46  ;;  %v2575_v0 = vpack.c.bf16 %v2113_v24, %v2113_v24 }
 0x298   : > { %vm1745_vm9 = vcmp.ge.f32.partialorder %v1704_v4, 0.0  ;;  %v1786_v58 = vmul.f32 0.01, %v1704_v4  ;;  %v1705_v30 = vadd.f32 %v4087_v15, %v1657_v51 }
 0x299   : > { %2320 = vst.msk [vmem:[%s4108_s22 + $0x8c] sm:$0xf] %vm2284_vm4, %v2575_v0 }
 0x29a   : > { %v1827_v1 = vsel %vm1745_vm9, %v1704_v4, %v1786_v58  ;;  %vm1746_vm10 = vcmp.ge.f32.partialorder %v1705_v30, 0.0  ;;  %v1787_v35 = vmul.f32 0.01, %v1705_v30 }
 0x29b   : > { %v2114_v45 = vmul.f32 %v2056_v20, %v1827_v1  ;;  %v1606_v19 = vpop.f32.mrb[160].mxu1 }
 0x29c   : > { %v1828_v42 = vsel %vm1746_vm10, %v1705_v30, %v1787_v35  ;;  %v1658_v6 = vmax.f32 %v4175_v14, %v1606_v19  ;;  %v3019_v33 = vpop.f32.mrb[161].mxu1  ;;  %v2066_v14 = vpop.permute.xlu0 %2065 }
 0x29d   : > { %v2576_v27 = vpack.c.bf16 %v2114_v45, %v2114_v45  ;;  %v2115_v32 = vmul.f32 %v2061_v44, %v1828_v42  ;;  %v1609_v11 = vpop.f32.mrb[162].mxu1 }
 0x29e   : > { %v1706_v5 = vadd.f32 %v4087_v15, %v1658_v6  ;;  %v1659_v61 = vmax.f32 %v4180_v2, %v1609_v11  ;;  %v3020_v12 = vpop.f32.mrb[163].mxu1 }
 0x29f   : > { %2321 = vst.msk [vmem:[%s4108_s22 + $0x90] sm:$0xf] %vm2284_vm4, %v2576_v27  ;;  %v2577_v62 = vpack.c.bf16 %v2115_v32, %v2115_v32 }
 0x2a0   : > { %vm1747_vm11 = vcmp.ge.f32.partialorder %v1706_v5, 0.0  ;;  %v1788_v28 = vmul.f32 0.01, %v1706_v5  ;;  %v1707_v48 = vadd.f32 %v4087_v15, %v1659_v61  ;;  %v2076_v7 = vpop.permute.xlu0 %2075 }
 0x2a1   : > { %2322 = vst.msk [vmem:[%s4108_s22 + $0x94] sm:$0xf] %vm2284_vm4, %v2577_v62 }
 0x2a2   : > { %v1829_v56 = vsel %vm1747_vm11, %v1706_v5, %v1788_v28  ;;  %vm1748_vm12 = vcmp.ge.f32.partialorder %v1707_v48, 0.0  ;;  %v1789_v59 = vmul.f32 0.01, %v1707_v48 }
 0x2a3   : > { %v2116_v57 = vmul.f32 %v2066_v14, %v1829_v56  ;;  %v1614_v49 = vpop.f32.mrb[164].mxu1 }
 0x2a4   : > { %v1830_v2 = vsel %vm1748_vm12, %v1707_v48, %v1789_v59  ;;  %v1660_v31 = vmax.f32 %v4193_v23, %v1614_v49  ;;  %v3023_v52 = vpop.f32.mrb[165].mxu1 }
 0x2a5   : > { %v2578_v13 = vpack.c.bf16 %v2116_v57, %v2116_v57  ;;  %v2117_v40 = vmul.f32 %v2071_v38, %v1830_v2  ;;  %v1617_v29 = vpop.f32.mrb[166].mxu1 }
 0x2a6   : > { %v1708_v47 = vadd.f32 %v4087_v15, %v1660_v31  ;;  %v3024_v36 = vpop.f32.mrb[167].mxu1 }
 0x2a7   : > { %2323 = vst.msk [vmem:[%s4108_s22 + $0x98] sm:$0xf] %vm2284_vm4, %v2578_v13  ;;  %v2579_v18 = vpack.c.bf16 %v2117_v40, %v2117_v40 }
 0x2a8   : > { %vm1749_vm13 = vcmp.ge.f32.partialorder %v1708_v47, 0.0  ;;  %v1790_v54 = vmul.f32 0.01, %v1708_v47 }
 0x2a9   : > { %2324 = vst.msk [vmem:[%s4108_s22 + $0x9c] sm:$0xf] %vm2284_vm4, %v2579_v18 }
 0x2aa   : > { %v1831_v37 = vsel %vm1749_vm13, %v1708_v47, %v1790_v54 }
 0x2ab   : > { %v2118_v63 = vmul.f32 %v2076_v7, %v1831_v37 }
 0x2ad   : > { %v2580_v23 = vpack.c.bf16 %v2118_v63, %v2118_v63 }
 0x2af   : > { %2326 = vst.msk [vmem:[%s4108_s22 + $0xa0] sm:$0x3] %vm2325_vm14, %v2580_v23 }
 0x2b0 PF: > { %s14_s15 = sadd.s32 1, %s3071_s15  }
 0x2b1   : > { %p11_p4 = scmp.ge.s32.totalorder %s14_s15, 4  }
 0x2b3   :  { %13 = sbr.rel (!%p11_p4) target bundleno = 1 (0x1), region = 66 }

// kernel: cnn_toy_forward.5
= control target key start
LH: loop header
LB: loop body
LE: loop exit
PB: predicated region body
PF: predicated region fallthrough
CT: control target
= control target key end

     0   :  { %12 = vsyncpa [#allocation3], 0  ;;  %v296_v28 = vlaneseq  ;;  %v2174_v36 = vmov 1966171168   ;;  %s2682_s0 = inlined_call_operand.vmem [shape: bf16[2,2048], index: 0, kind: input, shape index: {}]   ;;  %s2683_s1 = inlined_call_operand.vmem [shape: bf16[2048,128], index: 1, kind: input, shape index: {}]   ;;  %s2684_s2 = inlined_call_operand.vmem [shape: f32[1,128], index: 2, kind: input, shape index: {}]   ;;  %s2685_s3 = inlined_call_operand.vmem [shape: bf16[128,10], index: 3, kind: input, shape index: {}]   ;;  %s2686_s4 = inlined_call_operand.vmem [shape: f32[1,10], index: 4, kind: input, shape index: {}]   ;;  %s2687_s5 = inlined_call_operand.hbm [shape: f32[2,128], index: 5, kind: output, shape index: {0}]   ;;  %s2688_s6 = inlined_call_operand.hbm [shape: f32[2,10], index: 6, kind: output, shape index: {1}]  }
   0x1   :  { %v1988_v0 = vld [vmem:[%s2683_s1 + $0x40] sm:$0xff]   ;;  %v1992_v4 = vld [vmem:[%s2683_s1 + $0x48] sm:$0xff]   ;;  %v1996_v8 = vld [vmem:[%s2683_s1 + $0x50] sm:$0xff]   ;;  %v294_v37 = vunpack.c.l.s4 %v2174_v36 }
   0x2   :  { %v1989_v1 = vld [vmem:[%s2683_s1 + $0xc0] sm:$0xff]   ;;  %1778 = vmatprep.subr.bf16.mxu0 %v1988_v0  ;;  %v1993_v5 = vld [vmem:[%s2683_s1 + $0xc8] sm:$0xff]   ;;  %v1997_v9 = vld [vmem:[%s2683_s1 + $0xd0] sm:$0xff]   ;;  %v297_v33 = vshrl.u32 %v296_v28, 7 }
   0x3   :  { %v1990_v2 = vld [vmem:[%s2683_s1] sm:$0xff]   ;;  %1800 = vmatprep.subr.bf16.mxu1 %v1989_v1  ;;  %v1994_v6 = vld [vmem:[%s2683_s1 + $0x8] sm:$0xff]   ;;  %v1998_v10 = vld [vmem:[%s2683_s1 + $0x10] sm:$0xff]   ;;  %v295_v40 = vunpack.c.0.s8 %v294_v37 }
   0x4   :  { %v1991_v3 = vld [vmem:[%s2683_s1 + $0x80] sm:$0xff]   ;;  %1779 = vmatpush3.bf16.msra.mxu0 %v1990_v2  ;;  %v1995_v7 = vld [vmem:[%s2683_s1 + $0x88] sm:$0xff]   ;;  %v1999_v11 = vld [vmem:[%s2683_s1 + $0x90] sm:$0xff]  }
   0x5   :  { %1801 = vmatpush3.bf16.msra.mxu1 %v1991_v3  ;;  %1780 = vmatprep.subr.bf16.mxu0 %v1992_v4  ;;  %v2000_v12 = vld [vmem:[%s2683_s1 + $0x58] sm:$0xff]   ;;  %v2004_v16 = vld [vmem:[%s2683_s1 + $0x60] sm:$0xff]   ;;  %v2008_v20 = vld [vmem:[%s2683_s1 + $0x68] sm:$0xff]   ;;  %v2319_v41 = vsub.s32 %v295_v40, %v297_v33 }
   0x6   :  { %1802 = vmatprep.subr.bf16.mxu1 %v1993_v5  ;;  %v2001_v13 = vld [vmem:[%s2683_s1 + $0xd8] sm:$0xff]   ;;  %v2005_v17 = vld [vmem:[%s2683_s1 + $0xe0] sm:$0xff]   ;;  %v2009_v21 = vld [vmem:[%s2683_s1 + $0xe8] sm:$0xff]  }
   0x7   :  { %v2002_v14 = vld [vmem:[%s2683_s1 + $0x18] sm:$0xff]   ;;  %v2006_v18 = vld [vmem:[%s2683_s1 + $0x20] sm:$0xff]   ;;  %v2010_v22 = vld [vmem:[%s2683_s1 + $0x28] sm:$0xff]  }
   0x8   :  { %1781 = vmatpush3.bf16.msra.mxu0 %v1994_v6  ;;  %v2003_v15 = vld [vmem:[%s2683_s1 + $0x98] sm:$0xff]   ;;  %v2007_v19 = vld [vmem:[%s2683_s1 + $0xa0] sm:$0xff]   ;;  %v2011_v23 = vld [vmem:[%s2683_s1 + $0xa8] sm:$0xff]  }
   0x9   :  { %1803 = vmatpush3.bf16.msra.mxu1 %v1995_v7  ;;  %1782 = vmatprep.subr.bf16.mxu0 %v1996_v8  ;;  %v2012_v24 = vld [vmem:[%s2683_s1 + $0x70] sm:$0xff]   ;;  %v2016_v29 = vld [vmem:[%s2683_s1 + $0x78] sm:$0xff]   ;;  %v25_v34 = vld [vmem:[%s2682_s0] sm:$0xff] }
   0xa   :  { %1804 = vmatprep.subr.bf16.mxu1 %v1997_v9  ;;  %v2013_v25 = vld [vmem:[%s2683_s1 + $0xf0] sm:$0xff]   ;;  %v2017_v30 = vld [vmem:[%s2683_s1 + $0xf8] sm:$0xff]   ;;  %v2021_v35 = vld [vmem:[%s2683_s1 + $0x140] sm:$0xff]   ;;  %v292_v39 = vcombine.high %v25_v34, %v25_v34  ;;  %v299_v42 = vrot.slane %v25_v34, %v2319_v41 }
   0xb   :  { %v2014_v26 = vld [vmem:[%s2683_s1 + $0x30] sm:$0xff]   ;;  %v2018_v31 = vld [vmem:[%s2683_s1 + $0x38] sm:$0xff]   ;;  %v2022_v38 = vld [vmem:[%s2683_s1 + $0x1c0] sm:$0xff]  }
   0xc   :  { %1783 = vmatpush3.bf16.msra.mxu0 %v1998_v10  ;;  %v2015_v27 = vld [vmem:[%s2683_s1 + $0xb0] sm:$0xff]   ;;  %v2019_v32 = vld [vmem:[%s2683_s1 + $0xb8] sm:$0xff]   ;;  %v2323_v43 = vrot.slane %v292_v39, %v2319_v41  ;;  %v307_v44 = vcombine.high %v299_v42, %v299_v42  ;;  %v315_v45 = vrot.slane %v299_v42, %v2319_v41  ;;  %v2023_v47 = vld [vmem:[%s2683_s1 + $0x100] sm:$0xff]  }
   0xd   :  { %1805 = vmatpush3.bf16.msra.mxu1 %v1999_v11  ;;  %1784 = vmatprep.subr.bf16.mxu0 %v2000_v12  ;;  %v2024_v49 = vld [vmem:[%s2683_s1 + $0x180] sm:$0xff]   ;;  %v2025_v52 = vld [vmem:[%s2683_s1 + $0x148] sm:$0xff]   ;;  %v2029_v58 = vld [vmem:[%s2683_s1 + $0x150] sm:$0xff]  }
   0xe   :  { %1806 = vmatprep.subr.bf16.mxu1 %v2001_v13  ;;  %v308_v46 = vcombine.high %v2323_v43, %v2323_v43  ;;  %v329_v48 = vrot.slane %v307_v44, %v2319_v41  ;;  %v337_v51 = vcombine.high %v315_v45, %v315_v45  ;;  %v2026_v54 = vld [vmem:[%s2683_s1 + $0x1c8] sm:$0xff]   ;;  %v2030_v59 = vld [vmem:[%s2683_s1 + $0x1d0] sm:$0xff]   ;;  %v2033_v62 = vld [vmem:[%s2683_s1 + $0x158] sm:$0xff]  }
   0xf   :  { %v2027_v55 = vld [vmem:[%s2683_s1 + $0x108] sm:$0xff]   ;;  %v2031_v60 = vld [vmem:[%s2683_s1 + $0x110] sm:$0xff]   ;;  %v2034_v63 = vld [vmem:[%s2683_s1 + $0x1d8] sm:$0xff]  }
  0x10   :  { %1785 = vmatpush3.bf16.msra.mxu0 %v2002_v14  ;;  %v336_v50 = vrot.slane %v308_v46, %v2319_v41  ;;  %1206 = vmatprep.mubr.bf16.mxu0 %v329_v48  ;;  %v339_v53 = vcombine.high %v329_v48, %v329_v48  ;;  %v2028_v57 = vld [vmem:[%s2683_s1 + $0x188] sm:$0xff]   ;;  %v2032_v61 = vld [vmem:[%s2683_s1 + $0x190] sm:$0xff]   ;;  %v2035_v0 = vld [vmem:[%s2683_s1 + $0x118] sm:$0xff]  }
  0x11   :  { %1807 = vmatpush3.bf16.msra.mxu1 %v2003_v15  ;;  %1786 = vmatprep.subr.bf16.mxu0 %v2004_v16  ;;  %v2036_v1 = vld [vmem:[%s2683_s1 + $0x198] sm:$0xff]   ;;  %v2037_v2 = vld [vmem:[%s2683_s1 + $0x160] sm:$0xff]   ;;  %v2041_v6 = vld [vmem:[%s2683_s1 + $0x168] sm:$0xff]  }
  0x12   :  { %1808 = vmatprep.subr.bf16.mxu1 %v2005_v17  ;;  %v340_v56 = vcombine.high %v336_v50, %v336_v50  ;;  %1246 = vmatprep.mubr.bf16.mxu1 %v339_v53  ;;  %v2038_v3 = vld [vmem:[%s2683_s1 + $0x1e0] sm:$0xff]   ;;  %v2042_v7 = vld [vmem:[%s2683_s1 + $0x1e8] sm:$0xff]   ;;  %v2045_v10 = vld [vmem:[%s2683_s1 + $0x170] sm:$0xff]  }
  0x13   :  { %v2039_v4 = vld [vmem:[%s2683_s1 + $0x120] sm:$0xff]   ;;  %v2043_v8 = vld [vmem:[%s2683_s1 + $0x128] sm:$0xff]   ;;  %v2046_v11 = vld [vmem:[%s2683_s1 + $0x1f0] sm:$0xff]  }
  0x14   :  { %1787 = vmatpush3.bf16.msra.mxu0 %v2006_v18  ;;  %v2040_v5 = vld [vmem:[%s2683_s1 + $0x1a0] sm:$0xff]   ;;  %v2044_v9 = vld [vmem:[%s2683_s1 + $0x1a8] sm:$0xff]   ;;  %v2047_v12 = vld [vmem:[%s2683_s1 + $0x130] sm:$0xff]   ;;  %v322_v18 = vrot.slane %v2323_v43, %v2319_v41 }
  0x15   :  { %1809 = vmatpush3.bf16.msra.mxu1 %v2007_v19  ;;  %1788 = vmatprep.subr.bf16.mxu0 %v2008_v20  ;;  %v2048_v13 = vld [vmem:[%s2683_s1 + $0x1b0] sm:$0xff]   ;;  %v2049_v14 = vld [vmem:[%s2683_s1 + $0x178] sm:$0xff]   ;;  %v2053_v19 = vld [vmem:[%s2683_s1 + $0x240] sm:$0xff]  }
  0x16   :  { %1810 = vmatprep.subr.bf16.mxu1 %v2009_v21  ;;  %v2050_v15 = vld [vmem:[%s2683_s1 + $0x1f8] sm:$0xff]   ;;  %v2054_v20 = vld [vmem:[%s2683_s1 + $0x2c0] sm:$0xff]   ;;  %v2061_v28 = vld [vmem:[%s2683_s1 + $0x250] sm:$0xff]  }
  0x17   :  { %v2051_v16 = vld [vmem:[%s2683_s1 + $0x138] sm:$0xff]   ;;  %v2055_v21 = vld [vmem:[%s2683_s1 + $0x200] sm:$0xff]   ;;  %v2073_v40 = vld [vmem:[%s2683_s1 + $0x268] sm:$0xff]  }
  0x18   :  { %1789 = vmatpush3.bf16.msra.mxu0 %v2010_v22  ;;  %v2052_v17 = vld [vmem:[%s2683_s1 + $0x1b8] sm:$0xff]   ;;  %v2056_v22 = vld [vmem:[%s2683_s1 + $0x280] sm:$0xff]   ;;  %v2074_v42 = vld [vmem:[%s2683_s1 + $0x2e8] sm:$0xff]  }
  0x19   :  { %1811 = vmatpush3.bf16.msra.mxu1 %v2011_v23  ;;  %1790 = vmatprep.subr.bf16.mxu0 %v2012_v24  ;;  %v338_v23 = vcombine.high %v322_v18, %v322_v18  ;;  %v2057_v24 = vld [vmem:[%s2683_s1 + $0x248] sm:$0xff]   ;;  %v2066_v33 = vld [vmem:[%s2683_s1 + $0x2d8] sm:$0xff]   ;;  %v2069_v36 = vld [vmem:[%s2683_s1 + $0x260] sm:$0xff]  }
  0x1a   :  { %1812 = vmatprep.subr.bf16.mxu1 %v2013_v25  ;;  %v2058_v25 = vld [vmem:[%s2683_s1 + $0x2c8] sm:$0xff]   ;;  %v2067_v34 = vld [vmem:[%s2683_s1 + $0x218] sm:$0xff]   ;;  %v2070_v37 = vld [vmem:[%s2683_s1 + $0x2e0] sm:$0xff]  }
  0x1b   :  { %v2072_v39 = vld [vmem:[%s2683_s1 + $0x2a0] sm:$0xff]   ;;  %v2075_v43 = vld [vmem:[%s2683_s1 + $0x228] sm:$0xff]  }
  0x1c   :  { %1791 = vmatpush3.bf16.msra.mxu0 %v2014_v26  ;;  %v2059_v26 = vld [vmem:[%s2683_s1 + $0x208] sm:$0xff]  }
  0x1d   :  { %1813 = vmatpush3.bf16.msra.mxu1 %v2015_v27  ;;  %1792 = vmatprep.subr.bf16.mxu0 %v2016_v29  ;;  %v2060_v27 = vld [vmem:[%s2683_s1 + $0x288] sm:$0xff]   ;;  %v2062_v29 = vld [vmem:[%s2683_s1 + $0x2d0] sm:$0xff]  }
  0x1e   :  { %1814 = vmatprep.subr.bf16.mxu1 %v2017_v30  ;;  %v2063_v30 = vld [vmem:[%s2683_s1 + $0x210] sm:$0xff]   ;;  %v2076_v44 = vld [vmem:[%s2683_s1 + $0x2a8] sm:$0xff]  }
  0x1f   :  { %v26_v46 = vld [vmem:[%s2682_s0 + $0x8] sm:$0xff] }
  0x20   :  { %1793 = vmatpush3.bf16.msra.mxu0 %v2018_v31  ;;  %v2064_v31 = vld [vmem:[%s2683_s1 + $0x290] sm:$0xff]   ;;  %v348_v48 = vrot.slane %v26_v46, %v2319_v41 }
  0x21   :  { %1815 = vmatpush3.bf16.msra.mxu1 %v2019_v32  ;;  %1822 = vmatprep.subr.bf16.mxu0 %v2021_v35  ;;  %v2065_v32 = vld [vmem:[%s2683_s1 + $0x258] sm:$0xff]  }
  0x22   :  { %1844 = vmatprep.subr.bf16.mxu1 %v2022_v38  ;;  %v2068_v35 = vld [vmem:[%s2683_s1 + $0x298] sm:$0xff]   ;;  %v2071_v38 = vld [vmem:[%s2683_s1 + $0x220] sm:$0xff]  }
  0x23   :  { %1207 = vmatmul.mubr.bf16.vlgmr.msra.gmra.mrb[0].mxu0 %v315_v45  ;;  %v2077_v45 = vld [vmem:[%s2683_s1 + $0x270] sm:$0xff]  }
  0x24   :  { %1823 = vmatpush3.bf16.msra.mxu0 %v2023_v47  ;;  %1247 = vmatmul.mubr.bf16.vlgmr.msra.gmra.mrb[0].mxu1 %v337_v51  ;;  %v2078_v47 = vld [vmem:[%s2683_s1 + $0x2f0] sm:$0xff]  }
  0x25   :  { %1824 = vmatprep.subr.bf16.mxu0 %v2025_v52  ;;  %1845 = vmatpush3.bf16.msra.mxu1 %v2024_v49  ;;  %v341_v49 = vcombine.high %v26_v46, %v26_v46  ;;  %v2080_v51 = vld [vmem:[%s2683_s1 + $0x2b0] sm:$0xff]   ;;  %v356_v52 = vcombine.high %v348_v48, %v348_v48 }
  0x26   :  { %1286 = vmatprep.mubr.bf16.mxu0 %v336_v50  ;;  %1846 = vmatprep.subr.bf16.mxu1 %v2026_v54  ;;  %v2079_v50 = vld [vmem:[%s2683_s1 + $0x230] sm:$0xff]   ;;  %v2081_v54 = vld [vmem:[%s2683_s1 + $0x278] sm:$0xff]  }
  0x27   :  { %1326 = vmatprep.mubr.bf16.mxu1 %v340_v56  ;;  %v2511_v53 = vrot.slane %v341_v49, %v2319_v41  ;;  %v378_v56 = vrot.slane %v356_v52, %v2319_v41 }
  0x28   :  { %1825 = vmatpush3.bf16.msra.mxu0 %v2027_v55  ;;  %v2082_v55 = vld [vmem:[%s2683_s1 + $0x2f8] sm:$0xff]  }
  0x29   :  { %1826 = vmatprep.subr.bf16.mxu0 %v2029_v58  ;;  %1847 = vmatpush3.bf16.msra.mxu1 %v2028_v57  ;;  %v357_v57 = vcombine.high %v2511_v53, %v2511_v53  ;;  %v2083_v58 = vld [vmem:[%s2683_s1 + $0x238] sm:$0xff]  }
  0x2a   :  { %1848 = vmatprep.subr.bf16.mxu1 %v2030_v59  ;;  %v2084_v59 = vld [vmem:[%s2683_s1 + $0x2b8] sm:$0xff]  }
  0x2c   :  { %1827 = vmatpush3.bf16.msra.mxu0 %v2031_v60  ;;  %v388_v60 = vcombine.high %v378_v56, %v378_v56 }
  0x2d   :  { %1828 = vmatprep.subr.bf16.mxu0 %v2033_v62  ;;  %1849 = vmatpush3.bf16.msra.mxu1 %v2032_v61  ;;  %v364_v61 = vrot.slane %v348_v48, %v2319_v41  ;;  %v2085_v62 = vld [vmem:[%s2683_s1 + $0x340] sm:$0xff]  }
  0x2e   :  { %1850 = vmatprep.subr.bf16.mxu1 %v2034_v63  ;;  %v2086_v63 = vld [vmem:[%s2683_s1 + $0x3c0] sm:$0xff]  }
  0x30   :  { %1829 = vmatpush3.bf16.msra.mxu0 %v2035_v0  ;;  %v385_v0 = vrot.slane %v357_v57, %v2319_v41 }
  0x31   :  { %1830 = vmatprep.subr.bf16.mxu0 %v2037_v2  ;;  %1851 = vmatpush3.bf16.msra.mxu1 %v2036_v1  ;;  %v2087_v1 = vld [vmem:[%s2683_s1 + $0x300] sm:$0xff]  }
  0x32   :  { %1852 = vmatprep.subr.bf16.mxu1 %v2038_v3  ;;  %v2088_v2 = vld [vmem:[%s2683_s1 + $0x380] sm:$0xff]   ;;  %v386_v3 = vcombine.high %v364_v61, %v364_v61 }
  0x34   :  { %1831 = vmatpush3.bf16.msra.mxu0 %v2039_v4  ;;  %v2089_v4 = vld [vmem:[%s2683_s1 + $0x348] sm:$0xff]  }
  0x35   :  { %1832 = vmatprep.subr.bf16.mxu0 %v2041_v6  ;;  %1853 = vmatpush3.bf16.msra.mxu1 %v2040_v5  ;;  %v2090_v5 = vld [vmem:[%s2683_s1 + $0x3c8] sm:$0xff]   ;;  %v389_v6 = vcombine.high %v385_v0, %v385_v0 }
  0x36   :  { %1854 = vmatprep.subr.bf16.mxu1 %v2042_v7  ;;  %v2091_v7 = vld [vmem:[%s2683_s1 + $0x308] sm:$0xff]  }
  0x38   :  { %1833 = vmatpush3.bf16.msra.mxu0 %v2043_v8  ;;  %v2092_v8 = vld [vmem:[%s2683_s1 + $0x388] sm:$0xff]  }
  0x39   :  { %1834 = vmatprep.subr.bf16.mxu0 %v2045_v10  ;;  %1855 = vmatpush3.bf16.msra.mxu1 %v2044_v9  ;;  %v2093_v9 = vld [vmem:[%s2683_s1 + $0x350] sm:$0xff]  }
  0x3a   :  { %1856 = vmatprep.subr.bf16.mxu1 %v2046_v11  ;;  %v2094_v10 = vld [vmem:[%s2683_s1 + $0x3d0] sm:$0xff]  }
  0x3b   :  { %v2095_v11 = vld [vmem:[%s2683_s1 + $0x310] sm:$0xff]  }
  0x3c   :  { %1835 = vmatpush3.bf16.msra.mxu0 %v2047_v12  ;;  %v2096_v12 = vld [vmem:[%s2683_s1 + $0x390] sm:$0xff]  }
  0x3d   :  { %1836 = vmatprep.subr.bf16.mxu0 %v2049_v14  ;;  %1857 = vmatpush3.bf16.msra.mxu1 %v2048_v13  ;;  %v2097_v13 = vld [vmem:[%s2683_s1 + $0x358] sm:$0xff]  }
  0x3e   :  { %1858 = vmatprep.subr.bf16.mxu1 %v2050_v15  ;;  %v2098_v14 = vld [vmem:[%s2683_s1 + $0x3d8] sm:$0xff]  }
  0x3f   :  { %v2099_v15 = vld [vmem:[%s2683_s1 + $0x318] sm:$0xff]  }
  0x40   :  { %1837 = vmatpush3.bf16.msra.mxu0 %v2051_v16  ;;  %v2100_v16 = vld [vmem:[%s2683_s1 + $0x398] sm:$0xff]  }
  0x41   :  { %1866 = vmatprep.subr.bf16.mxu0 %v2053_v19  ;;  %1859 = vmatpush3.bf16.msra.mxu1 %v2052_v17  ;;  %v2101_v17 = vld [vmem:[%s2683_s1 + $0x360] sm:$0xff]  }
  0x42   :  { %1888 = vmatprep.subr.bf16.mxu1 %v2054_v20  ;;  %v2103_v19 = vld [vmem:[%s2683_s1 + $0x320] sm:$0xff]  }
  0x43   :  { %1287 = vmatmul.mubr.bf16.vlgmr.msra.gmra.mrb[4].mxu0 %v322_v18  ;;  %v2102_v18 = vld [vmem:[%s2683_s1 + $0x3e0] sm:$0xff]  }
  0x44   :  { %1867 = vmatpush3.bf16.msra.mxu0 %v2055_v21  ;;  %1327 = vmatmul.mubr.bf16.vlgmr.msra.gmra.mrb[4].mxu1 %v338_v23  ;;  %v2104_v20 = vld [vmem:[%s2683_s1 + $0x3a0] sm:$0xff]   ;;  %v2105_v21 = vld [vmem:[%s2683_s1 + $0x368] sm:$0xff]  }
  0x45   :  { %1868 = vmatprep.subr.bf16.mxu0 %v2057_v24  ;;  %1889 = vmatpush3.bf16.msra.mxu1 %v2056_v22  ;;  %v2106_v22 = vld [vmem:[%s2683_s1 + $0x3e8] sm:$0xff]  }
  0x46   :  { %1890 = vmatprep.subr.bf16.mxu1 %v2058_v25  ;;  %1366 = vmatprep.mubr.bf16.mxu0 %v378_v56  ;;  %v2107_v23 = vld [vmem:[%s2683_s1 + $0x328] sm:$0xff]   ;;  %v2109_v25 = vld [vmem:[%s2683_s1 + $0x370] sm:$0xff]  }
  0x47   :  { %1406 = vmatprep.mubr.bf16.mxu1 %v388_v60  ;;  %v2108_v24 = vld [vmem:[%s2683_s1 + $0x3a8] sm:$0xff]  }
  0x48   :  { %1869 = vmatpush3.bf16.msra.mxu0 %v2059_v26  ;;  %v2110_v26 = vld [vmem:[%s2683_s1 + $0x3f0] sm:$0xff]  }
  0x49   :  { %1870 = vmatprep.subr.bf16.mxu0 %v2061_v28  ;;  %1891 = vmatpush3.bf16.msra.mxu1 %v2060_v27  ;;  %v2111_v27 = vld [vmem:[%s2683_s1 + $0x330] sm:$0xff]  }
  0x4a   :  { %1892 = vmatprep.subr.bf16.mxu1 %v2062_v29  ;;  %v2112_v28 = vld [vmem:[%s2683_s1 + $0x3b0] sm:$0xff]   ;;  %v2113_v29 = vld [vmem:[%s2683_s1 + $0x378] sm:$0xff]  }
  0x4c   :  { %1871 = vmatpush3.bf16.msra.mxu0 %v2063_v30  ;;  %v2114_v30 = vld [vmem:[%s2683_s1 + $0x3f8] sm:$0xff]  }
  0x4d   :  { %1872 = vmatprep.subr.bf16.mxu0 %v2065_v32  ;;  %1893 = vmatpush3.bf16.msra.mxu1 %v2064_v31 }
  0x4e   :  { %1894 = vmatprep.subr.bf16.mxu1 %v2066_v33 }
  0x50   :  { %1873 = vmatpush3.bf16.msra.mxu0 %v2067_v34 }
  0x51   :  { %1874 = vmatprep.subr.bf16.mxu0 %v2069_v36  ;;  %1895 = vmatpush3.bf16.msra.mxu1 %v2068_v35 }
  0x52   :  { %1896 = vmatprep.subr.bf16.mxu1 %v2070_v37 }
  0x54   :  { %1875 = vmatpush3.bf16.msra.mxu0 %v2071_v38 }
  0x55   :  { %1876 = vmatprep.subr.bf16.mxu0 %v2073_v40  ;;  %1897 = vmatpush3.bf16.msra.mxu1 %v2072_v39 }
  0x56   :  { %1898 = vmatprep.subr.bf16.mxu1 %v2074_v42 }
  0x58   :  { %1877 = vmatpush3.bf16.msra.mxu0 %v2075_v43 }
  0x59   :  { %1878 = vmatprep.subr.bf16.mxu0 %v2077_v45  ;;  %1899 = vmatpush3.bf16.msra.mxu1 %v2076_v44 }
  0x5a   :  { %1900 = vmatprep.subr.bf16.mxu1 %v2078_v47 }
  0x5c   :  { %1879 = vmatpush3.bf16.msra.mxu0 %v2079_v50 }
  0x5d   :  { %1880 = vmatprep.subr.bf16.mxu0 %v2081_v54  ;;  %1901 = vmatpush3.bf16.msra.mxu1 %v2080_v51 }
  0x5e   :  { %1902 = vmatprep.subr.bf16.mxu1 %v2082_v55 }
  0x60   :  { %1881 = vmatpush3.bf16.msra.mxu0 %v2083_v58 }
  0x61   :  { %1910 = vmatprep.subr.bf16.mxu0 %v2085_v62  ;;  %1903 = vmatpush3.bf16.msra.mxu1 %v2084_v59 }
  0x62   :  { %1932 = vmatprep.subr.bf16.mxu1 %v2086_v63 }
  0x63   :  { %1367 = vmatmul.mubr.bf16.vlgmr.msra.gmra.mrb[8].mxu0 %v364_v61 }
  0x64   :  { %1911 = vmatpush3.bf16.msra.mxu0 %v2087_v1  ;;  %1446 = vmatprep.mubr.bf16.mxu0 %v385_v0 }
  0x65   :  { %1407 = vmatmul.mubr.bf16.vlgmr.msra.gmra.mrb[8].mxu1 %v386_v3  ;;  %1912 = vmatprep.subr.bf16.mxu0 %v2089_v4 }
  0x66   :  { %1933 = vmatpush3.bf16.msra.mxu1 %v2088_v2  ;;  %1486 = vmatprep.mubr.bf16.mxu1 %v389_v6 }
  0x67   :  { %1934 = vmatprep.subr.bf16.mxu1 %v2090_v5 }
  0x68   :  { %1913 = vmatpush3.bf16.msra.mxu0 %v2091_v7 }
  0x69   :  { %1914 = vmatprep.subr.bf16.mxu0 %v2093_v9 }
  0x6a   :  { %1935 = vmatpush3.bf16.msra.mxu1 %v2092_v8 }
  0x6b   :  { %1936 = vmatprep.subr.bf16.mxu1 %v2094_v10 }
  0x6c   :  { %1915 = vmatpush3.bf16.msra.mxu0 %v2095_v11 }
  0x6d   :  { %1916 = vmatprep.subr.bf16.mxu0 %v2097_v13 }
  0x6e   :  { %1937 = vmatpush3.bf16.msra.mxu1 %v2096_v12 }
  0x6f   :  { %1938 = vmatprep.subr.bf16.mxu1 %v2098_v14 }
  0x70   :  { %1917 = vmatpush3.bf16.msra.mxu0 %v2099_v15 }
  0x71   :  { %1918 = vmatprep.subr.bf16.mxu0 %v2101_v17 }
  0x72   :  { %1939 = vmatpush3.bf16.msra.mxu1 %v2100_v16 }
  0x73   :  { %1940 = vmatprep.subr.bf16.mxu1 %v2102_v18 }
  0x74   :  { %1919 = vmatpush3.bf16.msra.mxu0 %v2103_v19 }
  0x75   :  { %1920 = vmatprep.subr.bf16.mxu0 %v2105_v21 }
  0x76   :  { %1941 = vmatpush3.bf16.msra.mxu1 %v2104_v20 }
  0x77   :  { %1942 = vmatprep.subr.bf16.mxu1 %v2106_v22 }
  0x78   :  { %1921 = vmatpush3.bf16.msra.mxu0 %v2107_v23 }
  0x79   :  { %1922 = vmatprep.subr.bf16.mxu0 %v2109_v25 }
  0x7a   :  { %1943 = vmatpush3.bf16.msra.mxu1 %v2108_v24 }
  0x7b   :  { %1944 = vmatprep.subr.bf16.mxu1 %v2110_v26 }
  0x7c   :  { %13 = vsyncpa [#allocation5], 0  ;;  %1923 = vmatpush3.bf16.msra.mxu0 %v2111_v27  ;;  %v2115_v31 = vld [vmem:[%s2683_s1 + $0x338] sm:$0xff]   ;;  %v371_v32 = vrot.slane %v2511_v53, %v2319_v41  ;;  %v2118_v35 = vld [vmem:[%s2685_s3] sm:$0xff]   ;;  %v2175_v36 = vmov 0.0   ;;  %vm2176_vm0 = vmmov 0  }
  0x7d   :  { %1924 = vmatprep.subr.bf16.mxu0 %v2113_v29  ;;  %v2116_v33 = vld [vmem:[%s2683_s1 + $0x3b8] sm:$0xff]   ;;  %v2119_v41 = vld [vmem:[%s2685_s3 + $0x8] sm:$0xff]   ;;  %v2120_v37 = vld [vmem:[%s2685_s3 + $0x10] sm:$0xff]  }
  0x7e   :  { %1945 = vmatpush3.bf16.msra.mxu1 %v2112_v28  ;;  %v387_v34 = vcombine.high %v371_v32, %v371_v32  ;;  %v2121_v38 = vld [vmem:[%s2685_s3 + $0x18] sm:$0xff]   ;;  %v2122_v39 = vld [vmem:[%s2685_s3 + $0x20] sm:$0xff]   ;;  %v2123_v40 = vld [vmem:[%s2685_s3 + $0x28] sm:$0xff]  }
  0x7f   :  { %1946 = vmatprep.subr.bf16.mxu1 %v2114_v30  ;;  %v2124_v42 = vld [vmem:[%s2685_s3 + $0x30] sm:$0xff]   ;;  %v2125_v43 = vld [vmem:[%s2685_s3 + $0x38] sm:$0xff]   ;;  %v1640_v45 = vld [vmem:[%s2684_s2] ss:$0 sm:$0xff]  ;;  %s2177_s2 = smov [#allocation2]  }
  0x80   :  { %1925 = vmatpush3.bf16.msra.mxu0 %v2115_v31  ;;  %s1618_s3 = sshll.u32 %s2177_s2, 4  ;;  %s1619_s3 = int_to_ptr.vmem [resolvable:$true] %s1618_s3 }
  0x81   :  { %1963 = vmatprep.subr.bf16.mxu0 %v2175_v36  ;;  %s2126_s30 = scalar_lea.vmem %s1619_s3, 32  ;;  %p2131_p1 = scmp.lt.s32.totalorder %s1619_s3, %s1619_s3 }
  0x82   :  { %1947 = vmatpush3.bf16.msra.mxu1 %v2116_v33  ;;  %p2127_p0 = scmp.ne.s32.totalorder %s1619_s3, %s2126_s30  ;;  %p2132_p2 = scmp.lt.s32.totalorder %s2126_s30, %s2126_s30 }
  0x83   :  { %1447 = vmatmul.mubr.bf16.vlgmr.msra.gmra.mrb[12].mxu0 %v371_v32 }
  0x84   :  { %1964 = vmatpush3.bf16.msra.mxu0 %v2118_v35  ;;  %1979 = vmatprep.mubr.msk.bf16.mxu0 %vm2176_vm0, %v2175_v36  ;;  %p2133_p3 = por %p2132_p2, %p2131_p1 }
  0x85   :  { %1487 = vmatmul.mubr.bf16.vlgmr.msra.gmra.mrb[12].mxu1 %v387_v34  ;;  %1965 = vmatprep.subr.bf16.mxu0 %v2175_v36 }
  0x86   :  { %p2134_p4 = pnand %p2133_p3, %p2127_p0 }
  0x88   :  { %1966 = vmatpush3.bf16.msra.mxu0 %v2119_v41 }
  0x89   :  { %1967 = vmatprep.subr.bf16.mxu0 %v2175_v36 }
  0x8c   :  { %1968 = vmatpush3.bf16.msra.mxu0 %v2120_v37 }
  0x8d   :  { %1969 = vmatprep.subr.bf16.mxu0 %v2175_v36 }
  0x90   :  { %1970 = vmatpush3.bf16.msra.mxu0 %v2121_v38 }
  0x91   :  { %1971 = vmatprep.subr.bf16.mxu0 %v2175_v36 }
  0x94   :  { %1972 = vmatpush3.bf16.msra.mxu0 %v2122_v39 }
  0x95   :  { %1973 = vmatprep.subr.bf16.mxu0 %v2175_v36 }
  0x98   :  { %1974 = vmatpush3.bf16.msra.mxu0 %v2123_v40 }
  0x99   :  { %1975 = vmatprep.subr.bf16.mxu0 %v2175_v36 }
  0x9c   :  { %1976 = vmatpush3.bf16.msra.mxu0 %v2124_v42 }
  0x9d   :  { %1977 = vmatprep.subr.bf16.mxu0 %v2175_v36 }
  0xa0   :  { %1978 = vmatpush3.bf16.msra.mxu0 %v2125_v43 }
  0xf6   :  { %v1794_v44 = vpop.f32.mrb[0].mxu0 }
  0xf7   :  { %v1795_v46 = vpop.f32.mrb[1].mxu0  ;;  %v1816_v47 = vpop.f32.mrb[0].mxu1 }
  0xf8   :  { %v1796_v48 = vadd.f32 %v1795_v46, %v1794_v44  ;;  %v1797_v49 = vpop.f32.mrb[2].mxu0  ;;  %v1817_v50 = vpop.f32.mrb[1].mxu1 }
  0xf9   :  { %v1798_v51 = vpop.f32.mrb[3].mxu0  ;;  %v1818_v53 = vadd.f32 %v1817_v50, %v1816_v47  ;;  %v1819_v54 = vpop.f32.mrb[2].mxu1 }
  0xfa   :  { %v1209_v52 = vadd.f32 %v1796_v48, %v1640_v45  ;;  %v1820_v55 = vpop.f32.mrb[3].mxu1 }
  0xfc   :  { %v1249_v56 = vadd.f32 %v1818_v53, %v1209_v52 }
 0x116   :  { %v1838_v57 = vpop.f32.mrb[4].mxu0 }
 0x117   :  { %v1839_v58 = vpop.f32.mrb[5].mxu0  ;;  %v1860_v59 = vpop.f32.mrb[4].mxu1 }
 0x118   :  { %v1840_v60 = vadd.f32 %v1839_v58, %v1838_v57  ;;  %v1841_v61 = vpop.f32.mrb[6].mxu0  ;;  %v1861_v62 = vpop.f32.mrb[5].mxu1 }
 0x119   :  { %v1842_v63 = vpop.f32.mrb[7].mxu0  ;;  %v1862_v1 = vadd.f32 %v1861_v62, %v1860_v59  ;;  %v1863_v2 = vpop.f32.mrb[6].mxu1 }
 0x11a   :  { %v1289_v0 = vadd.f32 %v1840_v60, %v1249_v56  ;;  %v1864_v3 = vpop.f32.mrb[7].mxu1 }
 0x11c   :  { %v1329_v4 = vadd.f32 %v1862_v1, %v1289_v0 }
 0x136   :  { %v1882_v5 = vpop.f32.mrb[8].mxu0 }
 0x137   :  { %v1883_v6 = vpop.f32.mrb[9].mxu0 }
 0x138   :  { %v1904_v7 = vpop.f32.mrb[8].mxu1  ;;  %v1884_v8 = vadd.f32 %v1883_v6, %v1882_v5  ;;  %v1885_v9 = vpop.f32.mrb[10].mxu0 }
 0x139   :  { %v1905_v10 = vpop.f32.mrb[9].mxu1  ;;  %v1886_v11 = vpop.f32.mrb[11].mxu0 }
 0x13a   :  { %v1369_v12 = vadd.f32 %v1884_v8, %v1329_v4  ;;  %v1906_v13 = vadd.f32 %v1905_v10, %v1904_v7  ;;  %v1907_v14 = vpop.f32.mrb[10].mxu1 }
 0x13b   :  { %v1908_v15 = vpop.f32.mrb[11].mxu1 }
 0x13c   :  { %v1409_v16 = vadd.f32 %v1906_v13, %v1369_v12 }
 0x156   :  { %v1926_v17 = vpop.f32.mrb[12].mxu0 }
 0x157   :  { %v1927_v18 = vpop.f32.mrb[13].mxu0 }
 0x158   :  { %v1948_v19 = vpop.f32.mrb[12].mxu1  ;;  %v1928_v20 = vadd.f32 %v1927_v18, %v1926_v17  ;;  %v1929_v21 = vpop.f32.mrb[14].mxu0 }
 0x159   :  { %v1949_v22 = vpop.f32.mrb[13].mxu1  ;;  %v1930_v23 = vpop.f32.mrb[15].mxu0 }
 0x15a   :  { %v1449_v24 = vadd.f32 %v1928_v20, %v1409_v16  ;;  %v1950_v25 = vadd.f32 %v1949_v22, %v1948_v19  ;;  %v1951_v26 = vpop.f32.mrb[14].mxu1 }
 0x15b   :  { %v1952_v27 = vpop.f32.mrb[15].mxu1 }
 0x15c   :  { %v1489_v28 = vadd.f32 %v1950_v25, %v1449_v24 }
 0x15e   :  { %v1496_v29 = vmul.f32 0.01, %v1489_v28  ;;  %1494 = vst [vmem:[#allocation2] sm:$0x3] %v1489_v28  ;;  %vm1495_vm1 = vcmp.ge.f32.partialorder %v1489_v28, 0.0 }
 0x160   :  { %v1497_v30 = vsel %vm1495_vm1, %v1489_v28, %v1496_v29 }
 0x161   :  { %v1498_v31 = vpack.c.bf16 %v1497_v30, %v1497_v30 }
 0x163   :  { %1980 = vmatmul.mubr.bf16.vlgmr.msra.gmra.mrb[16].mxu0 %v1498_v31 }
 0x164   :  { %2137 = shalt.err (!%p2134_p4)
}
 0x165   :  { %s2138_s9 = scalar_lea.hbm %s2687_s5, 32 }
 0x166   :  { %p2139_p5 = scmp.ne.s32.totalorder %s2687_s5, %s2138_s9  ;;  %p2142_p6 = scmp.lt.u32.totalorder %s2138_s9, %s2687_s5 }
 0x168   :  { %p2144_p7 = pnand %p2142_p6, %p2139_p5 }
 0x16a   :  { %2147 = shalt.err (!%p2144_p7)
}
 0x16b   :  { %1621 = dma.vmem_to_hbm [thread:$0]  %s1619_s3, 32, %s2687_s5, [#allocation3]   ;;  %v1769_v32 = vld [vmem:[%s2686_s4] ss:$0 sm:$0xff]  ;;  %vm1610_vm2 = vcmask 74752  }
 0x16c   :  { %s2178_s1 = smov [#allocation4]  }
 0x16d   :  { %s1628_s17 = sshll.u32 %s2178_s1, 4  ;;  %s1629_s17 = int_to_ptr.vmem [resolvable:$true] %s1628_s17 }
 0x16e   :  { %s2148_s18 = scalar_lea.vmem %s1629_s17, 32  ;;  %p2153_p9 = scmp.lt.s32.totalorder %s1629_s17, %s1629_s17 }
 0x16f   :  { %p2149_p8 = scmp.ne.s32.totalorder %s1629_s17, %s2148_s18  ;;  %p2154_p10 = scmp.lt.s32.totalorder %s2148_s18, %s2148_s18 }
 0x171   :  { %p2155_p11 = por %p2154_p10, %p2153_p9 }
 0x173   :  { %p2156_p12 = pnand %p2155_p11, %p2149_p8 }
 0x236   :  { %v1604_v33 = vpop.f32.mrb[16].mxu0 }
 0x237   :  { %v1605_v34 = vadd.f32 %v1769_v32, %v1604_v33  ;;  %v1981_v35 = vpop.f32.mrb[17].mxu0 }
 0x238   :  { %v1607_v36 = vpop.f32.mrb[18].mxu0 }
 0x239   :  { %v1982_v41 = vpop.f32.mrb[19].mxu0  ;;  %1611 = vst.msk [vmem:[#allocation4] sm:$0x3] %vm1610_vm2, %v1605_v34 }
 0x23a   :  { %2159 = shalt.err (!%p2156_p12)
}
 0x23b   :  { %s2160_s4 = scalar_lea.hbm %s2688_s6, 32 }
 0x23c   :  { %p2161_p13 = scmp.ne.s32.totalorder %s2688_s6, %s2160_s4  ;;  %p2164_p0 = scmp.lt.u32.totalorder %s2160_s4, %s2688_s6 }
 0x23e   :  { %p2166_p1 = pnand %p2164_p0, %p2161_p13 }
 0x240   :  { %2169 = shalt.err (!%p2166_p1)
}
 0x241   :  { %1631 = dma.vmem_to_hbm [thread:$0]  %s1629_s17, 32, %s2688_s6, [#allocation5]  }
 0x242   :  { %2170 = dma.done.wait [#allocation3], 32  }
 0x243   :  { %2171 = vsyncadd [#allocation3], 4294967264 }
 0x244   :  { %2172 = dma.done.wait [#allocation5], 32  }
 0x245   :  { %2173 = vsyncadd [#allocation5], 4294967264 }
 0x246   :  { %1638 = vsyncpa [#allocation3], 1 }
 0x247   :  { %1639 = vsyncpa [#allocation5], 1 }

// kernel: cnn_toy_forward.4
= control target key start
LH: loop header
LB: loop body
LE: loop exit
PB: predicated region body
PF: predicated region fallthrough
CT: control target
= control target key end

     0   :  { %s4793_s18 = smov 0   ;;  %s6559_s0 = inlined_call_operand.vmem [shape: bf16[2,4,9,9,64], index: 0, kind: input, shape index: {}]   ;;  %s6560_s1 = inlined_call_operand.vmem [shape: bf16[2,3,256,64], index: 1, kind: input, shape index: {}]   ;;  %s6561_s2 = inlined_call_operand.vmem [shape: f32[1,64], index: 2, kind: input, shape index: {}]   ;;  %s6562_s3 = inlined_call_operand.vmem [shape: bf16[64,32], index: 3, kind: input, shape index: {}]   ;;  %s6563_s4 = inlined_call_operand.vmem [shape: f32[1,32], index: 4, kind: input, shape index: {}]   ;;  %s6564_s5 = inlined_call_operand.vmem [shape: bf16[2,64,32], index: 5, kind: output, shape index: {}]  }
   0x1 LB: > { %s3597_s19 = sadd.s32 4294967295, %s4760_s18   ;;  %p3601_p0 = scmp.ge.s32.totalorder %s4760_s18, 1  ;;  %s4760_s18 = sphi %s4793_s18, %s15_s18  }
   0x2   : > { %p187_p1 = scmp.lt.s32.totalorder %s4760_s18, 3 }
   0x4   : > { %p188_p2 = pnand %p3601_p0, %p187_p1 }
   0x6   : > { %191 = sbr.rel (%p188_p2) target bundleno = 795 (0x31b), region = 40 }
   0xd   : > { %p215_p3 = scmp.lt.s32.totalorder %s3597_s19, 1  ;;  %vm251_vm0 = vsmask.f32 3328  ;;  %vm252_vm1 = vsmask.f32 7440  ;;  %v4600_v0 = vld [vmem:[%s6560_s1 + $0xc0] sm:$0xff]  }
   0xe   : > { %v4601_v1 = vld [vmem:[%s6560_s1 + $0x80] sm:$0xff]   ;;  %4066 = vmatprep.subr.bf16.mxu0 %v4600_v0  ;;  %v4604_v4 = vld [vmem:[%s6560_s1 + $0xc8] sm:$0xff]   ;;  %vm4858_vm2 = vmor %vm251_vm0, %vm252_vm1  ;;  %s4762_s21 = smov 64   ;;  %vm1340_vm3 = vcmask 523264   ;;  %vm3533_vm14 = vcmask 257024  }
   0xf   : > { %s6685_s19 = smov (!%p215_p3, %s3597_s19), 1  ;;  %v4602_v2 = vld [vmem:[%s6560_s1 + $0x40] sm:$0xff]   ;;  %4067 = vmatpush3.bf16.msra.mxu0 %v4601_v1  ;;  %v4605_v33 = vld [vmem:[%s6560_s1 + $0x88] sm:$0xff]  }
  0x10   : > { %s4578_s24 = smul.u32 288, %s6685_s19  ;;  %v4603_v3 = vld [vmem:[%s6560_s1] sm:$0xff]   ;;  %4106 = vmatprep.subr.bf16.mxu1 %v4602_v2  ;;  %4068 = vmatprep.subr.bf16.mxu0 %v4604_v4  ;;  %v4606_v40 = vld [vmem:[%s6560_s1 + $0x48] sm:$0xff]   ;;  %v4608_v2 = vld [vmem:[%s6560_s1 + $0xd0] sm:$0xff]   ;;  %s4057_s11 = sshll.u32 %s6685_s19, 5 }
  0x11   : > { %4107 = vmatpush3.bf16.msra.mxu1 %v4603_v3  ;;  %v4607_v60 = vld [vmem:[%s6560_s1 + $0x8] sm:$0xff]  }
  0x12   : > { %s4819_s6 = scalar_lea.vmem %s6559_s0, %s4578_s24  ;;  %4108 = vmatprep.subr.bf16.mxu1 %v4606_v40 }
  0x13   : > { %v4825_v5 = vld [vmem:[%s4819_s6 + $0xd8] sm:$0xf]  ;;  %v4828_v6 = vld [vmem:[%s4819_s6 + $0xe0] sm:$0xf]  ;;  %v3645_v7 = vld [vmem:[%s4819_s6 + $0xdc] sm:$0x1]  ;;  %4069 = vmatpush3.bf16.msra.mxu0 %v4605_v33 }
  0x14   : > { %v3646_v8 = vld [vmem:[%s4819_s6 + $0xe4] sm:$0x1]  ;;  %v633_v9 = vshrl.u32 %v4825_v5, 16  ;;  %v636_v10 = vshll.u32 %v4825_v5, 16  ;;  %v642_v11 = vshll.u32 %v3645_v7, 16  ;;  %v647_v12 = vshrl.u32 %v4828_v6, 16  ;;  %4070 = vmatprep.subr.bf16.mxu0 %v4608_v2 }
  0x15   : > { %v650_v13 = vshll.u32 %v4828_v6, 16  ;;  %v656_v14 = vshll.u32 %v3646_v8, 16  ;;  %v4837_v15 = vld [vmem:[%s4819_s6 + $0x48] sm:$0xf]  ;;  %v4840_v16 = vld [vmem:[%s4819_s6 + $0x50] sm:$0xf]  ;;  %v3737_v17 = vcombine.low %v4825_v5, %v4828_v6  ;;  %4109 = vmatpush3.bf16.msra.mxu1 %v4607_v60 }
  0x16   : > { %v635_v18 = vrot.slane %v633_v9, 4  ;;  %v638_v19 = vrot.slane %v636_v10, 5  ;;  %v644_v20 = vrot.slane %v642_v11, 5  ;;  %v649_v21 = vrot.slane %v647_v12, 4  ;;  %v3613_v22 = vld [vmem:[%s4819_s6 + $0x4c] sm:$0x1] }
  0x17   : > { %v652_v23 = vrot.slane %v650_v13, 5  ;;  %v658_v24 = vrot.slane %v656_v14, 5  ;;  %v3614_v25 = vld [vmem:[%s4819_s6 + $0x54] sm:$0x1]  ;;  %v375_v26 = vshrl.u32 %v4837_v15, 16  ;;  %v378_v27 = vshll.u32 %v4837_v15, 16 }
  0x18   : > { %v639_v28 = vor.u32 %v638_v19, %v635_v18  ;;  %v384_v29 = vshll.u32 %v3613_v22, 16  ;;  %v389_v30 = vshrl.u32 %v4840_v16, 16  ;;  %v392_v31 = vshll.u32 %v4840_v16, 16  ;;  %v4851_v32 = vld [vmem:[%s4819_s6 + $0xe8] sm:$0xf]  ;;  %v4609_v10 = vld [vmem:[%s6560_s1 + $0x90] sm:$0xff]  }
  0x19   : > { %v653_v35 = vor.u32 %v652_v23, %v649_v21  ;;  %v377_v36 = vrot.slane %v375_v26, 4  ;;  %v380_v37 = vrot.slane %v378_v27, 5  ;;  %v398_v38 = vshll.u32 %v3614_v25, 16  ;;  %v4863_v39 = vld [vmem:[%s4819_s6 + $0xf0] sm:$0xf]  ;;  %4071 = vmatpush3.bf16.msra.mxu0 %v4609_v10 }
  0x1a   : > { %v640_v41 = vrot.slane %v639_v28, 4  ;;  %v386_v42 = vrot.slane %v384_v29, 5  ;;  %v391_v43 = vrot.slane %v389_v30, 4  ;;  %v394_v44 = vrot.slane %v392_v31, 5  ;;  %v3647_v45 = vld [vmem:[%s4819_s6 + $0xec] sm:$0x1] }
  0x1b   : > { %v654_v46 = vrot.slane %v653_v35, 4  ;;  %v381_v47 = vor.u32 %v380_v37, %v377_v36  ;;  %v400_v48 = vrot.slane %v398_v38, 5  ;;  %v3721_v49 = vcombine.low %v4837_v15, %v4840_v16  ;;  %v3648_v52 = vld [vmem:[%s4819_s6 + $0xf4] sm:$0x1]  ;;  %v4880_v59 = vld [vmem:[%s4819_s6 + $0x58] sm:$0xf] }
  0x1c   : > { %v645_v50 = vsel %vm4858_vm2, %v640_v41, %v644_v20  ;;  %v395_v51 = vor.u32 %v394_v44, %v391_v43  ;;  %v661_v53 = vshrl.u32 %v4851_v32, 16  ;;  %v664_v54 = vshll.u32 %v4851_v32, 16  ;;  %v4886_v1 = vld [vmem:[%s4819_s6 + $0x60] sm:$0xf]  ;;  %v3615_v9 = vld [vmem:[%s4819_s6 + $0x5c] sm:$0x1] }
  0x1d   : > { %v659_v55 = vsel %vm4858_vm2, %v654_v46, %v658_v24  ;;  %v382_v56 = vrot.slane %v381_v47, 4  ;;  %v670_v57 = vshll.u32 %v3647_v45, 16  ;;  %v675_v58 = vshrl.u32 %v4863_v39, 16  ;;  %v4610_v18 = vld [vmem:[%s6560_s1 + $0x50] sm:$0xff]   ;;  %v3616_v21 = vld [vmem:[%s4819_s6 + $0x64] sm:$0x1] }
  0x1e   : > { %v3745_v61 = vcombine.low %v645_v50, %v659_v55  ;;  %v396_v62 = vrot.slane %v395_v51, 4  ;;  %v663_v63 = vrot.slane %v661_v53, 4  ;;  %v666_v0 = vrot.slane %v664_v54, 5  ;;  %v4611_v24 = vld [vmem:[%s6560_s1 + $0x10] sm:$0xff]   ;;  %v4914_v29 = vld [vmem:[%s4819_s6 + $0xf8] sm:$0xf]  ;;  %4110 = vmatprep.subr.bf16.mxu1 %v4610_v18 }
  0x1f   : > { %v387_v3 = vsel %vm4858_vm2, %v382_v56, %v386_v42  ;;  %v672_v4 = vrot.slane %v670_v57, 5  ;;  %v677_v7 = vrot.slane %v675_v58, 4  ;;  %v678_v8 = vshll.u32 %v4863_v39, 16  ;;  %v3649_v36 = vld [vmem:[%s4819_s6 + $0xfc] sm:$0x1]  ;;  %4111 = vmatpush3.bf16.msra.mxu1 %v4611_v24 }
  0x20   : > { %1445 = vrot.lane.b32.xlu0 %v3745_v61, %s4762_s21  ;;  %v401_v11 = vsel %vm4858_vm2, %v396_v62, %v400_v48  ;;  %v667_v12 = vor.u32 %v666_v0, %v663_v63  ;;  %v684_v13 = vshll.u32 %v3648_v52, 16  ;;  %v3738_v14 = vcombine.low %v4851_v32, %v4863_v39  ;;  %v4612_v37 = vld [vmem:[%s6560_s1 + $0xd8] sm:$0xff]   ;;  %v4929_v43 = vld [vmem:[%s4819_s6 + $0x100] sm:$0xf]  ;;  %v3650_v54 = vld [vmem:[%s4819_s6 + $0x104] sm:$0x1] }
  0x21   : > { %v3729_v19 = vcombine.low %v387_v3, %v401_v11  ;;  %v680_v20 = vrot.slane %v678_v8, 5  ;;  %v403_v22 = vshrl.u32 %v4880_v59, 16  ;;  %v406_v23 = vshll.u32 %v4880_v59, 16  ;;  %v4613_v44 = vld [vmem:[%s6560_s1 + $0x98] sm:$0xff]   ;;  %4072 = vmatprep.subr.bf16.mxu0 %v4612_v37  ;;  %v4947_v56 = vld [vmem:[%s4819_s6 + $0x68] sm:$0xf] }
  0x22   : > { %v668_v25 = vrot.slane %v667_v12, 4  ;;  %v686_v26 = vrot.slane %v684_v13, 5  ;;  %v412_v27 = vshll.u32 %v3615_v9, 16  ;;  %v417_v28 = vshrl.u32 %v4886_v1, 16  ;;  %4073 = vmatpush3.bf16.msra.mxu0 %v4613_v44  ;;  %v3617_v61 = vld [vmem:[%s4819_s6 + $0x6c] sm:$0x1] }
  0x23   : > { %1332 = vrot.lane.b32.xlu1 %v3729_v19, %s4762_s21  ;;  %v681_v30 = vor.u32 %v680_v20, %v677_v7  ;;  %v405_v31 = vrot.slane %v403_v22, 4  ;;  %v408_v33 = vrot.slane %v406_v23, 5  ;;  %v420_v35 = vshll.u32 %v4886_v1, 16  ;;  %v4614_v15 = vld [vmem:[%s6560_s1 + $0x58] sm:$0xff]   ;;  %v3618_v10 = vld [vmem:[%s4819_s6 + $0x74] sm:$0x1] }
  0x24   : > { %1413 = vrot.lane.b32.xlu0 %v3737_v17, %s4762_s21  ;;  %v673_v38 = vsel %vm4858_vm2, %v668_v25, %v672_v4  ;;  %v414_v40 = vrot.slane %v412_v27, 5  ;;  %v419_v41 = vrot.slane %v417_v28, 4  ;;  %v426_v42 = vshll.u32 %v3616_v21, 16  ;;  %v4615_v0 = vld [vmem:[%s6560_s1 + $0x18] sm:$0xff]   ;;  %v4965_v4 = vld [vmem:[%s4819_s6 + $0x70] sm:$0xf]  ;;  %4112 = vmatprep.subr.bf16.mxu1 %v4614_v15 }
  0x25   : > { %v682_v45 = vrot.slane %v681_v30, 4  ;;  %v409_v46 = vor.u32 %v408_v33, %v405_v31  ;;  %v422_v47 = vrot.slane %v420_v35, 5  ;;  %v3722_v5 = vcombine.low %v4880_v59, %v4886_v1  ;;  %4113 = vmatpush3.bf16.msra.mxu1 %v4615_v0  ;;  %v4616_v13 = vld [vmem:[%s6560_s1 + $0xe0] sm:$0xff]   ;;  %v4980_v39 = vld [vmem:[%s4819_s6 + $0x108] sm:$0xf] }
  0x26   : > { %v428_v6 = vrot.slane %v426_v42, 5  ;;  %v689_v17 = vshrl.u32 %v4914_v29, 16  ;;  %v692_v48 = vshll.u32 %v4914_v29, 16  ;;  %v698_v50 = vshll.u32 %v3649_v36, 16  ;;  %v3651_v25 = vld [vmem:[%s4819_s6 + $0x10c] sm:$0x1]  ;;  %4074 = vmatprep.subr.bf16.mxu0 %v4616_v13 }
  0x27   : > { %1300 = vrot.lane.b32.xlu1 %v3721_v49, %s4762_s21  ;;  %v687_v51 = vsel %vm4858_vm2, %v682_v45, %v686_v26  ;;  %v410_v52 = vrot.slane %v409_v46, 4  ;;  %v423_v53 = vor.u32 %v422_v47, %v419_v41  ;;  %v703_v55 = vshrl.u32 %v4929_v43, 16  ;;  %v4618_v26 = vld [vmem:[%s6560_s1 + $0x60] sm:$0xff]   ;;  %v5000_v31 = vld [vmem:[%s4819_s6 + $0x110] sm:$0xf] }
  0x28   : > { %v3746_v57 = vcombine.low %v673_v38, %v687_v51  ;;  %v691_v58 = vrot.slane %v689_v17, 4  ;;  %v694_v59 = vrot.slane %v692_v48, 5  ;;  %v4949_v60 = vrot.slane %v698_v50, 5  ;;  %4114 = vmatprep.subr.bf16.mxu1 %v4618_v26  ;;  %v4619_v38 = vld [vmem:[%s6560_s1 + $0x20] sm:$0xff]   ;;  %v3652_v42 = vld [vmem:[%s4819_s6 + $0x114] sm:$0x1] }
  0x29   : > { %v415_v16 = vsel %vm4858_vm2, %v410_v52, %v414_v40  ;;  %v424_v49 = vrot.slane %v423_v53, 4  ;;  %v705_v62 = vrot.slane %v703_v55, 4  ;;  %v706_v63 = vshll.u32 %v4929_v43, 16  ;;  %4115 = vmatpush3.bf16.msra.mxu1 %v4619_v38  ;;  %v4620_v17 = vld [vmem:[%s6560_s1 + $0xe8] sm:$0xff]   ;;  %v3619_v53 = vld [vmem:[%s4819_s6 + $0x7c] sm:$0x1] }
  0x2a   : > { %1447 = vrot.lane.b32.xlu0 %v3746_v57, %s4762_s21  ;;  %v695_v1 = vor.u32 %v694_v59, %v691_v58  ;;  %v712_v2 = vshll.u32 %v3650_v54, 16  ;;  %v3739_v3 = vcombine.low %v4914_v29, %v4929_v43  ;;  %v431_v7 = vshrl.u32 %v4947_v56, 16  ;;  %v5025_v58 = vld [vmem:[%s4819_s6 + $0x80] sm:$0xf]  ;;  %v4621_v59 = vld [vmem:[%s6560_s1 + $0xa8] sm:$0xff]  }
  0x2b   : > { %1415 = vrot.lane.b32.xlu1 %v3738_v14, %s4762_s21  ;;  %v429_v8 = vsel %vm4858_vm2, %v424_v49, %v428_v6  ;;  %v708_v9 = vrot.slane %v706_v63, 5  ;;  %v434_v11 = vshll.u32 %v4947_v56, 16  ;;  %v440_v12 = vshll.u32 %v3617_v61, 16  ;;  %v4617_v14 = vld [vmem:[%s6560_s1 + $0xa0] sm:$0xff]   ;;  %v5013_v6 = vld [vmem:[%s4819_s6 + $0x78] sm:$0xf] }
  0x2c   : > { %v3730_v18 = vcombine.low %v415_v16, %v429_v8  ;;  %v696_v19 = vrot.slane %v695_v1, 4  ;;  %v714_v20 = vrot.slane %v712_v2, 5  ;;  %v433_v32 = vrot.slane %v431_v7, 4  ;;  %4075 = vmatpush3.bf16.msra.mxu0 %v4617_v14  ;;  %v3620_v16 = vld [vmem:[%s4819_s6 + $0x84] sm:$0x1] }
  0x2d   : > { %v709_v21 = vor.u32 %v708_v9, %v705_v62  ;;  %v436_v22 = vrot.slane %v434_v11, 5  ;;  %v4985_v23 = vrot.slane %v440_v12, 5  ;;  %v445_v24 = vshrl.u32 %v4965_v4, 16  ;;  %4076 = vmatprep.subr.bf16.mxu0 %v4620_v17  ;;  %v5037_v2 = vld [vmem:[%s4819_s6 + $0x50] sm:$0xf]  ;;  %v4622_v11 = vld [vmem:[%s6560_s1 + $0x68] sm:$0xff]  }
  0x2e   : > { %1334 = vrot.lane.b32.xlu0 %v3730_v18, %s4762_s21  ;;  %v701_v27 = vsel %vm4858_vm2, %v696_v19, %v4949_v60  ;;  %v448_v28 = vshll.u32 %v4965_v4, 16  ;;  %v454_v29 = vshll.u32 %v3618_v10, 16  ;;  %v3723_v30 = vcombine.low %v4947_v56, %v4965_v4  ;;  %v5043_v9 = vld [vmem:[%s4819_s6 + $0x58] sm:$0xf]  ;;  %v3677_v10 = vld [vmem:[%s4819_s6 + $0x54] sm:$0x1]  ;;  %4116 = vmatprep.subr.bf16.mxu1 %v4622_v11 }
  0x2f   : > { %1302 = vrot.lane.b32.xlu1 %v3722_v5, %s4762_s21  ;;  %v710_v33 = vrot.slane %v709_v21, 4  ;;  %v437_v35 = vor.u32 %v436_v22, %v433_v32  ;;  %v447_v36 = vrot.slane %v445_v24, 4  ;;  %v717_v37 = vshrl.u32 %v4980_v39, 16  ;;  %v3678_v21 = vld [vmem:[%s4819_s6 + $0x5c] sm:$0x1]  ;;  %v4623_v22 = vld [vmem:[%s6560_s1 + $0x28] sm:$0xff]  }
  0x30   : > { %v450_v40 = vrot.slane %v448_v28, 5  ;;  %v456_v41 = vrot.slane %v454_v29, 5  ;;  %v720_v43 = vshll.u32 %v4980_v39, 16  ;;  %v726_v44 = vshll.u32 %v3651_v25, 16  ;;  %4077 = vmatpush3.bf16.msra.mxu0 %v4621_v59  ;;  %4117 = vmatpush3.bf16.msra.mxu1 %v4623_v22  ;;  %v3680_v17 = vld [vmem:[%s4819_s6 + $0x6c] sm:$0x1] }
  0x31   : > { %v715_v45 = vsel %vm4858_vm2, %v710_v33, %v714_v20  ;;  %v438_v46 = vrot.slane %v437_v35, 4  ;;  %v719_v47 = vrot.slane %v717_v37, 4  ;;  %v731_v5 = vshrl.u32 %v5000_v31, 16  ;;  %v3679_v33 = vld [vmem:[%s4819_s6 + $0x64] sm:$0x1] }
  0x32   : > { %v3747_v48 = vcombine.low %v701_v27, %v715_v45  ;;  %v451_v50 = vor.u32 %v450_v40, %v447_v36  ;;  %v722_v51 = vrot.slane %v720_v43, 5  ;;  %v728_v52 = vrot.slane %v726_v44, 5  ;;  %v5062_v27 = vld [vmem:[%s4819_s6 + $0x60] sm:$0xf]  ;;  %v5071_v40 = vld [vmem:[%s4819_s6 + $0x68] sm:$0xf] }
  0x33   : > { %1417 = vrot.lane.b32.xlu1 %v3739_v3, %s4762_s21  ;;  %v443_v54 = vsel %vm4858_vm2, %v438_v46, %v4985_v23  ;;  %v733_v55 = vrot.slane %v731_v5, 4  ;;  %v734_v56 = vshll.u32 %v5000_v31, 16  ;;  %v740_v57 = vshll.u32 %v3652_v42, 16  ;;  %v3681_v59 = vld [vmem:[%s4819_s6 + $0x74] sm:$0x1] }
  0x34   : > { %1449 = vrot.lane.b32.xlu0 %v3747_v48, %s4762_s21  ;;  %v452_v60 = vrot.slane %v451_v50, 4  ;;  %v723_v61 = vor.u32 %v722_v51, %v719_v47  ;;  %v3740_v15 = vcombine.low %v4980_v39, %v5000_v31  ;;  %v459_v49 = vshrl.u32 %v5013_v6, 16  ;;  %v4625_v48 = vld [vmem:[%s6560_s1 + $0xb0] sm:$0xff]  }
  0x35   : > { %v736_v62 = vrot.slane %v734_v56, 5  ;;  %v742_v63 = vrot.slane %v740_v57, 5  ;;  %v462_v0 = vshll.u32 %v5013_v6, 16  ;;  %v468_v1 = vshll.u32 %v3619_v53, 16 }
  0x36   : > { %v457_v3 = vsel %vm4858_vm2, %v452_v60, %v456_v41  ;;  %v724_v4 = vrot.slane %v723_v61, 4  ;;  %v461_v7 = vrot.slane %v459_v49, 4  ;;  %v473_v8 = vshrl.u32 %v5025_v58, 16  ;;  %v4624_v41 = vld [vmem:[%s6560_s1 + $0xf0] sm:$0xff]   ;;  %v3666_v49 = vld [vmem:[%s4819_s6 + $0x78] sm:$0xf] }
  0x37   : > { %v3731_v12 = vcombine.low %v443_v54, %v457_v3  ;;  %1304 = vrot.lane.b32.xlu1 %v3723_v30, %s4762_s21  ;;  %v737_v13 = vor.u32 %v736_v62, %v733_v55  ;;  %v464_v18 = vrot.slane %v462_v0, 5  ;;  %v470_v19 = vrot.slane %v468_v1, 5  ;;  %4078 = vmatprep.subr.bf16.mxu0 %v4624_v41  ;;  %v5088_v54 = vld [vmem:[%s4819_s6 + $0x70] sm:$0xf] }
  0x38   : > { %v729_v20 = vsel %vm4858_vm2, %v724_v4, %v728_v52  ;;  %v475_v32 = vrot.slane %v473_v8, 4  ;;  %v476_v39 = vshll.u32 %v5025_v58, 16  ;;  %v482_v14 = vshll.u32 %v3620_v16, 16  ;;  %4079 = vmatpush3.bf16.msra.mxu0 %v4625_v48  ;;  %v4626_v62 = vld [vmem:[%s6560_s1 + $0x70] sm:$0xff]  }
  0x39   : > { %1336 = vrot.lane.b32.xlu0 %v3731_v12, %s4762_s21  ;;  %v738_v23 = vrot.slane %v737_v13, 4  ;;  %v465_v24 = vor.u32 %v464_v18, %v461_v7  ;;  %v3724_v25 = vcombine.low %v5013_v6, %v5025_v58  ;;  %v891_v26 = vshrl.u32 %v5037_v2, 16  ;;  %4118 = vmatprep.subr.bf16.mxu1 %v4626_v62 }
  0x3a   : > { %v478_v28 = vrot.slane %v476_v39, 5  ;;  %v484_v29 = vrot.slane %v482_v14, 5  ;;  %v894_v30 = vshll.u32 %v5037_v2, 16  ;;  %v900_v31 = vshll.u32 %v3677_v10, 16  ;;  %v4627_v10 = vld [vmem:[%s6560_s1 + $0x30] sm:$0xff]  }
  0x3b   : > { %v743_v35 = vsel %vm4858_vm2, %v738_v23, %v742_v63  ;;  %1419 = vrot.lane.b32.xlu1 %v3740_v15, %s4762_s21  ;;  %v466_v36 = vrot.slane %v465_v24, 4  ;;  %v893_v37 = vrot.slane %v891_v26, 4  ;;  %v905_v38 = vshrl.u32 %v5043_v9, 16  ;;  %v3683_v14 = vld [vmem:[%s4819_s6 + $0x84] sm:$0x1]  ;;  %4119 = vmatpush3.bf16.msra.mxu1 %v4627_v10  ;;  %v4628_v26 = vld [vmem:[%s6560_s1 + $0xf8] sm:$0xff]  }
  0x3c   : > { %v3748_v42 = vcombine.low %v729_v20, %v743_v35  ;;  %v479_v43 = vor.u32 %v478_v28, %v475_v32  ;;  %v896_v44 = vrot.slane %v894_v30, 5  ;;  %v902_v45 = vrot.slane %v900_v31, 5  ;;  %4080 = vmatprep.subr.bf16.mxu0 %v4628_v26 }
  0x3d   : > { %v471_v46 = vsel %vm4858_vm2, %v466_v36, %v470_v19  ;;  %v907_v47 = vrot.slane %v905_v38, 4  ;;  %v908_v5 = vshll.u32 %v5043_v9, 16  ;;  %v914_v6 = vshll.u32 %v3678_v21, 16  ;;  %v3667_v19 = vld [vmem:[%s4819_s6 + $0x80] sm:$0xf]  ;;  %v4629_v38 = vld [vmem:[%s6560_s1 + $0xb8] sm:$0xff]  }
  0x3e   : > { %1451 = vrot.lane.b32.xlu0 %v3748_v42, %s4762_s21  ;;  %v480_v50 = vrot.slane %v479_v43, 4  ;;  %v897_v51 = vor.u32 %v896_v44, %v893_v37  ;;  %v3753_v52 = vcombine.low %v5037_v2, %v5043_v9  ;;  %v919_v53 = vshrl.u32 %v5062_v27, 16  ;;  %v3682_v9 = vld [vmem:[%s4819_s6 + $0x7c] sm:$0x1]  ;;  %v3684_v37 = vld [vmem:[%s4819_s6 + $0x8c] sm:$0x1]  ;;  %4081 = vmatpush3.bf16.msra.mxu0 %v4629_v38 }
  0x3f   : > { %1306 = vrot.lane.b32.xlu1 %v3724_v25, %s4762_s21  ;;  %v910_v55 = vrot.slane %v908_v5, 5  ;;  %v916_v56 = vrot.slane %v914_v6, 5  ;;  %v922_v57 = vshll.u32 %v5062_v27, 16  ;;  %v928_v58 = vshll.u32 %v3679_v33, 16  ;;  %v3668_v25 = vld [vmem:[%s4819_s6 + $0x88] sm:$0xf] }
  0x40   : > { %v485_v60 = vsel %vm4858_vm2, %v480_v50, %v484_v29  ;;  %v898_v61 = vrot.slane %v897_v51, 4  ;;  %v921_v15 = vrot.slane %v919_v53, 4  ;;  %v933_v16 = vshrl.u32 %v5071_v40, 16  ;;  %v4630_v50 = vld [vmem:[%s6560_s1 + $0x78] sm:$0xff]  }
  0x41   : > { %v3732_v63 = vcombine.low %v471_v46, %v485_v60  ;;  %v911_v0 = vor.u32 %v910_v55, %v907_v47  ;;  %v924_v1 = vrot.slane %v922_v57, 5  ;;  %v930_v2 = vrot.slane %v928_v58, 5  ;;  %4120 = vmatprep.subr.bf16.mxu1 %v4630_v50  ;;  %v4631_v58 = vld [vmem:[%s6560_s1 + $0x38] sm:$0xff]  }
  0x42   : > { %v903_v3 = vsel %vm4858_vm2, %v898_v61, %v902_v45  ;;  %v935_v4 = vrot.slane %v933_v16, 4  ;;  %v936_v7 = vshll.u32 %v5071_v40, 16  ;;  %v942_v8 = vshll.u32 %v3680_v17, 16  ;;  %v4633_v16 = vld [vmem:[%s6560_s1 + $0x140] sm:$0xff]   ;;  %4121 = vmatpush3.bf16.msra.mxu1 %v4631_v58 }
  0x43   : > { %1338 = vrot.lane.b32.xlu0 %v3732_v63, %s4762_s21  ;;  %v912_v11 = vrot.slane %v911_v0, 4  ;;  %1525 = vrot.lane.b32.xlu1 %v3753_v52, %s4762_s21  ;;  %v925_v12 = vor.u32 %v924_v1, %v921_v15  ;;  %v3754_v13 = vcombine.low %v5062_v27, %v5071_v40  ;;  %v947_v18 = vshrl.u32 %v5088_v54, 16 }
  0x44   : > { %v938_v20 = vrot.slane %v936_v7, 5  ;;  %v950_v32 = vshll.u32 %v5088_v54, 16  ;;  %v956_v39 = vshll.u32 %v3681_v59, 16  ;;  %v961_v24 = vshrl.u32 %v3666_v49, 16  ;;  %4146 = vmatprep.subr.bf16.mxu0 %v4633_v16  ;;  %v5206_v16 = vld [vmem:[%s4819_s6 + $0x14] sm:$0x1] }
  0x45   : > { %v917_v21 = vsel %vm4858_vm2, %v912_v11, %v916_v56  ;;  %v926_v22 = vrot.slane %v925_v12, 4  ;;  %v949_v23 = vrot.slane %v947_v18, 4  ;;  %v944_v29 = vrot.slane %v942_v8, 5  ;;  %v4636_v8 = vld [vmem:[%s6560_s1 + $0x240] sm:$0xff]   ;;  %v5158_v11 = vld [vmem:[%s4819_s6 + $0x90] sm:$0xf] }
  0x46   : > { %v3761_v27 = vcombine.low %v903_v3, %v917_v21  ;;  %v939_v28 = vor.u32 %v938_v20, %v935_v4  ;;  %v952_v30 = vrot.slane %v950_v32, 5  ;;  %v963_v33 = vrot.slane %v961_v24, 4  ;;  %4186 = vmatprep.subr.bf16.mxu1 %v4636_v8  ;;  %v5161_v12 = vld [vmem:[%s4819_s6 + $0x98] sm:$0xf]  ;;  %v3637_v20 = vld [vmem:[%s4819_s6 + $0x94] sm:$0x1] }
  0x47   : > { %v931_v31 = vsel %vm4858_vm2, %v926_v22, %v930_v2  ;;  %1527 = vrot.lane.b32.xlu1 %v3754_v13, %s4762_s21  ;;  %v964_v35 = vshll.u32 %v3666_v49, 16  ;;  %v970_v36 = vshll.u32 %v3682_v9, 16  ;;  %v3755_v42 = vcombine.low %v5088_v54, %v3666_v49  ;;  %v5170_v32 = vld [vmem:[%s4819_s6 + $0x8] sm:$0xf]  ;;  %v3638_v21 = vld [vmem:[%s4819_s6 + $0x9c] sm:$0x1] }
  0x48   : > { %1557 = vrot.lane.b32.xlu0 %v3761_v27, %s4762_s21  ;;  %v940_v40 = vrot.slane %v939_v28, 4  ;;  %v953_v41 = vor.u32 %v952_v30, %v949_v23  ;;  %v975_v43 = vshrl.u32 %v3667_v19, 16  ;;  %v958_v44 = vrot.slane %v956_v39, 5  ;;  %v5180_v28 = vld [vmem:[%s4819_s6 + $0xa0] sm:$0xf] }
  0x49   : > { %v966_v45 = vrot.slane %v964_v35, 5  ;;  %v978_v46 = vshll.u32 %v3667_v19, 16  ;;  %v984_v47 = vshll.u32 %v3683_v14, 16  ;;  %v989_v48 = vshrl.u32 %v3668_v25, 16 }
  0x4a   : > { %v945_v5 = vsel %vm4858_vm2, %v940_v40, %v944_v29  ;;  %v954_v6 = vrot.slane %v953_v41, 4  ;;  %v977_v17 = vrot.slane %v975_v43, 4  ;;  %v972_v53 = vrot.slane %v970_v36, 5  ;;  %v243_v41 = vld [vmem:[%s4819_s6 + $0x4] sm:$0x1] }
  0x4b   : > { %v3762_v51 = vcombine.low %v931_v31, %v945_v5  ;;  %v967_v52 = vor.u32 %v966_v45, %v963_v33  ;;  %1529 = vrot.lane.b32.xlu1 %v3755_v42, %s4762_s21  ;;  %v980_v54 = vrot.slane %v978_v46, 5  ;;  %v991_v55 = vrot.slane %v989_v48, 4  ;;  %v244_v42 = vld [vmem:[%s4819_s6 + $0xc] sm:$0x1]  ;;  %v3639_v45 = vld [vmem:[%s4819_s6 + $0xa4] sm:$0x1] }
  0x4c   : > { %v992_v56 = vshll.u32 %v3668_v25, 16  ;;  %v998_v57 = vshll.u32 %v3684_v37, 16  ;;  %v959_v59 = vsel %vm4858_vm2, %v954_v6, %v958_v44  ;;  %v3756_v15 = vcombine.low %v3667_v19, %v3668_v25  ;;  %v5166_v19 = vld [vmem:[%s4819_s6] sm:$0xf]  ;;  %v3640_v46 = vld [vmem:[%s4819_s6 + $0xac] sm:$0x1] }
  0x4d   : > { %1559 = vrot.lane.b32.xlu0 %v3762_v51, %s4762_s21  ;;  %v968_v60 = vrot.slane %v967_v52, 4  ;;  %v981_v61 = vor.u32 %v980_v54, %v977_v17  ;;  %v986_v49 = vrot.slane %v984_v47, 5  ;;  %v513_v13 = vshrl.u32 %v5158_v11, 16  ;;  %v5189_v47 = vld [vmem:[%s4819_s6 + $0xa8] sm:$0xf] }
  0x4e   : > { %v994_v62 = vrot.slane %v992_v56, 5  ;;  %v1000_v1 = vrot.slane %v998_v57, 5  ;;  %v516_v18 = vshll.u32 %v5158_v11, 16  ;;  %v527_v39 = vshrl.u32 %v5161_v12, 16  ;;  %v5198_v52 = vld [vmem:[%s4819_s6 + $0x10] sm:$0xf] }
  0x4f   : > { %v973_v63 = vsel %vm4858_vm2, %v968_v60, %v972_v53  ;;  %v982_v0 = vrot.slane %v981_v61, 4  ;;  %1531 = vrot.lane.b32.xlu1 %v3756_v15, %s4762_s21  ;;  %v530_v14 = vshll.u32 %v5161_v12, 16  ;;  %v255_v22 = vshrl.u32 %v5166_v19, 16  ;;  %v5201_v57 = vld [vmem:[%s4819_s6 + $0x18] sm:$0xf] }
  0x50   : > { %v3763_v2 = vcombine.low %v959_v59, %v973_v63  ;;  %v995_v3 = vor.u32 %v994_v62, %v991_v55  ;;  %v258_v23 = vshll.u32 %v5166_v19, 16  ;;  %v515_v24 = vrot.slane %v513_v13, 4 }
  0x51   : > { %v987_v4 = vsel %vm4858_vm2, %v982_v0, %v986_v49  ;;  %v518_v25 = vrot.slane %v516_v18, 5  ;;  %v269_v26 = vshrl.u32 %v5170_v32, 16  ;;  %v272_v27 = vshll.u32 %v5170_v32, 16 }
  0x52   : > { %1561 = vrot.lane.b32.xlu0 %v3763_v2, %s4762_s21  ;;  %v996_v7 = vrot.slane %v995_v3, 4  ;;  %v522_v29 = vshll.u32 %v3637_v20, 16  ;;  %v536_v30 = vshll.u32 %v3638_v21, 16  ;;  %v529_v31 = vrot.slane %v527_v39, 4 }
  0x53   : > { %v532_v33 = vrot.slane %v530_v14, 5  ;;  %v257_v35 = vrot.slane %v255_v22, 4  ;;  %v260_v36 = vrot.slane %v258_v23, 5  ;;  %v541_v37 = vshrl.u32 %v5180_v28, 16 }
  0x54   : > { %v1001_v9 = vsel %vm4858_vm2, %v996_v7, %v1000_v1  ;;  %v544_v38 = vshll.u32 %v5180_v28, 16  ;;  %v519_v40 = vor.u32 %v518_v25, %v515_v24  ;;  %v271_v43 = vrot.slane %v269_v26, 4  ;;  %v246_v7 = vld [vmem:[%s4819_s6 + $0x1c] sm:$0x1]  ;;  %v5231_v25 = vld [vmem:[%s4819_s6 + $0xb0] sm:$0xf] }
  0x55   : > { %v3764_v10 = vcombine.low %v987_v4, %v1001_v9  ;;  %v274_v44 = vrot.slane %v272_v27, 5  ;;  %v543_v5 = vrot.slane %v541_v37, 4  ;;  %v5191_v17 = vrot.slane %v522_v29, 5  ;;  %v5234_v26 = vld [vmem:[%s4819_s6 + $0xb8] sm:$0xf] }
  0x56   : > { %v546_v6 = vrot.slane %v544_v38, 5  ;;  %v5193_v48 = vrot.slane %v536_v30, 5  ;;  %v5195_v50 = vrot.slane %v519_v40, 4  ;;  %v533_v51 = vor.u32 %v532_v33, %v529_v31  ;;  %v3693_v27 = vld [vmem:[%s4819_s6 + $0xe0] sm:$0xf] }
  0x57   : > { %1563 = vrot.lane.b32.xlu0 %v3764_v10, %s4762_s21  ;;  %v261_v53 = vor.u32 %v260_v36, %v257_v35  ;;  %v264_v54 = vshll.u32 %v243_v41, 16  ;;  %v275_v55 = vor.u32 %v274_v44, %v271_v43  ;;  %v278_v56 = vshll.u32 %v244_v42, 16  ;;  %v3694_v29 = vld [vmem:[%s4819_s6 + $0xe8] sm:$0xf]  ;;  %v3709_v31 = vld [vmem:[%s4819_s6 + $0xe4] sm:$0x1] }
  0x58   : > { %v550_v58 = vshll.u32 %v3639_v45, 16  ;;  %v564_v59 = vshll.u32 %v3640_v46, 16  ;;  %v555_v60 = vshrl.u32 %v5189_v47, 16  ;;  %v558_v61 = vshll.u32 %v5189_v47, 16  ;;  %v3710_v33 = vld [vmem:[%s4819_s6 + $0xec] sm:$0x1] }
  0x59   : > { %v547_v15 = vor.u32 %v546_v6, %v543_v5  ;;  %v283_v49 = vshrl.u32 %v5198_v52, 16  ;;  %v286_v62 = vshll.u32 %v5198_v52, 16  ;;  %v297_v63 = vshrl.u32 %v5201_v57, 16  ;;  %v3641_v37 = vld [vmem:[%s4819_s6 + $0xb4] sm:$0x1] }
  0x5a   : > { %v300_v0 = vshll.u32 %v5201_v57, 16  ;;  %v5212_v1 = vrot.slane %v533_v51, 4  ;;  %v5214_v2 = vrot.slane %v261_v53, 4  ;;  %v5216_v3 = vrot.slane %v264_v54, 5  ;;  %v3642_v38 = vld [vmem:[%s4819_s6 + $0xbc] sm:$0x1] }
  0x5b   : > { %v5218_v4 = vrot.slane %v278_v56, 5  ;;  %v5221_v8 = vrot.slane %v275_v55, 4  ;;  %v5223_v9 = vrot.slane %v550_v58, 5  ;;  %v5225_v10 = vrot.slane %v564_v59, 5 }
  0x5c   : > { %v557_v13 = vrot.slane %v555_v60, 4  ;;  %v5227_v18 = vrot.slane %v547_v15, 4  ;;  %v560_v20 = vrot.slane %v558_v61, 5  ;;  %v285_v39 = vrot.slane %v283_v49, 4 }
  0x5d   : > { %v292_v14 = vshll.u32 %v5206_v16, 16  ;;  %v288_v21 = vrot.slane %v286_v62, 5  ;;  %v299_v22 = vrot.slane %v297_v63, 4  ;;  %v302_v23 = vrot.slane %v300_v0, 5  ;;  %v5248_v0 = vld [vmem:[%s4819_s6 + $0x20] sm:$0xf] }
  0x5e   : > { %v306_v24 = vshll.u32 %v246_v7, 16  ;;  %v561_v30 = vor.u32 %v560_v20, %v557_v13  ;;  %v1149_v35 = vshrl.u32 %v3693_v27, 16  ;;  %v1152_v36 = vshll.u32 %v3693_v27, 16 }
  0x5f   : > { %v569_v40 = vshrl.u32 %v5231_v25, 16  ;;  %v1158_v41 = vshll.u32 %v3709_v31, 16  ;;  %v1163_v42 = vshrl.u32 %v3694_v29, 16  ;;  %v1166_v43 = vshll.u32 %v3694_v29, 16 }
  0x60   : > { %v572_v44 = vshll.u32 %v5231_v25, 16  ;;  %v1151_v45 = vrot.slane %v1149_v35, 4  ;;  %v1154_v46 = vrot.slane %v1152_v36, 5  ;;  %v1172_v5 = vshll.u32 %v3710_v33, 16  ;;  %v5251_v33 = vld [vmem:[%s4819_s6 + $0x28] sm:$0xf] }
  0x61   : > { %v583_v6 = vshrl.u32 %v5234_v26, 16  ;;  %v586_v51 = vshll.u32 %v5234_v26, 16  ;;  %v1165_v53 = vrot.slane %v1163_v42, 4  ;;  %v1168_v54 = vrot.slane %v1166_v43, 5  ;;  %v247_v43 = vld [vmem:[%s4819_s6 + $0x24] sm:$0x1] }
  0x62   : > { %v1155_v55 = vor.u32 %v1154_v46, %v1151_v45  ;;  %v1160_v56 = vrot.slane %v1158_v41, 5  ;;  %v1174_v58 = vrot.slane %v1172_v5, 5  ;;  %v3769_v59 = vcombine.low %v3693_v27, %v3694_v29  ;;  %v5279_v45 = vld [vmem:[%s4819_s6 + $0xc0] sm:$0xf]  ;;  %v5282_v46 = vld [vmem:[%s4819_s6 + $0xc8] sm:$0xf] }
  0x63   : > { %v289_v60 = vor.u32 %v288_v21, %v285_v39  ;;  %v303_v61 = vor.u32 %v302_v23, %v299_v22  ;;  %v1169_v15 = vor.u32 %v1168_v54, %v1165_v53  ;;  %v571_v16 = vrot.slane %v569_v40, 4  ;;  %v3643_v5 = vld [vmem:[%s4819_s6 + $0xc4] sm:$0x1] }
  0x64   : > { %v578_v49 = vshll.u32 %v3641_v37, 16  ;;  %v592_v62 = vshll.u32 %v3642_v38, 16  ;;  %v1156_v63 = vrot.slane %v1155_v55, 4  ;;  %1637 = vrot.lane.b32.xlu1 %v3769_v59, %s4762_s21  ;;  %v574_v7 = vrot.slane %v572_v44, 5  ;;  %v248_v44 = vld [vmem:[%s4819_s6 + $0x2c] sm:$0x1] }
  0x65   : > { %v585_v13 = vrot.slane %v583_v6, 4  ;;  %v588_v20 = vrot.slane %v586_v51, 5  ;;  %v1170_v31 = vrot.slane %v1169_v15, 4  ;;  %v5253_v35 = vrot.slane %v561_v30, 4 }
  0x66   : > { %v5255_v27 = vrot.slane %v292_v14, 5  ;;  %v5257_v39 = vrot.slane %v306_v24, 5  ;;  %v1161_v21 = vsel %vm4858_vm2, %v1156_v63, %v1160_v56  ;;  %v5261_v22 = vrot.slane %v289_v60, 4 }
  0x67   : > { %v5263_v23 = vrot.slane %v303_v61, 4  ;;  %v1175_v29 = vsel %vm4858_vm2, %v1170_v31, %v1174_v58  ;;  %v311_v14 = vshrl.u32 %v5248_v0, 16  ;;  %v314_v24 = vshll.u32 %v5248_v0, 16  ;;  %v3644_v61 = vld [vmem:[%s4819_s6 + $0xcc] sm:$0x1] }
  0x68   : > { %v3777_v30 = vcombine.low %v1161_v21, %v1175_v29  ;;  %v325_v36 = vshrl.u32 %v5251_v33, 16  ;;  %v328_v37 = vshll.u32 %v5251_v33, 16  ;;  %v575_v38 = vor.u32 %v574_v7, %v571_v16  ;;  %v3695_v7 = vld [vmem:[%s4819_s6 + $0xf0] sm:$0xf]  ;;  %v3712_v29 = vld [vmem:[%s4819_s6 + $0xfc] sm:$0x1] }
  0x69   : > { %v5271_v40 = vrot.slane %v578_v49, 5  ;;  %v589_v41 = vor.u32 %v588_v20, %v585_v13  ;;  %v5273_v42 = vrot.slane %v592_v62, 5  ;;  %v313_v6 = vrot.slane %v311_v14, 4  ;;  %v3696_v13 = vld [vmem:[%s4819_s6 + $0xf8] sm:$0xf] }
  0x6a   : > { %1669 = vrot.lane.b32.xlu0 %v3777_v30, %s4762_s21  ;;  %v316_v51 = vrot.slane %v314_v24, 5  ;;  %v327_v53 = vrot.slane %v325_v36, 4  ;;  %v330_v54 = vrot.slane %v328_v37, 5  ;;  %v5285_v55 = vrot.slane %v575_v38, 4  ;;  %v3711_v20 = vld [vmem:[%s4819_s6 + $0xf4] sm:$0x1] }
  0x6b   : > { %v5287_v56 = vrot.slane %v589_v41, 4  ;;  %v320_v58 = vshll.u32 %v247_v43, 16  ;;  %v597_v59 = vshrl.u32 %v5279_v45, 16  ;;  %v334_v60 = vshll.u32 %v248_v44, 16 }
  0x6c   : > { %v600_v15 = vshll.u32 %v5279_v45, 16  ;;  %v606_v16 = vshll.u32 %v3643_v5, 16  ;;  %v611_v49 = vshrl.u32 %v5282_v46, 16  ;;  %v525_v62 = vsel %vm4858_vm2, %v5195_v50, %v5191_v17 }
  0x6d   : > { %v539_v63 = vsel %vm4858_vm2, %v5212_v1, %v5193_v48  ;;  %v317_v31 = vor.u32 %v316_v51, %v313_v6  ;;  %v331_v21 = vor.u32 %v330_v54, %v327_v53  ;;  %v1177_v14 = vshrl.u32 %v3695_v7, 16 }
  0x6e   : > { %v1180_v30 = vshll.u32 %v3695_v7, 16  ;;  %v599_v24 = vrot.slane %v597_v59, 4  ;;  %v1186_v36 = vshll.u32 %v3711_v20, 16  ;;  %v1191_v37 = vshrl.u32 %v3696_v13, 16 }
  0x6f   : > { %v1194_v38 = vshll.u32 %v3696_v13, 16  ;;  %v602_v41 = vrot.slane %v600_v15, 5  ;;  %v1179_v43 = vrot.slane %v1177_v14, 4  ;;  %v1200_v50 = vshll.u32 %v3712_v29, 16  ;;  %v5319_v29 = vld [vmem:[%s4819_s6 + $0x30] sm:$0xf] }
  0x70   : > { %v1182_v17 = vrot.slane %v1180_v30, 5  ;;  %v614_v48 = vshll.u32 %v5282_v46, 16  ;;  %v620_v1 = vshll.u32 %v3644_v61, 16  ;;  %v1193_v44 = vrot.slane %v1191_v37, 4 }
  0x71   : > { %v1196_v5 = vrot.slane %v1194_v38, 5  ;;  %v1188_v51 = vrot.slane %v1186_v36, 5  ;;  %v1202_v53 = vrot.slane %v1200_v50, 5  ;;  %v3770_v54 = vcombine.low %v3695_v7, %v3696_v13 }
  0x72   : > { %v1183_v6 = vor.u32 %v1182_v17, %v1179_v43  ;;  %v267_v59 = vsel %vm4858_vm2, %v5214_v2, %v5216_v3  ;;  %v281_v15 = vsel %vm4858_vm2, %v5221_v8, %v5218_v4  ;;  %v553_v61 = vsel %vm4858_vm2, %v5227_v18, %v5223_v9  ;;  %v250_v17 = vld [vmem:[%s4819_s6 + $0x3c] sm:$0x1] }
  0x73   : > { %v1197_v20 = vor.u32 %v1196_v5, %v1193_v44  ;;  %v5321_v14 = vrot.slane %v320_v58, 5  ;;  %v603_v7 = vor.u32 %v602_v41, %v599_v24  ;;  %1639 = vrot.lane.b32.xlu1 %v3770_v54, %s4762_s21  ;;  %v339_v2 = vshrl.u32 %v5319_v29, 16  ;;  %v5348_v41 = vld [vmem:[%s4819_s6 + $0x38] sm:$0xf]  ;;  %v3713_v44 = vld [vmem:[%s4819_s6 + $0x104] sm:$0x1] }
  0x74   : > { %v1184_v13 = vrot.slane %v1183_v6, 4  ;;  %v5325_v3 = vrot.slane %v317_v31, 4  ;;  %v5327_v4 = vrot.slane %v331_v21, 4  ;;  %v5329_v8 = vrot.slane %v334_v60, 5  ;;  %v249_v21 = vld [vmem:[%s4819_s6 + $0x34] sm:$0x1] }
  0x75   : > { %v1198_v9 = vrot.slane %v1197_v20, 4  ;;  %v5331_v18 = vrot.slane %v606_v16, 5  ;;  %v613_v58 = vrot.slane %v611_v49, 4  ;;  %v616_v30 = vrot.slane %v614_v48, 5  ;;  %v3714_v5 = vld [vmem:[%s4819_s6 + $0x10c] sm:$0x1] }
  0x76   : > { %v1189_v24 = vsel %vm4858_vm2, %v1184_v13, %v1188_v51  ;;  %v567_v31 = vsel %vm4858_vm2, %v5253_v35, %v5225_v10  ;;  %v5339_v36 = vrot.slane %v620_v1, 5  ;;  %v342_v16 = vshll.u32 %v5319_v29, 16 }
  0x77   : > { %v1203_v60 = vsel %vm4858_vm2, %v1198_v9, %v1202_v53  ;;  %v3741_v49 = vcombine.low %v525_v62, %v539_v63  ;;  %v5345_v37 = vrot.slane %v603_v7, 4  ;;  %v5350_v43 = vrot.slane %v339_v2, 4  ;;  %v5381_v9 = vld [vmem:[%s6560_s1 + $0x100] sm:$0xff]  }
  0x78   : > { %v3778_v38 = vcombine.low %v1189_v24, %v1203_v60  ;;  %v3733_v10 = vcombine.low %v5158_v11, %v5161_v12  ;;  %v3717_v35 = vcombine.low %v5166_v19, %v5170_v32  ;;  %v3725_v50 = vcombine.low %v267_v59, %v281_v15  ;;  %v3697_v11 = vld [vmem:[%s4819_s6 + $0x100] sm:$0xf]  ;;  %v3698_v12 = vld [vmem:[%s4819_s6 + $0x108] sm:$0xf] }
  0x79   : > { %v5357_v48 = vcombine.low %v553_v61, %v567_v31  ;;  %v295_v62 = vsel %vm4858_vm2, %v5261_v22, %v5255_v27  ;;  %v309_v63 = vsel %vm4858_vm2, %v5263_v23, %v5257_v39  ;;  %v617_v19 = vor.u32 %v616_v30, %v613_v58  ;;  %v5509_v22 = vld [vmem:[%s6560_s1 + $0x210] sm:$0xff]  }
  0x7a   : > { %1671 = vrot.lane.b32.xlu0 %v3778_v38, %s4762_s21  ;;  %v344_v32 = vrot.slane %v342_v16, 5  ;;  %v1205_v6 = vshrl.u32 %v3697_v11, 16  ;;  %v3771_v51 = vcombine.low %v3697_v11, %v3698_v12  ;;  %v348_v54 = vshll.u32 %v249_v21, 16  ;;  %v5390_v16 = vld [vmem:[%s6560_s1 + $0x200] sm:$0xff]   ;;  %6613 = vst [vmem:[#allocation10_spill] sm:$0xff] %v5509_v22 }
  0x7b   : > { %v1208_v59 = vshll.u32 %v3697_v11, 16  ;;  %v1214_v15 = vshll.u32 %v3713_v44, 16  ;;  %v353_v61 = vshrl.u32 %v5348_v41, 16  ;;  %v1219_v7 = vshrl.u32 %v3698_v12, 16 }
  0x7c   : > { %v1207_v20 = vrot.slane %v1205_v6, 4  ;;  %v1222_v13 = vshll.u32 %v3698_v12, 16  ;;  %1641 = vrot.lane.b32.xlu1 %v3771_v51, %s4762_s21  ;;  %v356_v58 = vshll.u32 %v5348_v41, 16  ;;  %v362_v30 = vshll.u32 %v250_v17, 16 }
  0x7d   : > { %v1210_v24 = vrot.slane %v1208_v59, 5  ;;  %v1228_v31 = vshll.u32 %v3714_v5, 16  ;;  %v345_v38 = vor.u32 %v344_v32, %v5350_v43  ;;  %v1221_v17 = vrot.slane %v1219_v7, 4  ;;  %v5427_v59 = vld [vmem:[%s4819_s6 + $0x8] sm:$0xf] }
  0x7e   : > { %v1224_v11 = vrot.slane %v1222_v13, 5  ;;  %v5412_v44 = vrot.slane %v617_v19, 4  ;;  %v1216_v32 = vrot.slane %v1214_v15, 5  ;;  %v581_v5 = vsel %vm4858_vm2, %v5285_v55, %v5271_v40  ;;  %v5443_v55 = vld [vmem:[%s6560_s1 + $0x208] sm:$0xff]  }
  0x7f   : > { %v1211_v43 = vor.u32 %v1210_v24, %v1207_v20  ;;  %v5424_v6 = vrot.slane %v348_v54, 5  ;;  %v1230_v19 = vrot.slane %v1228_v31, 5  ;;  %v5430_v20 = vrot.slane %v353_v61, 4  ;;  %6608 = vst [vmem:[#allocation5_spill] sm:$0xff] %v5443_v55  ;;  %v5460_v24 = vld [vmem:[%s6560_s1 + $0x110] sm:$0xff]  }
  0x80   : > { %v1225_v51 = vor.u32 %v1224_v11, %v1221_v17  ;;  %v5432_v7 = vrot.slane %v356_v58, 5  ;;  %v5434_v13 = vrot.slane %v362_v30, 5  ;;  %v595_v54 = vsel %vm4858_vm2, %v5287_v56, %v5273_v42  ;;  %v5452_v30 = vld [vmem:[%s4819_s6 + $0x10] sm:$0xf]  ;;  %6609 = vst [vmem:[#allocation6_spill] sm:$0xff] %v5460_v24  ;;  %v5490_v11 = vld [vmem:[%s6560_s1 + $0x158] sm:$0xff]  }
  0x81   : > { %v5449_v61 = vrot.slane %v345_v38, 4  ;;  %v5465_v31 = vld [vmem:[%s6560_s1 + $0x250] sm:$0xff]   ;;  %v5470_v56 = vld [vmem:[%s4819_s6 + $0xc] sm:$0x1]  ;;  %v774_v38 = vshll.u32 %v5427_v59, 16  ;;  %v3718_v17 = vcombine.low %v5198_v52, %v5201_v57  ;;  %6611 = vst [vmem:[#allocation8_spill] sm:$0xff] %v5490_v11  ;;  %v5502_v52 = vcombine.low %v581_v5, %v595_v54 }
  0x82   : > { %v1226_v58 = vrot.slane %v1225_v51, 4  ;;  %6610 = vst [vmem:[#allocation7_spill] sm:$0xff] %v5465_v31  ;;  %v3699_v5 = vld [vmem:[%s4819_s6 + $0x110] sm:$0xf] }
  0x84   : > { %v1231_v39 = vsel %vm4858_vm2, %v1226_v58, %v1230_v19  ;;  %v5528_v19 = vld [vmem:[%s6560_s1 + $0x118] sm:$0xff]   ;;  %v5547_v58 = vld [vmem:[%s6560_s1 + $0x160] sm:$0xff]  }
  0x85   : > { %6615 = vst [vmem:[#allocation12_spill] sm:$0xff] %v5528_v19  ;;  %6617 = vst [vmem:[#allocation14_spill] sm:$0xff] %v5547_v58 }
  0x92   : > { %v1446_v1 = vpop.permute.xlu0 %1445 }
  0x93   : > { %v5373_v53 = vsel %vm1340_vm3, %v3741_v49, %v1446_v1  ;;  %v5395_v49 = vld [vmem:[%s6560_s1 + $0x148] sm:$0xff]  }
  0x94   : > { %6605 = vst [vmem:[#allocation2_spill] sm:$0xff] %v5373_v53  ;;  %1902 = vmatprep.mubr.bf16.mxu0 %v5373_v53  ;;  %v5410_v1 = vld [vmem:[%s6560_s1 + $0x248] sm:$0xff]  }
  0x95   : > { %v1333_v2 = vpop.permute.xlu1 %1332 }
  0x96   : > { %v1414_v60 = vpop.permute.xlu0 %1413  ;;  %v5385_v21 = vsel %vm1340_vm3, %v3725_v50, %v1333_v2  ;;  %v5405_v50 = vld [vmem:[%s6560_s1 + $0x108] sm:$0xff]   ;;  %v1212_v2 = vrot.slane %v1211_v43, 4 }
  0x97   : > { %v5399_v12 = vsel %vm1340_vm3, %v3733_v10, %v1414_v60  ;;  %2063 = vmatprep.mubr.bf16.mxu1 %v5385_v21  ;;  %v5418_v10 = vld [vmem:[%s6560_s1 + $0x150] sm:$0xff]   ;;  %v771_v60 = vshrl.u32 %v5427_v59, 16 }
  0x98   : > { %6606 = vst [vmem:[#allocation3_spill] sm:$0xff] %v5399_v12  ;;  %1903 = vmatmul.mubr.bf16.vlgmr.msra.gmra.mrb[0].mxu0 %v5399_v12  ;;  %6607 = vst [vmem:[#allocation4_spill] sm:$0xff] %v5418_v10  ;;  %v1217_v42 = vsel %vm4858_vm2, %v1212_v2, %v1216_v32  ;;  %v785_v32 = vshrl.u32 %v5452_v30, 16  ;;  %v1233_v2 = vshrl.u32 %v3699_v5, 16 }
  0x99   : > { %v1301_v15 = vpop.permute.xlu1 %1300  ;;  %4147 = vmatpush3.bf16.msra.mxu0 %v5381_v9  ;;  %v3779_v57 = vcombine.low %v1217_v42, %v1231_v39  ;;  %v3716_v42 = vld [vmem:[%s4819_s6 + $0x11c] sm:$0x1] }
  0x9a   : > { %v5437_v40 = vsel %vm1340_vm3, %v3717_v35, %v1301_v15  ;;  %4148 = vmatprep.subr.bf16.mxu0 %v5395_v49  ;;  %v3734_v35 = vcombine.low %v5180_v28, %v5189_v47  ;;  %v3726_v47 = vcombine.low %v295_v62, %v309_v63  ;;  %v337_v62 = vsel %vm4858_vm2, %v5327_v4, %v5329_v8  ;;  %v3700_v8 = vld [vmem:[%s4819_s6 + $0x118] sm:$0xf]  ;;  %v3715_v15 = vld [vmem:[%s4819_s6 + $0x114] sm:$0x1] }
  0x9b   : > { %2064 = vmatmul.mubr.bf16.vlgmr.msra.gmra.mrb[0].mxu1 %v5437_v40  ;;  %1673 = vrot.lane.b32.xlu0 %v3779_v57, %s4762_s21  ;;  %v5538_v4 = vrot.slane %v771_v60, 4  ;;  %v1242_v39 = vshll.u32 %v3715_v15, 16  ;;  %v1247_v60 = vshrl.u32 %v3700_v8, 16  ;;  %v1250_v43 = vshll.u32 %v3700_v8, 16 }
  0x9c   : > { %v1448_v28 = vpop.permute.xlu0 %1447  ;;  %4187 = vmatpush3.bf16.msra.mxu1 %v5390_v16  ;;  %v5565_v15 = vrot.slane %v774_v38, 5  ;;  %v5588_v38 = vld [vmem:[%s4819_s6 + $0x14] sm:$0x1] }
  0x9d   : > { %v5498_v23 = vsel %vm1340_vm3, %v5357_v48, %v1448_v28  ;;  %v1416_v27 = vpop.permute.xlu1 %1415  ;;  %4149 = vmatpush3.bf16.msra.mxu0 %v5405_v50  ;;  %4188 = vmatprep.subr.bf16.mxu1 %v5410_v1  ;;  %v323_v48 = vsel %vm4858_vm2, %v5325_v3, %v5321_v14  ;;  %v5533_v14 = vld [vmem:[%s6560_s1 + $0x258] sm:$0xff]   ;;  %v1236_v28 = vshll.u32 %v3699_v5, 16  ;;  %v1235_v3 = vrot.slane %v1233_v2, 4 }
  0x9e   : > { %6612 = vst [vmem:[#allocation9_spill] sm:$0xff] %v5498_v23  ;;  %1910 = vmatprep.mubr.bf16.mxu0 %v5498_v23  ;;  %4150 = vmatprep.subr.bf16.mxu0 %v5418_v10  ;;  %v5523_v51 = vsel %vm1340_vm3, %v3734_v35, %v1416_v27  ;;  %6616 = vst [vmem:[#allocation13_spill] sm:$0xff] %v5533_v14  ;;  %v788_v35 = vshll.u32 %v5452_v30, 16  ;;  %v5556_v63 = vcombine.low %v323_v48, %v337_v62  ;;  %v5571_v48 = vld [vmem:[%s6560_s1 + $0x218] sm:$0xff]  }
  0x9f   : > { %6614 = vst [vmem:[#allocation11_spill] sm:$0xff] %v5523_v51  ;;  %6618 = vst [vmem:[#allocation15_spill] sm:$0xff] %v5571_v48  ;;  %v1249_v62 = vrot.slane %v1247_v60, 4  ;;  %v1252_v2 = vrot.slane %v1250_v43, 5 }
  0xa0   : > { %v1335_v54 = vpop.permute.xlu0 %1334  ;;  %4189 = vmatpush3.bf16.msra.mxu1 %v5443_v55  ;;  %1911 = vmatmul.mubr.bf16.gmra.mrb[4].mxu0 %v5523_v51  ;;  %v5592_v43 = vrot.slane %v788_v35, 5 }
  0xa1   : > { %v1303_v27 = vpop.permute.xlu1 %1302  ;;  %v5552_v57 = vsel %vm1340_vm3, %v3726_v47, %v1335_v54  ;;  %4151 = vmatpush3.bf16.msra.mxu0 %v5460_v24  ;;  %4190 = vmatprep.subr.bf16.mxu1 %v5465_v31  ;;  %v359_v47 = vor.u32 %v5432_v7, %v5430_v20  ;;  %v1238_v54 = vrot.slane %v1236_v28, 5  ;;  %v5574_v31 = vld [vmem:[%s4819_s6 + $0x18] sm:$0xf]  ;;  %v5580_v20 = vld [vmem:[%s6560_s1 + $0x120] sm:$0xff]   ;;  %v5590_v28 = vrot.slane %v785_v32, 4 }
  0xa2   : > { %2071 = vmatprep.mubr.bf16.mxu1 %v5552_v57  ;;  %v5560_v55 = vsel %vm1340_vm3, %v3718_v17, %v1303_v27  ;;  %4152 = vmatprep.subr.bf16.mxu0 %v5490_v11  ;;  %v1256_v17 = vshll.u32 %v3716_v42, 16  ;;  %v3772_v27 = vcombine.low %v3699_v5, %v3700_v8  ;;  %v5585_v7 = vld [vmem:[%s6560_s1 + $0x260] sm:$0xff]   ;;  %v1244_v8 = vrot.slane %v1242_v39, 5 }
  0xa3   : > { %2072 = vmatmul.mubr.bf16.gmra.mrb[4].mxu1 %v5560_v55  ;;  %6619 = vst [vmem:[#allocation16_spill] sm:$0xff] %v5585_v7  ;;  %v1239_v5 = vor.u32 %v1238_v54, %v1235_v3  ;;  %v5595_v42 = vld [vmem:[%s4819_s6 + $0x20] sm:$0xf]  ;;  %v1253_v11 = vor.u32 %v1252_v2, %v1249_v62  ;;  %v799_v35 = vshrl.u32 %v5574_v31, 16  ;;  %v802_v3 = vshll.u32 %v5574_v31, 16 }
  0xa4   : > { %4191 = vmatpush3.bf16.msra.mxu1 %v5509_v22  ;;  %v5602_v22 = vld [vmem:[%s6560_s1 + $0x168] sm:$0xff]   ;;  %v1258_v32 = vrot.slane %v1256_v17, 5  ;;  %v609_v54 = vsel %vm4858_vm2, %v5345_v37, %v5331_v18  ;;  %v5618_v62 = vld [vmem:[%s6560_s1 + $0x220] sm:$0xff]   ;;  %1643 = vrot.lane.b32.xlu1 %v3772_v27, %s4762_s21  ;;  %v3671_v17 = vld [vmem:[%s4819_s6 + $0x1c] sm:$0x1] }
  0xa5   : > { %v1418_v60 = vpop.permute.xlu1 %1417  ;;  %4153 = vmatpush3.bf16.msra.mxu0 %v5528_v19  ;;  %4192 = vmatprep.subr.bf16.mxu1 %v5533_v14  ;;  %v623_v14 = vsel %vm4858_vm2, %v5412_v44, %v5339_v36  ;;  %v1240_v2 = vrot.slane %v1239_v5, 4  ;;  %v5630_v36 = vld [vmem:[%s6560_s1 + $0x268] sm:$0xff]   ;;  %v1254_v37 = vrot.slane %v1253_v11, 4  ;;  %v801_v44 = vrot.slane %v799_v35, 4  ;;  %v3672_v35 = vld [vmem:[%s4819_s6 + $0x24] sm:$0x1] }
  0xa6   : > { %v1450_v39 = vpop.permute.xlu0 %1449  ;;  %4154 = vmatprep.subr.bf16.mxu0 %v5547_v58  ;;  %v813_v58 = vshrl.u32 %v5595_v42, 16  ;;  %v804_v19 = vrot.slane %v802_v3, 5  ;;  %v6621_v5 = vcombine.low %v5231_v25, %v5234_v26  ;;  %v816_v3 = vshll.u32 %v5595_v42, 16  ;;  %v5654_v26 = vld [vmem:[%s6560_s1 + $0x170] sm:$0xff]  }
  0xa7   : > { %v5625_v18 = vsel %vm1340_vm3, %v5502_v52, %v1450_v39  ;;  %v5643_v52 = vld [vmem:[%s6560_s1 + $0x128] sm:$0xff]   ;;  %v360_v39 = vrot.slane %v359_v47, 4  ;;  %v1245_v11 = vsel %vm4858_vm2, %v1240_v2, %v1244_v8  ;;  %v794_v47 = vshll.u32 %v5588_v38, 16 }
  0xa8   : > { %6620 = vst [vmem:[#allocation17_spill] sm:$0xff] %v5625_v18  ;;  %v5636_v27 = vsel %vm1340_vm3, %v6621_v5, %v1418_v60  ;;  %1918 = vmatprep.mubr.bf16.mxu0 %v5625_v18  ;;  %4193 = vmatpush3.bf16.msra.mxu1 %v5571_v48  ;;  %v777_v60 = vor.u32 %v5565_v15, %v5538_v4  ;;  %v808_v2 = vshll.u32 %v3671_v17, 16  ;;  %v5665_v5 = vld [vmem:[%s6560_s1 + $0x228] sm:$0xff]   ;;  %v815_v24 = vrot.slane %v813_v58, 4 }
  0xa9   : > { %v1305_v25 = vpop.permute.xlu1 %1304  ;;  %1919 = vmatmul.mubr.bf16.gmra.mrb[8].mxu0 %v5636_v27  ;;  %4194 = vmatprep.subr.bf16.mxu1 %v5585_v7  ;;  %v1259_v8 = vsel %vm4858_vm2, %v1254_v37, %v1258_v32  ;;  %v791_v7 = vor.u32 %v5592_v43, %v5590_v28  ;;  %v818_v10 = vrot.slane %v816_v3, 5  ;;  %v6622_v15 = vcombine.low %v5248_v0, %v5251_v33  ;;  %v5679_v32 = vld [vmem:[%s6560_s1 + $0x270] sm:$0xff]  }
  0xaa   : > { %4155 = vmatpush3.bf16.msra.mxu0 %v5580_v20  ;;  %v3780_v48 = vcombine.low %v1245_v11, %v1259_v8  ;;  %6623 = vst [vmem:[#allocation18_spill] sm:$0xff] %v5679_v32  ;;  %v6624_v17 = vshll.u32 %v5470_v56, 16  ;;  %v805_v58 = vor.u32 %v804_v19, %v801_v44  ;;  %v822_v43 = vshll.u32 %v3672_v35, 16  ;;  %v5695_v33 = vld [vmem:[%s6560_s1 + $0x130] sm:$0xff]   ;;  %v5722_v11 = vld [vmem:[%s4819_s6 + $0x28] sm:$0xf] }
  0xab   : > { %v1337_v4 = vpop.permute.xlu0 %1336  ;;  %v5673_v38 = vsel %vm1340_vm3, %v6622_v15, %v1305_v25  ;;  %4156 = vmatprep.subr.bf16.mxu0 %v5602_v22  ;;  %v3736_v0 = vcombine.low %v5279_v45, %v5282_v46  ;;  %6625 = vst [vmem:[#allocation19_spill] sm:$0xff] %v5695_v33  ;;  %v3744_v56 = vcombine.low %v609_v54, %v623_v14  ;;  %v5707_v45 = vld [vmem:[%s6560_s1 + $0x178] sm:$0xff]   ;;  %v778_v46 = vrot.slane %v777_v60, 4  ;;  %v5735_v3 = vld [vmem:[%s4819_s6 + $0x30] sm:$0xf] }
  0xac   : > { %v5683_v28 = vrot.slane %v6624_v17, 5  ;;  %v5687_v37 = vsel %vm1340_vm3, %v5556_v63, %v1337_v4  ;;  %4195 = vmatpush3.bf16.msra.mxu1 %v5618_v62  ;;  %1675 = vrot.lane.b32.xlu0 %v3780_v48, %s4762_s21  ;;  %v351_v63 = vsel %vm4858_vm2, %v5449_v61, %v5424_v6  ;;  %v796_v48 = vrot.slane %v794_v47, 5  ;;  %v5717_v6 = vld [vmem:[%s6560_s1 + $0x230] sm:$0xff]   ;;  %v5728_v35 = vld [vmem:[%s6560_s1 + $0x278] sm:$0xff]   ;;  %v3673_v25 = vld [vmem:[%s4819_s6 + $0x2c] sm:$0x1]  ;;  %s6538_s21 = scalar_lea.vmem %s6564_s5, %s4057_s11 }
  0xad   : > { %2079 = vmatprep.mubr.bf16.mxu1 %v5687_v37  ;;  %v1420_v19 = vpop.permute.xlu1 %1419  ;;  %4196 = vmatprep.subr.bf16.mxu1 %v5630_v36  ;;  %v365_v14 = vsel %vm4858_vm2, %v360_v39, %v5434_v13  ;;  %v792_v61 = vrot.slane %v791_v7, 4  ;;  %v5719_v54 = vrot.slane %v808_v2, 5  ;;  %v819_v44 = vor.u32 %v818_v10, %v815_v24  ;;  %v5744_v24 = vld [vmem:[%s6560_s1 + $0x138] sm:$0xff]   ;;  %v3674_v60 = vld [vmem:[%s4819_s6 + $0x34] sm:$0x1] }
  0xae   : > { %2080 = vmatmul.mubr.bf16.gmra.mrb[8].mxu1 %v5673_v38  ;;  %4157 = vmatpush3.bf16.msra.mxu0 %v5643_v52  ;;  %v5730_v13 = vrot.slane %v805_v58, 4  ;;  %v5732_v39 = vrot.slane %v822_v43, 5  ;;  %v3720_v10 = vcombine.low %v5319_v29, %v5348_v41  ;;  %v827_v47 = vshrl.u32 %v5722_v11, 16  ;;  %v5763_v58 = vld [vmem:[%s6560_s1 + $0x1c0] sm:$0xff]  }
  0xaf   : > { %4158 = vmatprep.subr.bf16.mxu0 %v5654_v26  ;;  %v830_v8 = vshll.u32 %v5722_v11, 16  ;;  %v3728_v4 = vcombine.low %v351_v63, %v365_v14  ;;  %v841_v15 = vshrl.u32 %v5735_v3, 16  ;;  %v844_v29 = vshll.u32 %v5735_v3, 16  ;;  %6626 = vst [vmem:[#allocation20_spill] sm:$0xff] %v5763_v58 }
  0xb0   : > { %v1452_v7 = vpop.permute.xlu0 %1451  ;;  %4197 = vmatpush3.bf16.msra.mxu1 %v5665_v5  ;;  %v5756_v41 = vsel %vm1340_vm3, %v3736_v0, %v1420_v19  ;;  %v820_v43 = vrot.slane %v819_v44, 4  ;;  %v836_v14 = vshll.u32 %v3673_v25, 16  ;;  %v5780_v25 = vld [vmem:[%s6560_s1 + $0x238] sm:$0xff]  }
  0xb1   : > { %v5750_v2 = vsel %vm1340_vm3, %v3744_v56, %v1452_v7  ;;  %4198 = vmatprep.subr.bf16.mxu1 %v5679_v32  ;;  %v1307_v17 = vpop.permute.xlu1 %1306  ;;  %v829_v56 = vrot.slane %v827_v47, 4  ;;  %v832_v63 = vrot.slane %v830_v8, 5  ;;  %v843_v0 = vrot.slane %v841_v15, 4  ;;  %6627 = vst [vmem:[#allocation21_spill] sm:$0xff] %v5780_v25 }
  0xb2   : > { %1926 = vmatprep.mubr.bf16.mxu0 %v5750_v2  ;;  %4159 = vmatpush3.bf16.msra.mxu0 %v5695_v33  ;;  %v846_v19 = vrot.slane %v844_v29, 5  ;;  %v850_v7 = vshll.u32 %v3674_v60, 16  ;;  %v783_v32 = vsel %vm4858_vm2, %v778_v46, %v5683_v28  ;;  %v797_v33 = vsel %vm4858_vm2, %v792_v61, %v796_v48  ;;  %v5791_v46 = vld [vmem:[%s6560_s1 + $0x2c0] sm:$0xff]  }
  0xb3   : > { %1927 = vmatmul.mubr.bf16.gmra.mrb[12].mxu0 %v5756_v41  ;;  %4160 = vmatprep.subr.bf16.mxu0 %v5707_v45  ;;  %v5774_v47 = vsel %vm1340_vm3, %v3720_v10, %v1307_v17  ;;  %v833_v60 = vor.u32 %v832_v63, %v829_v56  ;;  %v3749_v28 = vcombine.low %v5427_v59, %v5452_v30  ;;  %v5799_v59 = vld [vmem:[%s6560_s1 + $0x180] sm:$0xff]   ;;  %v5811_v17 = vld [vmem:[%s4819_s6 + $0x38] sm:$0xf] }
  0xb4   : > { %4199 = vmatpush3.bf16.msra.mxu1 %v5717_v6  ;;  %v847_v8 = vor.u32 %v846_v19, %v843_v0  ;;  %6628 = vst [vmem:[#allocation22_spill] sm:$0xff] %v5791_v46  ;;  %v3757_v48 = vcombine.low %v783_v32, %v797_v33  ;;  %6629 = vst [vmem:[#allocation23_spill] sm:$0xff] %v5799_v59  ;;  %v811_v30 = vsel %vm4858_vm2, %v5730_v13, %v5719_v54  ;;  %v5814_v56 = vld [vmem:[%s4819_s6 + $0x40] sm:$0xf]  ;;  %v3675_v54 = vld [vmem:[%s4819_s6 + $0x3c] sm:$0x1] }
  0xb5   : > { %v1339_v44 = vpop.permute.xlu0 %1338  ;;  %4200 = vmatprep.subr.bf16.mxu1 %v5728_v35  ;;  %v1526_v61 = vpop.permute.xlu1 %1525  ;;  %v825_v32 = vsel %vm4858_vm2, %v820_v43, %v5732_v39  ;;  %v838_v33 = vrot.slane %v836_v14, 5  ;;  %v852_v10 = vrot.slane %v850_v7, 5  ;;  %v3676_v13 = vld [vmem:[%s4819_s6 + $0x44] sm:$0x1]  ;;  %v855_v39 = vshrl.u32 %v5811_v17, 16  ;;  %v5835_v7 = vld [vmem:[%s6560_s1 + $0x1c8] sm:$0xff]  }
  0xb6   : > { %v5783_v15 = vsel %vm1340_vm3, %v3728_v4, %v1339_v44  ;;  %4161 = vmatpush3.bf16.msra.mxu0 %v5744_v24  ;;  %v834_v4 = vrot.slane %v833_v60, 4  ;;  %v848_v29 = vrot.slane %v847_v8, 4  ;;  %v5817_v0 = vsel %vm1340_vm3, %v3749_v28, %v1526_v61  ;;  %v5830_v19 = vld [vmem:[%s6560_s1 + $0x280] sm:$0xff]  }
  0xb7   : > { %2087 = vmatprep.mubr.bf16.mxu1 %v5783_v15  ;;  %4226 = vmatprep.subr.bf16.mxu0 %v5763_v58  ;;  %v858_v43 = vshll.u32 %v5811_v17, 16  ;;  %v3758_v44 = vcombine.low %v811_v30, %v825_v32  ;;  %v869_v60 = vshrl.u32 %v5814_v56, 16  ;;  %v872_v8 = vshll.u32 %v5814_v56, 16  ;;  %v5849_v30 = vld [vmem:[%s6560_s1 + $0x2c8] sm:$0xff]  }
  0xb8   : > { %2088 = vmatmul.mubr.bf16.gmra.mrb[12].mxu1 %v5774_v47  ;;  %v857_v28 = vrot.slane %v855_v39, 4  ;;  %v864_v61 = vshll.u32 %v3675_v54, 16  ;;  %v3750_v54 = vcombine.low %v5574_v31, %v5595_v42  ;;  %v839_v39 = vsel %vm4858_vm2, %v834_v4, %v838_v33  ;;  %v5867_v31 = vld [vmem:[%s6560_s1 + $0x288] sm:$0xff]   ;;  %v5876_v33 = vld [vmem:[%s6560_s1 + $0x190] sm:$0xff]  }
  0xb9   : > { %2492 = vmatprep.mubr.bf16.mxu1 %v5373_v53  ;;  %4201 = vmatpush3.bf16.msra.mxu1 %v5780_v25  ;;  %v871_v32 = vrot.slane %v869_v60, 4  ;;  %v874_v25 = vrot.slane %v872_v8, 5  ;;  %v1528_v8 = vpop.permute.xlu1 %1527 }
  0xba   : > { %v1558_v63 = vpop.permute.xlu0 %1557  ;;  %4266 = vmatprep.subr.bf16.mxu1 %v5791_v46  ;;  %v5844_v46 = vld [vmem:[%s6560_s1 + $0x188] sm:$0xff]  }
  0xbb   : > { %v5825_v14 = vsel %vm1340_vm3, %v3757_v48, %v1558_v63  ;;  %v860_v48 = vrot.slane %v858_v43, 5  ;;  %v878_v63 = vshll.u32 %v3676_v13, 16  ;;  %v5857_v13 = vld [vmem:[%s6560_s1 + $0x1d0] sm:$0xff]   ;;  %v853_v43 = vsel %vm4858_vm2, %v848_v29, %v852_v10 }
  0xbc   : > { %2257 = vmatprep.mubr.bf16.mxu0 %v5825_v14  ;;  %v875_v42 = vor.u32 %v874_v25, %v871_v32  ;;  %v866_v10 = vrot.slane %v864_v61, 5  ;;  %v3759_v29 = vcombine.low %v839_v39, %v853_v43  ;;  %v5883_v25 = vsel %vm1340_vm3, %v3750_v54, %v1528_v8  ;;  %v5916_v43 = vld [vmem:[%s6560_s1 + $0x198] sm:$0xff]  }
  0xbd   : > { %2258 = vmatmul.mubr.bf16.vlgmr.msra.gmra.mrb[16].mxu0 %v5817_v0  ;;  %v861_v58 = vor.u32 %v860_v48, %v857_v28  ;;  %v880_v4 = vrot.slane %v878_v63, 5  ;;  %v5902_v63 = vld [vmem:[%s6560_s1 + $0x290] sm:$0xff]   ;;  %v3751_v8 = vcombine.low %v5722_v11, %v5735_v3  ;;  %v5938_v11 = vld [vmem:[%s6560_s1 + $0x298] sm:$0xff]  }
  0xbe   : > { %4227 = vmatpush3.bf16.msra.mxu0 %v5799_v59  ;;  %v876_v48 = vrot.slane %v875_v42, 4  ;;  %v1530_v42 = vpop.permute.xlu1 %1529  ;;  %6630 = vst [vmem:[#allocation24_spill] sm:$0xff] %v5938_v11 }
  0xbf   : > { %4228 = vmatprep.subr.bf16.mxu0 %v5835_v7  ;;  %v1560_v60 = vpop.permute.xlu0 %1559  ;;  %v862_v28 = vrot.slane %v861_v58, 4  ;;  %v5895_v58 = vld [vmem:[%s6560_s1 + $0x1d8] sm:$0xff]  }
  0xc0   : > { %2493 = vmatmul.mubr.bf16.vlgmr.msra.gmra.mrb[16].mxu1 %v5399_v12  ;;  %v5871_v59 = vsel %vm1340_vm3, %v3758_v44, %v1560_v60  ;;  %v5888_v44 = vld [vmem:[%s6560_s1 + $0x2d0] sm:$0xff]   ;;  %v881_v39 = vsel %vm4858_vm2, %v876_v48, %v880_v4  ;;  %v5921_v60 = vld [vmem:[%s6560_s1 + $0x2d8] sm:$0xff]   ;;  %v5953_v48 = vld [vmem:[%s6560_s1 + $0x2e0] sm:$0xff]  }
  0xc1   : > { %2500 = vmatprep.mubr.bf16.mxu1 %v5498_v23  ;;  %4267 = vmatpush3.bf16.msra.mxu1 %v5830_v19  ;;  %v867_v54 = vsel %vm4858_vm2, %v862_v28, %v866_v10  ;;  %v5930_v10 = vld [vmem:[%s6560_s1 + $0x1e0] sm:$0xff]   ;;  %6632 = vst [vmem:[#allocation26_spill] sm:$0xff] %v5953_v48 }
  0xc2   : > { %4229 = vmatpush3.bf16.msra.mxu0 %v5844_v46  ;;  %4268 = vmatprep.subr.bf16.mxu1 %v5849_v30  ;;  %v3760_v4 = vcombine.low %v867_v54, %v881_v39  ;;  %v5948_v28 = vld [vmem:[%s6560_s1 + $0x1a0] sm:$0xff]  }
  0xc3   : > { %2265 = vmatprep.mubr.bf16.mxu0 %v5871_v59  ;;  %4230 = vmatprep.subr.bf16.mxu0 %v5857_v13  ;;  %6631 = vst [vmem:[#allocation25_spill] sm:$0xff] %v5948_v28  ;;  %v5969_v39 = vld [vmem:[%s6560_s1 + $0x2a0] sm:$0xff]  }
  0xc4   : > { %v1562_v61 = vpop.permute.xlu0 %1561  ;;  %6634 = vst [vmem:[#allocation28_spill] sm:$0xff] %v5969_v39 }
  0xc5   : > { %4269 = vmatpush3.bf16.msra.mxu1 %v5867_v31  ;;  %2266 = vmatmul.mubr.bf16.gmra.mrb[20].mxu0 %v5883_v25  ;;  %v5905_v32 = vsel %vm1340_vm3, %v3759_v29, %v1562_v61  ;;  %v5943_v29 = vsel %vm1340_vm3, %v3751_v8, %v1530_v42  ;;  %v5959_v61 = vld [vmem:[%s6560_s1 + $0x1e8] sm:$0xff]  }
  0xc6   : > { %4231 = vmatpush3.bf16.msra.mxu0 %v5876_v33  ;;  %4270 = vmatprep.subr.bf16.mxu1 %v5888_v44  ;;  %6633 = vst [vmem:[#allocation27_spill] sm:$0xff] %v5959_v61  ;;  %v5976_v8 = vld [vmem:[%s6560_s1 + $0x1a8] sm:$0xff]  }
  0xc7   : > { %4232 = vmatprep.subr.bf16.mxu0 %v5895_v58  ;;  %2273 = vmatprep.mubr.bf16.mxu0 %v5905_v32  ;;  %6635 = vst [vmem:[#allocation29_spill] sm:$0xff] %v5976_v8  ;;  %v5981_v42 = vld [vmem:[%s6560_s1 + $0x2e8] sm:$0xff]  }
  0xc8   : > { %2501 = vmatmul.mubr.bf16.gmra.mrb[20].mxu1 %v5523_v51  ;;  %6636 = vst [vmem:[#allocation30_spill] sm:$0xff] %v5981_v42 }
  0xc9   : > { %2508 = vmatprep.mubr.bf16.mxu1 %v5625_v18  ;;  %4271 = vmatpush3.bf16.msra.mxu1 %v5902_v63  ;;  %v1564_v3 = vpop.permute.xlu0 %1563 }
  0xca   : > { %4233 = vmatpush3.bf16.msra.mxu0 %v5916_v43  ;;  %4272 = vmatprep.subr.bf16.mxu1 %v5921_v60  ;;  %v5962_v54 = vsel %vm1340_vm3, %v3760_v4, %v1564_v3  ;;  %v3752_v4 = vcombine.low %v5811_v17, %v5814_v56  ;;  %v1532_v3 = vpop.permute.xlu1 %1531  ;;  %v5998_v17 = vld [vmem:[%s6560_s1 + $0x2a8] sm:$0xff]  }
  0xcb   : > { %4234 = vmatprep.subr.bf16.mxu0 %v5930_v10  ;;  %6638 = vst [vmem:[#allocation32_spill] sm:$0xff] %v5998_v17 }
  0xcc   : > { %v6003_v56 = vsel %vm1340_vm3, %v3752_v4, %v1532_v3  ;;  %v6026_v4 = vld [vmem:[%s6560_s1 + $0x2b0] sm:$0xff]   ;;  %v6033_v3 = vld [vmem:[%s6560_s1 + $0x1b8] sm:$0xff]  }
  0xcd   : > { %4273 = vmatpush3.bf16.msra.mxu1 %v5938_v11  ;;  %2274 = vmatmul.mubr.bf16.gmra.mrb[24].mxu0 %v5943_v29  ;;  %6642 = vst [vmem:[#allocation36_spill] sm:$0xff] %v6026_v4  ;;  %6643 = vst [vmem:[#allocation37_spill] sm:$0xff] %v6033_v3 }
  0xce   : > { %4235 = vmatpush3.bf16.msra.mxu0 %v5948_v28  ;;  %4274 = vmatprep.subr.bf16.mxu1 %v5953_v48  ;;  %v5990_v48 = vld [vmem:[%s6560_s1 + $0x1f0] sm:$0xff]  }
  0xcf   : > { %4236 = vmatprep.subr.bf16.mxu0 %v5959_v61  ;;  %2281 = vmatprep.mubr.bf16.mxu0 %v5962_v54  ;;  %6637 = vst [vmem:[#allocation31_spill] sm:$0xff] %v5990_v48  ;;  %v6008_v61 = vld [vmem:[%s6560_s1 + $0x1b0] sm:$0xff]  }
  0xd0   : > { %2509 = vmatmul.mubr.bf16.gmra.mrb[24].mxu1 %v5636_v27  ;;  %6639 = vst [vmem:[#allocation33_spill] sm:$0xff] %v6008_v61  ;;  %v3704_v28 = vld [vmem:[%s4819_s6 + $0xb4] sm:$0x1] }
  0xd1   : > { %2516 = vmatprep.mubr.bf16.mxu1 %v5750_v2  ;;  %4275 = vmatpush3.bf16.msra.mxu1 %v5969_v39  ;;  %v6013_v39 = vld [vmem:[%s6560_s1 + $0x2f0] sm:$0xff]   ;;  %v1080_v11 = vshll.u32 %v3704_v28, 16 }
  0xd2   : > { %4237 = vmatpush3.bf16.msra.mxu0 %v5976_v8  ;;  %4276 = vmatprep.subr.bf16.mxu1 %v5981_v42  ;;  %6640 = vst [vmem:[#allocation34_spill] sm:$0xff] %v6013_v39  ;;  %v6019_v8 = vld [vmem:[%s6560_s1 + $0x1f8] sm:$0xff]  }
  0xd3   : > { %4238 = vmatprep.subr.bf16.mxu0 %v5990_v48  ;;  %6641 = vst [vmem:[#allocation35_spill] sm:$0xff] %v6019_v8 }
  0xd5   : > { %4277 = vmatpush3.bf16.msra.mxu1 %v5998_v17  ;;  %2282 = vmatmul.mubr.bf16.gmra.mrb[28].mxu0 %v6003_v56  ;;  %v6038_v17 = vld [vmem:[%s6560_s1 + $0x2f8] sm:$0xff]  }
  0xd6   : > { %4239 = vmatpush3.bf16.msra.mxu0 %v6008_v61  ;;  %2653 = vmatprep.mubr.bf16.mxu0 %v5385_v21  ;;  %6644 = vst [vmem:[#allocation38_spill] sm:$0xff] %v6038_v17  ;;  %v6048_v21 = vld [vmem:[%s6560_s1 + $0x2b8] sm:$0xff]   ;;  %v6650_v61 = vld [vmem:[#allocation8_spill] sm:$0xff] }
  0xd7   : > { %4278 = vmatprep.subr.bf16.mxu1 %v6013_v39  ;;  %4240 = vmatprep.subr.bf16.mxu0 %v6019_v8  ;;  %6645 = vst [vmem:[#allocation39_spill] sm:$0xff] %v6048_v21  ;;  %v4720_v39 = vld [vmem:[%s6560_s1 + $0xc0] sm:$0xff]   ;;  %v6646_v8 = vld [vmem:[#allocation4_spill] sm:$0xff] }
  0xd8   : > { %2517 = vmatmul.mubr.bf16.gmra.mrb[28].mxu1 %v5756_v41 }
  0xd9   : > { %4279 = vmatpush3.bf16.msra.mxu1 %v6026_v4  ;;  %2847 = vmatprep.mubr.bf16.mxu1 %v5825_v14  ;;  %v4721_v4 = vld [vmem:[%s6560_s1 + $0x80] sm:$0xff]  }
  0xda   : > { %4241 = vmatpush3.bf16.msra.mxu0 %v6033_v3  ;;  %4280 = vmatprep.subr.bf16.mxu1 %v6038_v17  ;;  %v4722_v17 = vld [vmem:[%s6560_s1 + $0x40] sm:$0xff]   ;;  %v6192_v3 = vld [vmem:[%s4819_s6 + $0xb0] sm:$0xf] }
  0xdb   : > { %4306 = vmatprep.subr.bf16.mxu0 %v4720_v39  ;;  %v4723_v39 = vld [vmem:[%s6560_s1 + $0xc8] sm:$0xff]  }
  0xdd   : > { %4281 = vmatpush3.bf16.msra.mxu1 %v6048_v21  ;;  %2654 = vmatmul.mubr.bf16.vlgmr.msra.gmra.mrb[32].mxu0 %v5437_v40  ;;  %v4724_v40 = vld [vmem:[%s6560_s1] sm:$0xff]  }
  0xde   : > { %4307 = vmatpush3.bf16.msra.mxu0 %v4721_v4  ;;  %2661 = vmatprep.mubr.bf16.mxu0 %v5552_v57  ;;  %v4725_v57 = vld [vmem:[%s6560_s1 + $0x88] sm:$0xff]   ;;  %v4727_v4 = vld [vmem:[%s6560_s1 + $0xd0] sm:$0xff]  }
  0xdf   : > { %4346 = vmatprep.subr.bf16.mxu1 %v4722_v17  ;;  %4308 = vmatprep.subr.bf16.mxu0 %v4723_v39  ;;  %v4726_v17 = vld [vmem:[%s6560_s1 + $0x48] sm:$0xff]  }
  0xe0   : > { %2848 = vmatmul.mubr.bf16.vlgmr.msra.gmra.mrb[32].mxu1 %v5817_v0  ;;  %v4728_v39 = vld [vmem:[%s6560_s1 + $0x8] sm:$0xff]  }
  0xe1   : > { %2855 = vmatprep.mubr.bf16.mxu1 %v5871_v59  ;;  %4347 = vmatpush3.bf16.msra.mxu1 %v4724_v40  ;;  %v4729_v40 = vld [vmem:[%s6560_s1 + $0x90] sm:$0xff]  }
  0xe2   : > { %4309 = vmatpush3.bf16.msra.mxu0 %v4725_v57  ;;  %4348 = vmatprep.subr.bf16.mxu1 %v4726_v17  ;;  %v4730_v57 = vld [vmem:[%s6560_s1 + $0x50] sm:$0xff]   ;;  %v4731_v17 = vld [vmem:[%s6560_s1 + $0xd8] sm:$0xff]  }
  0xe3   : > { %4310 = vmatprep.subr.bf16.mxu0 %v4727_v4  ;;  %v4734_v4 = vld [vmem:[%s6560_s1 + $0x58] sm:$0xff]  }
  0xe5   : > { %4349 = vmatpush3.bf16.msra.mxu1 %v4728_v39  ;;  %2662 = vmatmul.mubr.bf16.gmra.mrb[36].mxu0 %v5560_v55  ;;  %v4732_v55 = vld [vmem:[%s6560_s1 + $0x10] sm:$0xff]   ;;  %v4735_v39 = vld [vmem:[%s6560_s1 + $0xe0] sm:$0xff]  }
  0xe6   : > { %4311 = vmatpush3.bf16.msra.mxu0 %v4729_v40  ;;  %2669 = vmatprep.mubr.bf16.mxu0 %v5687_v37  ;;  %v4733_v37 = vld [vmem:[%s6560_s1 + $0x98] sm:$0xff]  }
  0xe7   : > { %4350 = vmatprep.subr.bf16.mxu1 %v4730_v57  ;;  %4312 = vmatprep.subr.bf16.mxu0 %v4731_v17  ;;  %v4736_v40 = vld [vmem:[%s6560_s1 + $0x18] sm:$0xff]   ;;  %v4737_v57 = vld [vmem:[%s6560_s1 + $0xa0] sm:$0xff]  }
  0xe8   : > { %2856 = vmatmul.mubr.bf16.gmra.mrb[36].mxu1 %v5883_v25  ;;  %v4738_v17 = vld [vmem:[%s6560_s1 + $0x60] sm:$0xff]  }
  0xe9   : > { %2863 = vmatprep.mubr.bf16.mxu1 %v5905_v32  ;;  %4351 = vmatpush3.bf16.msra.mxu1 %v4732_v55  ;;  %v4739_v55 = vld [vmem:[%s6560_s1 + $0xe8] sm:$0xff]  }
  0xea   : > { %4313 = vmatpush3.bf16.msra.mxu0 %v4733_v37  ;;  %4352 = vmatprep.subr.bf16.mxu1 %v4734_v4  ;;  %v4742_v37 = vld [vmem:[%s6560_s1 + $0x68] sm:$0xff]   ;;  %v4743_v4 = vld [vmem:[%s6560_s1 + $0xf0] sm:$0xff]  }
  0xeb   : > { %4314 = vmatprep.subr.bf16.mxu0 %v4735_v39  ;;  %v4744_v39 = vld [vmem:[%s6560_s1 + $0x28] sm:$0xff]  }
  0xed   : > { %4353 = vmatpush3.bf16.msra.mxu1 %v4736_v40  ;;  %2670 = vmatmul.mubr.bf16.gmra.mrb[40].mxu0 %v5673_v38  ;;  %v4740_v38 = vld [vmem:[%s6560_s1 + $0x20] sm:$0xff]   ;;  %v4745_v40 = vld [vmem:[%s6560_s1 + $0xb0] sm:$0xff]  }
  0xee   : > { %4315 = vmatpush3.bf16.msra.mxu0 %v4737_v57  ;;  %2677 = vmatprep.mubr.bf16.mxu0 %v5783_v15  ;;  %v4741_v15 = vld [vmem:[%s6560_s1 + $0xa8] sm:$0xff]   ;;  %v4746_v57 = vld [vmem:[%s6560_s1 + $0x70] sm:$0xff]  }
  0xef   : > { %4354 = vmatprep.subr.bf16.mxu1 %v4738_v17  ;;  %4316 = vmatprep.subr.bf16.mxu0 %v4739_v55  ;;  %v4747_v17 = vld [vmem:[%s6560_s1 + $0xf8] sm:$0xff]  }
  0xf0   : > { %2864 = vmatmul.mubr.bf16.gmra.mrb[40].mxu1 %v5943_v29  ;;  %v4749_v55 = vld [vmem:[%s6560_s1 + $0xb8] sm:$0xff]  }
  0xf1   : > { %2871 = vmatprep.mubr.bf16.mxu1 %v5962_v54  ;;  %4355 = vmatpush3.bf16.msra.mxu1 %v4740_v38  ;;  %v4750_v38 = vld [vmem:[%s6560_s1 + $0x78] sm:$0xff]  }
  0xf2   : > { %4317 = vmatpush3.bf16.msra.mxu0 %v4741_v15  ;;  %4356 = vmatprep.subr.bf16.mxu1 %v4742_v37  ;;  %v6163_v15 = vld [vmem:[%s4819_s6 + $0x98] sm:$0xf]  ;;  %v6166_v37 = vld [vmem:[%s4819_s6 + $0xa0] sm:$0xf] }
  0xf3   : > { %4318 = vmatprep.subr.bf16.mxu0 %v4743_v4  ;;  %v4751_v4 = vld [vmem:[%s6560_s1 + $0x140] sm:$0xff]  }
  0xf5   : > { %4357 = vmatpush3.bf16.msra.mxu1 %v4744_v39  ;;  %2678 = vmatmul.mubr.bf16.gmra.mrb[44].mxu0 %v5774_v47  ;;  %v4748_v47 = vld [vmem:[%s6560_s1 + $0x30] sm:$0xff]   ;;  %v4752_v39 = vld [vmem:[%s6560_s1 + $0x38] sm:$0xff]  }
  0xf6   : > { %4319 = vmatpush3.bf16.msra.mxu0 %v4745_v40  ;;  %2928 = vmatprep.mubr.bf16.mxu0 %v5825_v14  ;;  %v1029_v40 = vshrl.u32 %v6163_v15, 16 }
  0xf7   : > { %4358 = vmatprep.subr.bf16.mxu1 %v4746_v57  ;;  %4320 = vmatprep.subr.bf16.mxu0 %v4747_v17  ;;  %v1032_v57 = vshll.u32 %v6163_v15, 16  ;;  %v1043_v17 = vshrl.u32 %v6166_v37, 16 }
  0xf8   : > { %2872 = vmatmul.mubr.bf16.gmra.mrb[44].mxu1 %v6003_v56 }
  0xf9   : > { %4359 = vmatpush3.bf16.msra.mxu1 %v4748_v47  ;;  %2993 = vmatprep.mubr.bf16.mxu1 %v5373_v53  ;;  %v1046_v47 = vshll.u32 %v6166_v37, 16  ;;  %v6648_v53 = vld [vmem:[#allocation6_spill] sm:$0xff] }
  0xfa   : > { %4321 = vmatpush3.bf16.msra.mxu0 %v4749_v55  ;;  %4360 = vmatprep.subr.bf16.mxu1 %v4750_v38  ;;  %v4753_v55 = vld [vmem:[%s6560_s1 + $0x240] sm:$0xff]   ;;  %v6187_v38 = vld [vmem:[%s4819_s6 + $0xa8] sm:$0xf] }
  0xfb   : > { %4386 = vmatprep.subr.bf16.mxu0 %v4751_v4  ;;  %v1034_v4 = vrot.slane %v1032_v57, 5  ;;  %v1048_v21 = vrot.slane %v1046_v47, 5  ;;  %v6647_v57 = vld [vmem:[#allocation5_spill] sm:$0xff] }
  0xfd   : > { %4361 = vmatpush3.bf16.msra.mxu1 %v4752_v39  ;;  %2929 = vmatmul.mubr.bf16.vlgmr.msra.gmra.mrb[48].mxu0 %v5817_v0  ;;  %v1045_v39 = vrot.slane %v1043_v17, 4 }
  0xfe   : > { %4387 = vmatpush3.bf16.msra.mxu0 %v5381_v9  ;;  %2936 = vmatprep.mubr.bf16.mxu0 %v5871_v59  ;;  %v1031_v9 = vrot.slane %v1029_v40, 4  ;;  %v1074_v40 = vshll.u32 %v6192_v3, 16 }
  0xff   : > { %4426 = vmatprep.subr.bf16.mxu1 %v4753_v55  ;;  %4388 = vmatprep.subr.bf16.mxu0 %v5395_v49  ;;  %v3701_v55 = vld [vmem:[%s4819_s6 + $0x9c] sm:$0x1]  ;;  %v3702_v49 = vld [vmem:[%s4819_s6 + $0xa4] sm:$0x1]  ;;  %v1049_v17 = vor.u32 %v1048_v21, %v1045_v39 }
 0x100   : > { %2994 = vmatmul.mubr.bf16.vlgmr.msra.gmra.mrb[48].mxu1 %v5399_v12  ;;  %v1057_v12 = vshrl.u32 %v6187_v38, 16  ;;  %v1052_v47 = vshll.u32 %v3702_v49, 16  ;;  %v6651_v21 = vld [vmem:[#allocation10_spill] sm:$0xff] }
 0x101   : > { %3001 = vmatprep.mubr.bf16.mxu1 %v5498_v23  ;;  %4427 = vmatpush3.bf16.msra.mxu1 %v5390_v16  ;;  %v1060_v23 = vshll.u32 %v6187_v38, 16  ;;  %v1071_v16 = vshrl.u32 %v6192_v3, 16 }
 0x102   : > { %4389 = vmatpush3.bf16.msra.mxu0 %v5405_v50  ;;  %4428 = vmatprep.subr.bf16.mxu1 %v5410_v1  ;;  %v1035_v50 = vor.u32 %v1034_v4, %v1031_v9  ;;  %v1038_v1 = vshll.u32 %v3701_v55, 16  ;;  %v1059_v48 = vrot.slane %v1057_v12, 4  ;;  %v1076_v4 = vrot.slane %v1074_v40, 5  ;;  %v6653_v12 = vld [vmem:[#allocation13_spill] sm:$0xff] }
 0x103   : > { %4390 = vmatprep.subr.bf16.mxu0 %v6646_v8  ;;  %v6649_v8 = vld [vmem:[#allocation7_spill] sm:$0xff]  ;;  %v1062_v42 = vrot.slane %v1060_v23, 5  ;;  %v1073_v9 = vrot.slane %v1071_v16, 4  ;;  %v1050_v55 = vrot.slane %v1049_v17, 4  ;;  %v1054_v49 = vrot.slane %v1052_v47, 5 }
 0x104   : > { %v1040_v39 = vrot.slane %v1038_v1, 5  ;;  %v6220_v23 = vld [vmem:[%s4819_s6 + $0xc0] sm:$0xf]  ;;  %v6655_v17 = vld [vmem:[#allocation15_spill] sm:$0xff] }
 0x105   : > { %4429 = vmatpush3.bf16.msra.mxu1 %v6647_v57  ;;  %2937 = vmatmul.mubr.bf16.gmra.mrb[52].mxu0 %v5883_v25  ;;  %v3703_v57 = vld [vmem:[%s4819_s6 + $0xac] sm:$0x1]  ;;  %v1063_v16 = vor.u32 %v1062_v42, %v1059_v48  ;;  %v1099_v48 = vshrl.u32 %v6220_v23, 16  ;;  %v1102_v28 = vshll.u32 %v6220_v23, 16  ;;  %v6656_v42 = vld [vmem:[#allocation16_spill] sm:$0xff] }
 0x106   : > { %4391 = vmatpush3.bf16.msra.mxu0 %v6648_v53  ;;  %2944 = vmatprep.mubr.bf16.mxu0 %v5905_v32  ;;  %v1036_v53 = vrot.slane %v1035_v50, 4  ;;  %v1066_v40 = vshll.u32 %v3703_v57, 16 }
 0x107   : > { %4430 = vmatprep.subr.bf16.mxu1 %v6649_v8  ;;  %4392 = vmatprep.subr.bf16.mxu0 %v6650_v61  ;;  %v6215_v8 = vld [vmem:[%s4819_s6 + $0xb8] sm:$0xf]  ;;  %v6652_v61 = vld [vmem:[#allocation12_spill] sm:$0xff]  ;;  %v1064_v57 = vrot.slane %v1063_v16, 4 }
 0x108   : > { %3002 = vmatmul.mubr.bf16.gmra.mrb[52].mxu1 %v5523_v51  ;;  %v6654_v51 = vld [vmem:[#allocation14_spill] sm:$0xff]  ;;  %v1085_v50 = vshrl.u32 %v6215_v8, 16  ;;  %v1088_v1 = vshll.u32 %v6215_v8, 16  ;;  %v1041_v47 = vsel %vm4858_vm2, %v1036_v53, %v1040_v39 }
 0x109   : > { %3009 = vmatprep.mubr.bf16.mxu1 %v5625_v18  ;;  %4431 = vmatpush3.bf16.msra.mxu1 %v6651_v21  ;;  %v1077_v18 = vor.u32 %v1076_v4, %v1073_v9  ;;  %v1068_v9 = vrot.slane %v1066_v40, 5  ;;  %v1082_v4 = vrot.slane %v1080_v11, 5  ;;  %v3705_v21 = vld [vmem:[%s4819_s6 + $0xbc] sm:$0x1]  ;;  %v6248_v11 = vld [vmem:[%s4819_s6 + $0xd0] sm:$0xf] }
 0x10a   : > { %4393 = vmatpush3.bf16.msra.mxu0 %v6652_v61  ;;  %4432 = vmatprep.subr.bf16.mxu1 %v6653_v12  ;;  %v1090_v61 = vrot.slane %v1088_v1, 5  ;;  %v1101_v12 = vrot.slane %v1099_v48, 4  ;;  %v1094_v16 = vshll.u32 %v3705_v21, 16  ;;  %v6657_v48 = vld [vmem:[#allocation19_spill] sm:$0xff] }
 0x10b   : > { %4394 = vmatprep.subr.bf16.mxu0 %v6654_v51  ;;  %v1055_v51 = vsel %vm4858_vm2, %v1050_v55, %v1054_v49  ;;  %v1078_v39 = vrot.slane %v1077_v18, 4  ;;  %v3706_v55 = vld [vmem:[%s4819_s6 + $0xc4] sm:$0x1]  ;;  %v1087_v49 = vrot.slane %v1085_v50, 4  ;;  %v1069_v18 = vsel %vm4858_vm2, %v1064_v57, %v1068_v9 }
 0x10c   : > { %v3773_v53 = vcombine.low %v1041_v47, %v1055_v51  ;;  %v1108_v40 = vshll.u32 %v3706_v55, 16  ;;  %v1127_v47 = vshrl.u32 %v6248_v11, 16  ;;  %v1130_v51 = vshll.u32 %v6248_v11, 16 }
 0x10d   : > { %4433 = vmatpush3.bf16.msra.mxu1 %v6655_v17  ;;  %2945 = vmatmul.mubr.bf16.gmra.mrb[56].mxu0 %v5943_v29  ;;  %v6243_v17 = vld [vmem:[%s4819_s6 + $0xc8] sm:$0xf]  ;;  %v1083_v50 = vsel %vm4858_vm2, %v1078_v39, %v1082_v4  ;;  %v1091_v1 = vor.u32 %v1090_v61, %v1087_v49  ;;  %v1096_v57 = vrot.slane %v1094_v16, 5 }
 0x10e   : > { %4395 = vmatpush3.bf16.msra.mxu0 %v5580_v20  ;;  %2952 = vmatprep.mubr.bf16.mxu0 %v5962_v54  ;;  %v1670_v20 = vpop.permute.xlu0 %1669  ;;  %v3774_v9 = vcombine.low %v1069_v18, %v1083_v50  ;;  %v1110_v21 = vrot.slane %v1108_v40, 5  ;;  %v1132_v49 = vrot.slane %v1130_v51, 5  ;;  %v6660_v18 = vld [vmem:[#allocation21_spill] sm:$0xff]  ;;  %v6661_v50 = vld [vmem:[#allocation23_spill] sm:$0xff] }
 0x10f   : > { %4434 = vmatprep.subr.bf16.mxu1 %v6656_v42  ;;  %4396 = vmatprep.subr.bf16.mxu0 %v5602_v22  ;;  %v1104_v22 = vrot.slane %v1102_v28, 5  ;;  %v6658_v28 = vld [vmem:[#allocation18_spill] sm:$0xff]  ;;  %v3765_v42 = vcombine.low %v6163_v15, %v6166_v37  ;;  %v1092_v4 = vrot.slane %v1091_v1, 4  ;;  %v3707_v15 = vld [vmem:[%s4819_s6 + $0xcc] sm:$0x1] }
 0x110   : > { %3010 = vmatmul.mubr.bf16.gmra.mrb[56].mxu1 %v5636_v27  ;;  %v6662_v1 = vld [vmem:[#allocation22_spill] sm:$0xff] }
 0x111   : > { %3017 = vmatprep.mubr.bf16.mxu1 %v5750_v2  ;;  %4435 = vmatpush3.bf16.msra.mxu1 %v5618_v62  ;;  %v6254_v62 = vsel %vm1340_vm3, %v3773_v53, %v1670_v20  ;;  %v3708_v20 = vld [vmem:[%s4819_s6 + $0xd4] sm:$0x1] }
 0x112   : > { %4397 = vmatpush3.bf16.msra.mxu0 %v5643_v52  ;;  %4436 = vmatprep.subr.bf16.mxu1 %v5630_v36  ;;  %v1113_v52 = vshrl.u32 %v6243_v17, 16  ;;  %v1105_v36 = vor.u32 %v1104_v22, %v1101_v12  ;;  %v1672_v39 = vpop.permute.xlu0 %1671  ;;  %v6659_v12 = vld [vmem:[#allocation20_spill] sm:$0xff]  ;;  %v1122_v22 = vshll.u32 %v3707_v15, 16  ;;  %v1136_v40 = vshll.u32 %v3708_v20, 16 }
 0x113   : > { %4398 = vmatprep.subr.bf16.mxu0 %v5654_v26  ;;  %v1116_v26 = vshll.u32 %v6243_v17, 16 }
 0x114   : > { %v1115_v53 = vrot.slane %v1113_v52, 4  ;;  %v1106_v55 = vrot.slane %v1105_v36, 4  ;;  %v3766_v52 = vcombine.low %v6187_v38, %v6192_v3  ;;  %v6669_v3 = vld [vmem:[#allocation30_spill] sm:$0xff] }
 0x115   : > { %4437 = vmatpush3.bf16.msra.mxu1 %v5665_v5  ;;  %2953 = vmatmul.mubr.bf16.gmra.mrb[60].mxu0 %v6003_v56  ;;  %v1638_v5 = vpop.permute.xlu1 %1637  ;;  %v1118_v37 = vrot.slane %v1116_v26, 5 }
 0x116   : > { %4399 = vmatpush3.bf16.msra.mxu0 %v6657_v48  ;;  %4438 = vmatprep.subr.bf16.mxu1 %v6658_v28  ;;  %v6277_v61 = vsel %vm1340_vm3, %v3765_v42, %v1638_v5  ;;  %v1124_v48 = vrot.slane %v1122_v22, 5  ;;  %v1138_v42 = vrot.slane %v1136_v40, 5  ;;  %v6676_v5 = vld [vmem:[#allocation36_spill] sm:$0xff] }
 0x117   : > { %4400 = vmatprep.subr.bf16.mxu0 %v5707_v45  ;;  %3058 = vmatprep.mubr.bf16.mxu0 %v6254_v62  ;;  %v1129_v45 = vrot.slane %v1127_v47, 4  ;;  %v1674_v47 = vpop.permute.xlu0 %1673 }
 0x118   : > { %3018 = vmatmul.mubr.bf16.gmra.mrb[60].mxu1 %v5756_v41 }
 0x119   : > { %4439 = vmatpush3.bf16.msra.mxu1 %v5717_v6  ;;  %3139 = vmatprep.mubr.bf16.mxu1 %v5825_v14  ;;  %v6282_v6 = vsel %vm1340_vm3, %v3774_v9, %v1672_v39  ;;  %v1097_v14 = vsel %vm4858_vm2, %v1092_v4, %v1096_v57  ;;  %v1133_v16 = vor.u32 %v1132_v49, %v1129_v45  ;;  %v1640_v36 = vpop.permute.xlu1 %1639  ;;  %v6677_v57 = vld [vmem:[#allocation37_spill] sm:$0xff]  ;;  %v6678_v9 = vld [vmem:[#allocation38_spill] sm:$0xff]  ;;  %v6679_v4 = vld [vmem:[#allocation39_spill] sm:$0xff] }
 0x11a   : > { %4401 = vmatpush3.bf16.msra.mxu0 %v5744_v24  ;;  %4440 = vmatprep.subr.bf16.mxu1 %v5728_v35  ;;  %v1111_v35 = vsel %vm4858_vm2, %v1106_v55, %v1110_v21  ;;  %v1119_v24 = vor.u32 %v1118_v37, %v1115_v53  ;;  %v6680_v21 = vld [vmem:[#allocation3_spill] sm:$0xff]  ;;  %v6681_v53 = vld [vmem:[#allocation9_spill] sm:$0xff] }
 0x11b   : > { %4466 = vmatprep.subr.bf16.mxu0 %v6659_v12  ;;  %v3775_v26 = vcombine.low %v1097_v14, %v1111_v35  ;;  %v1134_v28 = vrot.slane %v1133_v16, 4  ;;  %v6682_v39 = vld [vmem:[#allocation11_spill] sm:$0xff] }
 0x11c   : > { %v1120_v51 = vrot.slane %v1119_v24, 4 }
 0x11d   : > { %4441 = vmatpush3.bf16.msra.mxu1 %v6660_v18  ;;  %3059 = vmatmul.mubr.bf16.vlgmr.msra.gmra.mrb[64].mxu0 %v6277_v61 }
 0x11e   : > { %4467 = vmatpush3.bf16.msra.mxu0 %v6661_v50  ;;  %4506 = vmatprep.subr.bf16.mxu1 %v6662_v1  ;;  %v1676_v34 = vpop.permute.xlu0 %1675 }
 0x11f   : > { %4468 = vmatprep.subr.bf16.mxu0 %v5835_v7  ;;  %3066 = vmatprep.mubr.bf16.mxu0 %v6282_v6  ;;  %v1683_v7 = vsel %vm1340_vm3, %v3766_v52, %v1640_v36 }
 0x120   : > { %3140 = vmatmul.mubr.bf16.vlgmr.msra.gmra.mrb[64].mxu1 %v5817_v0  ;;  %v1703_v0 = vsel %vm1340_vm3, %v3775_v26, %v1674_v47 }
 0x121   : > { %3147 = vmatprep.mubr.bf16.mxu1 %v5871_v59  ;;  %4507 = vmatpush3.bf16.msra.mxu1 %v5830_v19  ;;  %v1125_v59 = vsel %vm4858_vm2, %v1120_v51, %v1124_v48  ;;  %v1139_v19 = vsel %vm4858_vm2, %v1134_v28, %v1138_v42 }
 0x122   : > { %4469 = vmatpush3.bf16.msra.mxu0 %v5844_v46  ;;  %4508 = vmatprep.subr.bf16.mxu1 %v5849_v30  ;;  %v3767_v46 = vcombine.low %v6215_v8, %v6220_v23  ;;  %v1642_v30 = vpop.permute.xlu1 %1641  ;;  %v6670_v8 = vld [vmem:[#allocation31_spill] sm:$0xff]  ;;  %v6671_v23 = vld [vmem:[#allocation32_spill] sm:$0xff] }
 0x123   : > { %4470 = vmatprep.subr.bf16.mxu0 %v5857_v13  ;;  %v3776_v13 = vcombine.low %v1125_v59, %v1139_v19 }
 0x125   : > { %4509 = vmatpush3.bf16.msra.mxu1 %v5867_v31  ;;  %3067 = vmatmul.mubr.bf16.gmra.mrb[68].mxu0 %v1683_v7  ;;  %v1687_v31 = vsel %vm1340_vm3, %v3767_v46, %v1642_v30 }
 0x126   : > { %4471 = vmatpush3.bf16.msra.mxu0 %v5876_v33  ;;  %4510 = vmatprep.subr.bf16.mxu1 %v5888_v44  ;;  %v1707_v33 = vsel %vm1340_vm3, %v3776_v13, %v1676_v34  ;;  %v6663_v44 = vld [vmem:[#allocation24_spill] sm:$0xff] }
 0x127   : > { %4472 = vmatprep.subr.bf16.mxu0 %v5895_v58  ;;  %3074 = vmatprep.mubr.bf16.mxu0 %v1703_v0  ;;  %v6665_v58 = vld [vmem:[#allocation26_spill] sm:$0xff] }
 0x128   : > { %3148 = vmatmul.mubr.bf16.gmra.mrb[68].mxu1 %v5883_v25  ;;  %v6664_v25 = vld [vmem:[#allocation25_spill] sm:$0xff] }
 0x129   : > { %3155 = vmatprep.mubr.bf16.mxu1 %v5905_v32  ;;  %4511 = vmatpush3.bf16.msra.mxu1 %v5902_v63  ;;  %v3768_v63 = vcombine.low %v6243_v17, %v6248_v11  ;;  %v6666_v32 = vld [vmem:[#allocation27_spill] sm:$0xff]  ;;  %v6672_v17 = vld [vmem:[#allocation33_spill] sm:$0xff]  ;;  %v6673_v11 = vld [vmem:[#allocation2_spill] sm:$0xff] }
 0x12a   : > { %4473 = vmatpush3.bf16.msra.mxu0 %v5916_v43  ;;  %4512 = vmatprep.subr.bf16.mxu1 %v5921_v60  ;;  %v1644_v43 = vpop.permute.xlu1 %1643  ;;  %v6667_v60 = vld [vmem:[#allocation28_spill] sm:$0xff] }
 0x12b   : > { %4474 = vmatprep.subr.bf16.mxu0 %v5930_v10  ;;  %v6668_v10 = vld [vmem:[#allocation29_spill] sm:$0xff]  ;;  %v1691_v38 = vsel %vm1340_vm3, %v3768_v63, %v1644_v43 }
 0x12d   : > { %4513 = vmatpush3.bf16.msra.mxu1 %v6663_v44  ;;  %3075 = vmatmul.mubr.bf16.gmra.mrb[72].mxu0 %v1687_v31 }
 0x12e   : > { %4475 = vmatpush3.bf16.msra.mxu0 %v6664_v25  ;;  %4514 = vmatprep.subr.bf16.mxu1 %v6665_v58 }
 0x12f   : > { %4476 = vmatprep.subr.bf16.mxu0 %v6666_v32  ;;  %3082 = vmatprep.mubr.bf16.mxu0 %v1707_v33 }
 0x130   : > { %3156 = vmatmul.mubr.bf16.gmra.mrb[72].mxu1 %v5943_v29  ;;  %v6674_v29 = vld [vmem:[#allocation34_spill] sm:$0xff] }
 0x131   : > { %3163 = vmatprep.mubr.bf16.mxu1 %v5962_v54  ;;  %4515 = vmatpush3.bf16.msra.mxu1 %v6667_v60  ;;  %v6675_v54 = vld [vmem:[#allocation35_spill] sm:$0xff] }
 0x132   : > { %4477 = vmatpush3.bf16.msra.mxu0 %v6668_v10  ;;  %4516 = vmatprep.subr.bf16.mxu1 %v6669_v3 }
 0x133   : > { %4478 = vmatprep.subr.bf16.mxu0 %v6670_v8 }
 0x135   : > { %4517 = vmatpush3.bf16.msra.mxu1 %v6671_v23  ;;  %3083 = vmatmul.mubr.bf16.gmra.mrb[76].mxu0 %v1691_v38 }
 0x136   : > { %4479 = vmatpush3.bf16.msra.mxu0 %v6672_v17  ;;  %3204 = vmatprep.mubr.bf16.mxu0 %v6673_v11 }
 0x137   : > { %4518 = vmatprep.subr.bf16.mxu1 %v6674_v29  ;;  %4480 = vmatprep.subr.bf16.mxu0 %v6675_v54 }
 0x138   : > { %3164 = vmatmul.mubr.bf16.gmra.mrb[76].mxu1 %v6003_v56  ;;  %v6683_v56 = vld [vmem:[#allocation17_spill] sm:$0xff] }
 0x139   : > { %4519 = vmatpush3.bf16.msra.mxu1 %v6676_v5  ;;  %3269 = vmatprep.mubr.bf16.mxu1 %v6254_v62 }
 0x13a   : > { %4481 = vmatpush3.bf16.msra.mxu0 %v6677_v57  ;;  %4520 = vmatprep.subr.bf16.mxu1 %v6678_v9 }
 0x13d   : > { %4521 = vmatpush3.bf16.msra.mxu1 %v6679_v4  ;;  %3205 = vmatmul.mubr.bf16.vlgmr.msra.gmra.mrb[80].mxu0 %v6680_v21 }
 0x13e   : > { %3212 = vmatprep.mubr.bf16.mxu0 %v6681_v53 }
 0x140   : > { %3270 = vmatmul.mubr.bf16.vlgmr.msra.gmra.mrb[80].mxu1 %v6277_v61 }
 0x141   : > { %3277 = vmatprep.mubr.bf16.mxu1 %v6282_v6 }
 0x145   : > { %3213 = vmatmul.mubr.bf16.gmra.mrb[84].mxu0 %v6682_v39 }
 0x146   : > { %3220 = vmatprep.mubr.bf16.mxu0 %v6683_v56 }
 0x148   : > { %3278 = vmatmul.mubr.bf16.gmra.mrb[84].mxu1 %v1683_v7 }
 0x149   : > { %3285 = vmatprep.mubr.bf16.mxu1 %v1703_v0 }
 0x14d   : > { %3221 = vmatmul.mubr.bf16.gmra.mrb[88].mxu0 %v5636_v27 }
 0x14e   : > { %3228 = vmatprep.mubr.bf16.mxu0 %v5750_v2 }
 0x150   : > { %3286 = vmatmul.mubr.bf16.gmra.mrb[88].mxu1 %v1687_v31 }
 0x151   : > { %3293 = vmatprep.mubr.bf16.mxu1 %v1707_v33 }
 0x155   : > { %3229 = vmatmul.mubr.bf16.gmra.mrb[92].mxu0 %v5756_v41 }
 0x158   : > { %3294 = vmatmul.mubr.bf16.gmra.mrb[92].mxu1 %v1691_v38 }
 0x16b   : > { %v4082_v62 = vpop.f32.mrb[0].mxu0 }
 0x16c   : > { %v4083_v55 = vpop.f32.mrb[1].mxu0 }
 0x16d   : > { %v4084_v15 = vadd.f32 %v4083_v55, %v4082_v62  ;;  %v4085_v37 = vpop.f32.mrb[2].mxu0 }
 0x16e   : > { %v4122_v45 = vpop.f32.mrb[0].mxu1  ;;  %v4086_v49 = vpop.f32.mrb[3].mxu0 }
 0x16f   : > { %v4123_v61 = vpop.f32.mrb[1].mxu1  ;;  %v4087_v20 = vadd.f32 %v4086_v49, %v4085_v37 }
 0x170   : > { %v4124_v12 = vadd.f32 %v4123_v61, %v4122_v45  ;;  %v4125_v6 = vpop.f32.mrb[2].mxu1 }
 0x171   : > { %v4126_v14 = vpop.f32.mrb[3].mxu1 }
 0x172   : > { %v2066_v22 = vadd.f32 %v4124_v12, %v4084_v15  ;;  %v4127_v27 = vadd.f32 %v4126_v14, %v4125_v6 }
 0x173   : > { %v4088_v18 = vpop.f32.mrb[4].mxu0 }
 0x174   : > { %v2069_v2 = vadd.f32 %v4127_v27, %v4087_v20  ;;  %v4089_v35 = vpop.f32.mrb[5].mxu0 }
 0x175   : > { %v4090_v24 = vadd.f32 %v4089_v35, %v4088_v18  ;;  %v4091_v16 = vpop.f32.mrb[6].mxu0 }
 0x176   : > { %v4128_v41 = vpop.f32.mrb[4].mxu1  ;;  %v4092_v40 = vpop.f32.mrb[7].mxu0 }
 0x177   : > { %v4129_v50 = vpop.f32.mrb[5].mxu1  ;;  %v4093_v1 = vadd.f32 %v4092_v40, %v4091_v16 }
 0x178   : > { %v4130_v52 = vadd.f32 %v4129_v50, %v4128_v41  ;;  %v4131_v36 = vpop.f32.mrb[6].mxu1 }
 0x179   : > { %v4132_v26 = vpop.f32.mrb[7].mxu1 }
 0x17a   : > { %v2074_v47 = vadd.f32 %v4130_v52, %v4090_v24  ;;  %v4133_v51 = vadd.f32 %v4132_v26, %v4131_v36 }
 0x17c   : > { %v2077_v48 = vadd.f32 %v4133_v51, %v4093_v1  ;;  %v4094_v28 = vpop.f32.mrb[8].mxu0  ;;  %v4717_v1 = vld [vmem:[%s6562_s3 + $0x8] sm:$0xff]  }
 0x17d   : > { %v4095_v42 = vpop.f32.mrb[9].mxu0 }
 0x17e   : > { %v4096_v7 = vadd.f32 %v4095_v42, %v4094_v28  ;;  %v4097_v0 = vpop.f32.mrb[10].mxu0  ;;  %v4718_v28 = vld [vmem:[%s6562_s3 + $0x10] sm:$0xff]  }
 0x17f   : > { %v4098_v59 = vpop.f32.mrb[11].mxu0 }
 0x180   : > { %v4099_v19 = vadd.f32 %v4098_v59, %v4097_v0 }
 0x181   : > { %v4134_v46 = vpop.f32.mrb[8].mxu1 }
 0x182   : > { %v4135_v30 = vpop.f32.mrb[9].mxu1 }
 0x183   : > { %v4136_v13 = vadd.f32 %v4135_v30, %v4134_v46  ;;  %v4137_v34 = vpop.f32.mrb[10].mxu1 }
 0x184   : > { %v4138_v31 = vpop.f32.mrb[11].mxu1 }
 0x185   : > { %v2082_v33 = vadd.f32 %v4136_v13, %v4096_v7  ;;  %v4139_v44 = vadd.f32 %v4138_v31, %v4137_v34  ;;  %v4719_v31 = vld [vmem:[%s6562_s3 + $0x18] sm:$0xff]  }
 0x186   : > { %v4100_v25 = vpop.f32.mrb[12].mxu0 }
 0x187   : > { %v6355_v58 = vadd.f32 %v4139_v44, %v4099_v19  ;;  %v4101_v63 = vpop.f32.mrb[13].mxu0 }
 0x188   : > { %v4102_v32 = vadd.f32 %v4101_v63, %v4100_v25  ;;  %v4103_v43 = vpop.f32.mrb[14].mxu0 }
 0x189   : > { %v4104_v60 = vpop.f32.mrb[15].mxu0 }
 0x18a   : > { %v4105_v10 = vadd.f32 %v4104_v60, %v4103_v43 }
 0x18b   : > { %v4140_v3 = vpop.f32.mrb[12].mxu1 }
 0x18c   : > { %v4141_v38 = vpop.f32.mrb[13].mxu1 }
 0x18d   : > { %v4142_v8 = vadd.f32 %v4141_v38, %v4140_v3  ;;  %v4143_v23 = vpop.f32.mrb[14].mxu1 }
 0x18e   : > { %v4144_v17 = vpop.f32.mrb[15].mxu1 }
 0x18f   : > { %v6357_v11 = vadd.f32 %v4142_v8, %v4102_v32  ;;  %v4145_v29 = vadd.f32 %v4144_v17, %v4143_v23 }
 0x190   : > { %v4162_v54 = vpop.f32.mrb[16].mxu0 }
 0x191   : > { %v6359_v5 = vadd.f32 %v4145_v29, %v4105_v10  ;;  %v4163_v57 = vpop.f32.mrb[17].mxu0 }
 0x192   : > { %v4164_v9 = vadd.f32 %v4163_v57, %v4162_v54  ;;  %v4165_v4 = vpop.f32.mrb[18].mxu0 }
 0x193   : > { %v4202_v21 = vpop.f32.mrb[16].mxu1  ;;  %v4166_v53 = vpop.f32.mrb[19].mxu0 }
 0x194   : > { %v6361_v39 = vadd.f32 %v4164_v9, %v2066_v22  ;;  %v4203_v56 = vpop.f32.mrb[17].mxu1  ;;  %v4167_v62 = vadd.f32 %v4166_v53, %v4165_v4  ;;  %v4716_v22 = vld [vmem:[%s6562_s3] sm:$0xff]  }
 0x195   : > { %v6363_v55 = vadd.f32 %v4203_v56, %v4202_v21  ;;  %v4205_v15 = vpop.f32.mrb[18].mxu1  ;;  %4554 = vmatprep.subr.bf16.mxu0 %v4716_v22  ;;  %4570 = vmatprep.subr.bf16.mxu1 %v4716_v22 }
 0x196   : > { %v6365_v37 = vadd.f32 %v4167_v62, %v2069_v2  ;;  %v4206_v45 = vpop.f32.mrb[19].mxu1  ;;  %4555 = vmatpush3.bf16.msra.mxu0 %v4716_v22  ;;  %4574 = vmatpush3.bf16.msra.mxu1 %v4716_v22 }
 0x197   : > { %v6367_v49 = vadd.f32 %v4206_v45, %v4205_v15  ;;  %4556 = vmatprep.subr.bf16.mxu0 %v4717_v1  ;;  %4571 = vmatprep.subr.bf16.mxu1 %v4717_v1 }
 0x198   : > { %v4168_v61 = vpop.f32.mrb[20].mxu0 }
 0x199   : > { %v4169_v20 = vpop.f32.mrb[21].mxu0 }
 0x19a   : > { %v4170_v12 = vadd.f32 %v4169_v20, %v4168_v61  ;;  %v4171_v6 = vpop.f32.mrb[22].mxu0  ;;  %4557 = vmatpush3.bf16.msra.mxu0 %v4717_v1  ;;  %4575 = vmatpush3.bf16.msra.mxu1 %v4717_v1 }
 0x19b   : > { %v4208_v14 = vpop.f32.mrb[20].mxu1  ;;  %v4172_v27 = vpop.f32.mrb[23].mxu0  ;;  %4558 = vmatprep.subr.bf16.mxu0 %v4718_v28  ;;  %4572 = vmatprep.subr.bf16.mxu1 %v4718_v28 }
 0x19c   : > { %v6372_v18 = vadd.f32 %v4170_v12, %v2074_v47  ;;  %v4209_v35 = vpop.f32.mrb[21].mxu1  ;;  %v4173_v24 = vadd.f32 %v4172_v27, %v4171_v6 }
 0x19d   : > { %v6374_v16 = vadd.f32 %v4209_v35, %v4208_v14  ;;  %v4211_v2 = vpop.f32.mrb[22].mxu1 }
 0x19e   : > { %v6376_v41 = vadd.f32 %v4173_v24, %v2077_v48  ;;  %v4212_v40 = vpop.f32.mrb[23].mxu1  ;;  %4559 = vmatpush3.bf16.msra.mxu0 %v4718_v28  ;;  %4576 = vmatpush3.bf16.msra.mxu1 %v4718_v28 }
 0x19f   : > { %v6378_v50 = vadd.f32 %v4212_v40, %v4211_v2  ;;  %4560 = vmatprep.subr.bf16.mxu0 %v4719_v31  ;;  %4573 = vmatprep.subr.bf16.mxu1 %v4719_v31 }
 0x1a0   : > { %v4174_v52 = vpop.f32.mrb[24].mxu0 }
 0x1a1   : > { %v4175_v36 = vpop.f32.mrb[25].mxu0 }
 0x1a2   : > { %v4176_v26 = vadd.f32 %v4175_v36, %v4174_v52  ;;  %v4177_v47 = vpop.f32.mrb[26].mxu0  ;;  %4561 = vmatpush3.bf16.msra.mxu0 %v4719_v31  ;;  %4577 = vmatpush3.bf16.msra.mxu1 %v4719_v31 }
 0x1a3   : > { %v4214_v51 = vpop.f32.mrb[24].mxu1  ;;  %v4178_v48 = vpop.f32.mrb[27].mxu0 }
 0x1a4   : > { %v6386_v42 = vadd.f32 %v4176_v26, %v2082_v33  ;;  %v4215_v7 = vpop.f32.mrb[25].mxu1  ;;  %v4179_v0 = vadd.f32 %v4178_v48, %v4177_v47 }
 0x1a5   : > { %v6388_v59 = vadd.f32 %v4215_v7, %v4214_v51  ;;  %v4217_v19 = vpop.f32.mrb[26].mxu1 }
 0x1a6   : > { %v6391_v46 = vadd.f32 %v4179_v0, %v6355_v58  ;;  %v4218_v30 = vpop.f32.mrb[27].mxu1 }
 0x1a7   : > { %v6393_v13 = vadd.f32 %v4218_v30, %v4217_v19 }
 0x1a8   : > { %v4180_v34 = vpop.f32.mrb[28].mxu0 }
 0x1a9   : > { %v4181_v33 = vpop.f32.mrb[29].mxu0 }
 0x1aa   : > { %v4182_v44 = vadd.f32 %v4181_v33, %v4180_v34  ;;  %v4183_v25 = vpop.f32.mrb[30].mxu0 }
 0x1ab   : > { %v4220_v63 = vpop.f32.mrb[28].mxu1  ;;  %v4184_v32 = vpop.f32.mrb[31].mxu0 }
 0x1ac   : > { %v6399_v58 = vadd.f32 %v4182_v44, %v6357_v11  ;;  %v4221_v43 = vpop.f32.mrb[29].mxu1  ;;  %v4185_v60 = vadd.f32 %v4184_v32, %v4183_v25 }
 0x1ad   : > { %v6401_v10 = vadd.f32 %v4221_v43, %v4220_v63  ;;  %v4223_v3 = vpop.f32.mrb[30].mxu1 }
 0x1ae   : > { %v6404_v38 = vadd.f32 %v4185_v60, %v6359_v5  ;;  %v4224_v8 = vpop.f32.mrb[31].mxu1 }
 0x1af   : > { %v6406_v23 = vadd.f32 %v4224_v8, %v4223_v3 }
 0x1b0   : > { %v4242_v17 = vpop.f32.mrb[32].mxu0 }
 0x1b1   : > { %v4243_v29 = vpop.f32.mrb[33].mxu0 }
 0x1b2   : > { %v4244_v54 = vadd.f32 %v4243_v29, %v4242_v17  ;;  %v4245_v57 = vpop.f32.mrb[34].mxu0 }
 0x1b3   : > { %v4282_v9 = vpop.f32.mrb[32].mxu1  ;;  %v4246_v4 = vpop.f32.mrb[35].mxu0 }
 0x1b4   : > { %v2656_v11 = vadd.f32 %v4244_v54, %v6363_v55  ;;  %v4283_v21 = vpop.f32.mrb[33].mxu1  ;;  %v4247_v53 = vadd.f32 %v4246_v4, %v4245_v57 }
 0x1b5   : > { %v4284_v56 = vadd.f32 %v4283_v21, %v4282_v9  ;;  %v4285_v62 = vpop.f32.mrb[34].mxu1 }
 0x1b6   : > { %v2659_v15 = vadd.f32 %v4247_v53, %v6367_v49  ;;  %v4286_v45 = vpop.f32.mrb[35].mxu1 }
 0x1b7   : > { %v6410_v5 = vadd.f32 %v4284_v56, %v2656_v11  ;;  %v4287_v61 = vadd.f32 %v4286_v45, %v4285_v62 }
 0x1b8   : > { %v4248_v20 = vpop.f32.mrb[36].mxu0 }
 0x1b9   : > { %v2888_v12 = vmax.f32 %v6361_v39, %v6410_v5  ;;  %v6414_v6 = vadd.f32 %v4287_v61, %v2659_v15  ;;  %v4249_v14 = vpop.f32.mrb[37].mxu0 }
 0x1ba   : > { %v4250_v27 = vadd.f32 %v4249_v14, %v4248_v20  ;;  %v4251_v22 = vpop.f32.mrb[38].mxu0 }
 0x1bb   : > { %v2889_v55 = vmax.f32 %v6365_v37, %v6414_v6  ;;  %v4288_v35 = vpop.f32.mrb[36].mxu1  ;;  %v4252_v24 = vpop.f32.mrb[39].mxu0 }
 0x1bc   : > { %v2664_v49 = vadd.f32 %v4250_v27, %v6374_v16  ;;  %v4289_v2 = vpop.f32.mrb[37].mxu1  ;;  %v4253_v40 = vadd.f32 %v4252_v24, %v4251_v22 }
 0x1bd   : > { %v4290_v1 = vadd.f32 %v4289_v2, %v4288_v35  ;;  %v4291_v52 = vpop.f32.mrb[38].mxu1 }
 0x1be   : > { %v2667_v36 = vadd.f32 %v4253_v40, %v6378_v50  ;;  %v4292_v26 = vpop.f32.mrb[39].mxu1 }
 0x1bf   : > { %v6420_v47 = vadd.f32 %v4290_v1, %v2664_v49  ;;  %v4293_v51 = vadd.f32 %v4292_v26, %v4291_v52 }
 0x1c0   : > { %v4254_v48 = vpop.f32.mrb[40].mxu0 }
 0x1c1   : > { %v2890_v28 = vmax.f32 %v6372_v18, %v6420_v47  ;;  %v6424_v7 = vadd.f32 %v4293_v51, %v2667_v36  ;;  %v4255_v0 = vpop.f32.mrb[41].mxu0 }
 0x1c2   : > { %v4256_v19 = vadd.f32 %v4255_v0, %v4254_v48  ;;  %v4257_v30 = vpop.f32.mrb[42].mxu0 }
 0x1c3   : > { %v2891_v16 = vmax.f32 %v6376_v41, %v6424_v7  ;;  %v4294_v34 = vpop.f32.mrb[40].mxu1  ;;  %v4258_v31 = vpop.f32.mrb[43].mxu0 }
 0x1c4   : > { %v2672_v50 = vadd.f32 %v4256_v19, %v6388_v59  ;;  %v4295_v33 = vpop.f32.mrb[41].mxu1  ;;  %v4259_v44 = vadd.f32 %v4258_v31, %v4257_v30 }
 0x1c5   : > { %v4296_v25 = vadd.f32 %v4295_v33, %v4294_v34  ;;  %v4297_v63 = vpop.f32.mrb[42].mxu1 }
 0x1c6   : > { %v2675_v32 = vadd.f32 %v4259_v44, %v6393_v13  ;;  %v4298_v43 = vpop.f32.mrb[43].mxu1 }
 0x1c7   : > { %v6430_v60 = vadd.f32 %v4296_v25, %v2672_v50  ;;  %v4299_v3 = vadd.f32 %v4298_v43, %v4297_v63 }
 0x1c8   : > { %v4260_v8 = vpop.f32.mrb[44].mxu0 }
 0x1c9   : > { %v2892_v17 = vmax.f32 %v6386_v42, %v6430_v60  ;;  %v6434_v29 = vadd.f32 %v4299_v3, %v2675_v32  ;;  %v4261_v54 = vpop.f32.mrb[45].mxu0 }
 0x1ca   : > { %v4262_v57 = vadd.f32 %v4261_v54, %v4260_v8  ;;  %v4263_v9 = vpop.f32.mrb[46].mxu0 }
 0x1cb   : > { %v2893_v59 = vmax.f32 %v6391_v46, %v6434_v29  ;;  %v4300_v4 = vpop.f32.mrb[44].mxu1  ;;  %v4264_v11 = vpop.f32.mrb[47].mxu0 }
 0x1cc   : > { %v2680_v13 = vadd.f32 %v4262_v57, %v6401_v10  ;;  %v4301_v21 = vpop.f32.mrb[45].mxu1  ;;  %v4265_v53 = vadd.f32 %v4264_v11, %v4263_v9 }
 0x1cd   : > { %v4302_v56 = vadd.f32 %v4301_v21, %v4300_v4  ;;  %v4303_v62 = vpop.f32.mrb[46].mxu1 }
 0x1ce   : > { %v2683_v15 = vadd.f32 %v4265_v53, %v6406_v23  ;;  %v4304_v45 = vpop.f32.mrb[47].mxu1 }
 0x1cf   : > { %v6440_v61 = vadd.f32 %v4302_v56, %v2680_v13  ;;  %v4305_v20 = vadd.f32 %v4304_v45, %v4303_v62 }
 0x1d0   : > { %v4322_v14 = vpop.f32.mrb[48].mxu0 }
 0x1d1   : > { %v2894_v27 = vmax.f32 %v6399_v58, %v6440_v61  ;;  %v6444_v22 = vadd.f32 %v4305_v20, %v2683_v15  ;;  %v4323_v35 = vpop.f32.mrb[49].mxu0 }
 0x1d2   : > { %v4324_v24 = vadd.f32 %v4323_v35, %v4322_v14  ;;  %v4325_v49 = vpop.f32.mrb[50].mxu0 }
 0x1d3   : > { %v2895_v10 = vmax.f32 %v6404_v38, %v6444_v22  ;;  %v4362_v2 = vpop.f32.mrb[48].mxu1  ;;  %v4326_v40 = vpop.f32.mrb[51].mxu0  ;;  %v6503_v38 = vld [vmem:[%s6561_s2] ss:$0 sm:$0xff] }
 0x1d4   : > { %v4363_v1 = vpop.f32.mrb[49].mxu1  ;;  %v4327_v23 = vadd.f32 %v4326_v40, %v4325_v49 }
 0x1d5   : > { %v4364_v52 = vadd.f32 %v4363_v1, %v4362_v2  ;;  %v4365_v36 = vpop.f32.mrb[50].mxu1 }
 0x1d6   : > { %v4366_v26 = vpop.f32.mrb[51].mxu1 }
 0x1d7   : > { %v2996_v51 = vadd.f32 %v4364_v52, %v4324_v24  ;;  %v4367_v48 = vadd.f32 %v4366_v26, %v4365_v36 }
 0x1d8   : > { %v4328_v0 = vpop.f32.mrb[52].mxu0 }
 0x1d9   : > { %v2999_v19 = vadd.f32 %v4367_v48, %v4327_v23  ;;  %v4329_v30 = vpop.f32.mrb[53].mxu0 }
 0x1da   : > { %v4330_v34 = vadd.f32 %v4329_v30, %v4328_v0  ;;  %v4331_v31 = vpop.f32.mrb[54].mxu0 }
 0x1db   : > { %v4368_v50 = vpop.f32.mrb[52].mxu1  ;;  %v4332_v33 = vpop.f32.mrb[55].mxu0 }
 0x1dc   : > { %v4369_v44 = vpop.f32.mrb[53].mxu1  ;;  %v4333_v25 = vadd.f32 %v4332_v33, %v4331_v31 }
 0x1dd   : > { %v4370_v63 = vadd.f32 %v4369_v44, %v4368_v50  ;;  %v4371_v32 = vpop.f32.mrb[54].mxu1 }
 0x1de   : > { %v4372_v43 = vpop.f32.mrb[55].mxu1 }
 0x1df   : > { %v3004_v3 = vadd.f32 %v4370_v63, %v4330_v34  ;;  %v4373_v8 = vadd.f32 %v4372_v43, %v4371_v32 }
 0x1e0   : > { %v4334_v54 = vpop.f32.mrb[56].mxu0 }
 0x1e1   : > { %v3007_v57 = vadd.f32 %v4373_v8, %v4333_v25  ;;  %v4335_v9 = vpop.f32.mrb[57].mxu0 }
 0x1e2   : > { %v4336_v4 = vadd.f32 %v4335_v9, %v4334_v54  ;;  %v4337_v11 = vpop.f32.mrb[58].mxu0 }
 0x1e3   : > { %v4374_v13 = vpop.f32.mrb[56].mxu1  ;;  %v4338_v21 = vpop.f32.mrb[59].mxu0 }
 0x1e4   : > { %v4375_v53 = vpop.f32.mrb[57].mxu1  ;;  %v4339_v56 = vadd.f32 %v4338_v21, %v4337_v11 }
 0x1e5   : > { %v4376_v62 = vadd.f32 %v4375_v53, %v4374_v13  ;;  %v4377_v15 = vpop.f32.mrb[58].mxu1 }
 0x1e6   : > { %v4378_v45 = vpop.f32.mrb[59].mxu1 }
 0x1e7   : > { %v3012_v20 = vadd.f32 %v4376_v62, %v4336_v4  ;;  %v4379_v14 = vadd.f32 %v4378_v45, %v4377_v15 }
 0x1e8   : > { %v4340_v35 = vpop.f32.mrb[60].mxu0 }
 0x1e9   : > { %v3015_v24 = vadd.f32 %v4379_v14, %v4339_v56  ;;  %v4341_v49 = vpop.f32.mrb[61].mxu0 }
 0x1ea   : > { %v4342_v2 = vadd.f32 %v4341_v49, %v4340_v35  ;;  %v4343_v40 = vpop.f32.mrb[62].mxu0 }
 0x1eb   : > { %v4380_v1 = vpop.f32.mrb[60].mxu1  ;;  %v4344_v23 = vpop.f32.mrb[63].mxu0 }
 0x1ec   : > { %v4381_v52 = vpop.f32.mrb[61].mxu1  ;;  %v4345_v36 = vadd.f32 %v4344_v23, %v4343_v40 }
 0x1ed   : > { %v4382_v26 = vadd.f32 %v4381_v52, %v4380_v1  ;;  %v4383_v48 = vpop.f32.mrb[62].mxu1 }
 0x1ee   : > { %v4384_v0 = vpop.f32.mrb[63].mxu1 }
 0x1ef   : > { %v3020_v30 = vadd.f32 %v4382_v26, %v4342_v2  ;;  %v4385_v34 = vadd.f32 %v4384_v0, %v4383_v48 }
 0x1f0   : > { %v4402_v31 = vpop.f32.mrb[64].mxu0 }
 0x1f1   : > { %v3023_v50 = vadd.f32 %v4385_v34, %v4345_v36  ;;  %v4403_v33 = vpop.f32.mrb[65].mxu0 }
 0x1f2   : > { %v4404_v44 = vadd.f32 %v4403_v33, %v4402_v31  ;;  %v4405_v25 = vpop.f32.mrb[66].mxu0 }
 0x1f3   : > { %v4442_v63 = vpop.f32.mrb[64].mxu1  ;;  %v4406_v32 = vpop.f32.mrb[67].mxu0 }
 0x1f4   : > { %v3091_v43 = vadd.f32 %v4404_v44, %v2996_v51  ;;  %v4443_v8 = vpop.f32.mrb[65].mxu1  ;;  %v4407_v54 = vadd.f32 %v4406_v32, %v4405_v25 }
 0x1f5   : > { %v4444_v9 = vadd.f32 %v4443_v8, %v4442_v63  ;;  %v4445_v4 = vpop.f32.mrb[66].mxu1 }
 0x1f6   : > { %v6451_v11 = vmax.f32 %v2888_v12, %v3091_v43  ;;  %v3092_v13 = vadd.f32 %v4407_v54, %v2999_v19  ;;  %v4446_v21 = vpop.f32.mrb[67].mxu1 }
 0x1f7   : > { %v4447_v53 = vadd.f32 %v4446_v21, %v4445_v4 }
 0x1f8   : > { %v6456_v56 = vmax.f32 %v2889_v55, %v3092_v13  ;;  %v4408_v62 = vpop.f32.mrb[68].mxu0 }
 0x1f9   : > { %v4409_v15 = vpop.f32.mrb[69].mxu0 }
 0x1fa   : > { %v4410_v51 = vadd.f32 %v4409_v15, %v4408_v62  ;;  %v4411_v45 = vpop.f32.mrb[70].mxu0 }
 0x1fb   : > { %v4448_v14 = vpop.f32.mrb[68].mxu1  ;;  %v4412_v35 = vpop.f32.mrb[71].mxu0 }
 0x1fc   : > { %v3093_v49 = vadd.f32 %v4410_v51, %v3004_v3  ;;  %v4449_v2 = vpop.f32.mrb[69].mxu1  ;;  %v4413_v40 = vadd.f32 %v4412_v35, %v4411_v45 }
 0x1fd   : > { %v6458_v39 = vadd.f32 %v4449_v2, %v4448_v14  ;;  %v4451_v5 = vpop.f32.mrb[70].mxu1 }
 0x1fe   : > { %v6463_v12 = vmax.f32 %v2890_v28, %v3093_v49  ;;  %v3094_v37 = vadd.f32 %v4413_v40, %v3007_v57  ;;  %v4452_v6 = vpop.f32.mrb[71].mxu1 }
 0x1ff   : > { %v6465_v55 = vadd.f32 %v4452_v6, %v4451_v5 }
 0x200   : > { %v6470_v19 = vmax.f32 %v2891_v16, %v3094_v37  ;;  %v4414_v3 = vpop.f32.mrb[72].mxu0 }
 0x201   : > { %v4415_v1 = vpop.f32.mrb[73].mxu0 }
 0x202   : > { %v4416_v23 = vadd.f32 %v4415_v1, %v4414_v3  ;;  %v4417_v52 = vpop.f32.mrb[74].mxu0 }
 0x203   : > { %v4454_v36 = vpop.f32.mrb[72].mxu1  ;;  %v4418_v26 = vpop.f32.mrb[75].mxu0 }
 0x204   : > { %v3095_v48 = vadd.f32 %v4416_v23, %v3012_v20  ;;  %v4455_v0 = vpop.f32.mrb[73].mxu1  ;;  %v4419_v18 = vadd.f32 %v4418_v26, %v4417_v52 }
 0x205   : > { %v6472_v47 = vadd.f32 %v4455_v0, %v4454_v36  ;;  %v4457_v28 = vpop.f32.mrb[74].mxu1 }
 0x206   : > { %v6477_v57 = vmax.f32 %v2892_v17, %v3095_v48  ;;  %v3096_v41 = vadd.f32 %v4419_v18, %v3015_v24  ;;  %v4458_v7 = vpop.f32.mrb[75].mxu1 }
 0x207   : > { %v6479_v16 = vadd.f32 %v4458_v7, %v4457_v28 }
 0x208   : > { %v6484_v34 = vmax.f32 %v2893_v59, %v3096_v41  ;;  %v4420_v20 = vpop.f32.mrb[76].mxu0 }
 0x209   : > { %v4421_v31 = vpop.f32.mrb[77].mxu0 }
 0x20a   : > { %v4422_v33 = vadd.f32 %v4421_v31, %v4420_v20  ;;  %v4423_v44 = vpop.f32.mrb[78].mxu0 }
 0x20b   : > { %v4460_v25 = vpop.f32.mrb[76].mxu1  ;;  %v4424_v63 = vpop.f32.mrb[79].mxu0 }
 0x20c   : > { %v3097_v32 = vadd.f32 %v4422_v33, %v3020_v30  ;;  %v4461_v43 = vpop.f32.mrb[77].mxu1  ;;  %v4425_v42 = vadd.f32 %v4424_v63, %v4423_v44 }
 0x20d   : > { %v6486_v60 = vadd.f32 %v4461_v43, %v4460_v25  ;;  %v4463_v17 = vpop.f32.mrb[78].mxu1 }
 0x20e   : > { %v6491_v24 = vmax.f32 %v2894_v27, %v3097_v32  ;;  %v3098_v46 = vadd.f32 %v4425_v42, %v3023_v50  ;;  %v4464_v29 = vpop.f32.mrb[79].mxu1 }
 0x20f   : > { %v6493_v59 = vadd.f32 %v4464_v29, %v4463_v17 }
 0x210   : > { %v6498_v8 = vmax.f32 %v2895_v10, %v3098_v46  ;;  %v4482_v30 = vpop.f32.mrb[80].mxu0 }
 0x211   : > { %v4483_v54 = vpop.f32.mrb[81].mxu0 }
 0x212   : > { %v4484_v4 = vadd.f32 %v4483_v54, %v4482_v30  ;;  %v4485_v13 = vpop.f32.mrb[82].mxu0 }
 0x213   : > { %v4522_v21 = vpop.f32.mrb[80].mxu1  ;;  %v4486_v62 = vpop.f32.mrb[83].mxu0 }
 0x214   : > { %v3207_v15 = vadd.f32 %v4484_v4, %v4444_v9  ;;  %v4523_v51 = vpop.f32.mrb[81].mxu1  ;;  %v4487_v58 = vadd.f32 %v4486_v62, %v4485_v13 }
 0x215   : > { %v4524_v61 = vadd.f32 %v4523_v51, %v4522_v21  ;;  %v4525_v27 = vpop.f32.mrb[82].mxu1 }
 0x216   : > { %v3210_v50 = vadd.f32 %v4487_v58, %v4447_v53  ;;  %v4526_v45 = vpop.f32.mrb[83].mxu1 }
 0x217   : > { %v3302_v14 = vadd.f32 %v4524_v61, %v3207_v15  ;;  %v4527_v35 = vadd.f32 %v4526_v45, %v4525_v27 }
 0x218   : > { %v4488_v22 = vpop.f32.mrb[84].mxu0 }
 0x219   : > { %v3310_v10 = vmax.f32 %v6451_v11, %v3302_v14  ;;  %v3303_v49 = vadd.f32 %v4527_v35, %v3210_v50  ;;  %v4489_v2 = vpop.f32.mrb[85].mxu0 }
 0x21a   : > { %v4490_v40 = vadd.f32 %v4489_v2, %v4488_v22  ;;  %v4491_v9 = vpop.f32.mrb[86].mxu0 }
 0x21b   : > { %v3325_v5 = vadd.f32 %v6503_v38, %v3310_v10  ;;  %v3311_v37 = vmax.f32 %v6456_v56, %v3303_v49  ;;  %v4528_v53 = vpop.f32.mrb[84].mxu1  ;;  %v4492_v6 = vpop.f32.mrb[87].mxu0 }
 0x21c   : > { %v3215_v3 = vadd.f32 %v4490_v40, %v6458_v39  ;;  %v4529_v1 = vpop.f32.mrb[85].mxu1  ;;  %v4493_v23 = vadd.f32 %v4492_v6, %v4491_v9 }
 0x21d   : > { %v3341_v52 = vmul.f32 0.01, %v3325_v5  ;;  %v3326_v36 = vadd.f32 %v6503_v38, %v3311_v37  ;;  %v4530_v26 = vadd.f32 %v4529_v1, %v4528_v53  ;;  %v4531_v48 = vpop.f32.mrb[86].mxu1  ;;  %vm3333_vm4 = vcmp.ge.f32.partialorder %v3325_v5, 0.0 }
 0x21e   : > { %v3218_v11 = vadd.f32 %v4493_v23, %v6465_v55  ;;  %v4532_v0 = vpop.f32.mrb[87].mxu1 }
 0x21f   : > { %v3342_v18 = vmul.f32 0.01, %v3326_v36  ;;  %v3304_v28 = vadd.f32 %v4530_v26, %v3215_v3  ;;  %v4533_v41 = vadd.f32 %v4532_v0, %v4531_v48  ;;  %vm3334_vm5 = vcmp.ge.f32.partialorder %v3326_v36, 0.0 }
 0x220   : > { %v4494_v56 = vpop.f32.mrb[88].mxu0  ;;  %v3349_v31 = vsel %vm3333_vm4, %v3325_v5, %v3341_v52 }
 0x221   : > { %v3312_v7 = vmax.f32 %v6463_v12, %v3304_v28  ;;  %v3305_v20 = vadd.f32 %v4533_v41, %v3218_v11  ;;  %v4495_v39 = vpop.f32.mrb[89].mxu0  ;;  %v3350_v33 = vsel %vm3334_vm5, %v3326_v36, %v3342_v18 }
 0x222   : > { %v4496_v44 = vadd.f32 %v4495_v39, %v4494_v56  ;;  %v4497_v25 = vpop.f32.mrb[90].mxu0  ;;  %v3357_v63 = vpack.c.bf16 %v3350_v33, %v3349_v31 }
 0x223   : > { %v3327_v32 = vadd.f32 %v6503_v38, %v3312_v7  ;;  %v3313_v55 = vmax.f32 %v6470_v19, %v3305_v20  ;;  %v4534_v43 = vpop.f32.mrb[88].mxu1  ;;  %v4498_v42 = vpop.f32.mrb[91].mxu0  ;;  %v4038_v7 = vld [vmem:[%s6563_s4] ss:$0 sm:$0xff] }
 0x224   : > { %v3223_v17 = vadd.f32 %v4496_v44, %v6472_v47  ;;  %v4535_v46 = vpop.f32.mrb[89].mxu1  ;;  %v4499_v29 = vadd.f32 %v4498_v42, %v4497_v25  ;;  %4562 = vmatprep.mubr.msk.bf16.mxu0 %vm1340_vm3, %v3357_v63 }
 0x225   : > { %v3343_v12 = vmul.f32 0.01, %v3327_v32  ;;  %v3328_v30 = vadd.f32 %v6503_v38, %v3313_v55  ;;  %v4536_v54 = vadd.f32 %v4535_v46, %v4534_v43  ;;  %v4537_v4 = vpop.f32.mrb[90].mxu1  ;;  %vm3335_vm6 = vcmp.ge.f32.partialorder %v3327_v32, 0.0 }
 0x226   : > { %v3226_v13 = vadd.f32 %v4499_v29, %v6479_v16  ;;  %v4538_v21 = vpop.f32.mrb[91].mxu1 }
 0x227   : > { %vm3336_vm7 = vcmp.ge.f32.partialorder %v3328_v30, 0.0  ;;  %v3344_v62 = vmul.f32 0.01, %v3328_v30  ;;  %v3306_v19 = vadd.f32 %v4536_v54, %v3223_v17  ;;  %v4539_v15 = vadd.f32 %v4538_v21, %v4537_v4 }
 0x228   : > { %v4500_v51 = vpop.f32.mrb[92].mxu0  ;;  %v3351_v58 = vsel %vm3335_vm6, %v3327_v32, %v3343_v12 }
 0x229   : > { %v3352_v47 = vsel %vm3336_vm7, %v3328_v30, %v3344_v62  ;;  %v3314_v61 = vmax.f32 %v6477_v57, %v3306_v19  ;;  %v4501_v27 = vpop.f32.mrb[93].mxu0  ;;  %v3307_v45 = vadd.f32 %v4539_v15, %v3226_v13 }
 0x22a   : > { %v3358_v50 = vpack.c.bf16 %v3352_v47, %v3351_v58  ;;  %v4502_v14 = vadd.f32 %v4501_v27, %v4500_v51  ;;  %v4503_v35 = vpop.f32.mrb[94].mxu0 }
 0x22b   : > { %v3329_v22 = vadd.f32 %v6503_v38, %v3314_v61  ;;  %v4540_v10 = vpop.f32.mrb[92].mxu1  ;;  %v4504_v49 = vpop.f32.mrb[95].mxu0  ;;  %v3315_v16 = vmax.f32 %v6484_v34, %v3307_v45 }
 0x22c   : > { %v3231_v2 = vadd.f32 %v4502_v14, %v6486_v60  ;;  %v4541_v40 = vpop.f32.mrb[93].mxu1  ;;  %v4505_v9 = vadd.f32 %v4504_v49, %v4503_v35  ;;  %4563 = vmatmul.mubr.msk.bf16.vlgmr.msra.gmra.mrb[96].mxu0 %vm1340_vm3, %v3358_v50 }
 0x22d   : > { %v4542_v5 = vadd.f32 %v4541_v40, %v4540_v10  ;;  %v4543_v37 = vpop.f32.mrb[94].mxu1  ;;  %v3345_v57 = vmul.f32 0.01, %v3329_v22  ;;  %v3330_v53 = vadd.f32 %v6503_v38, %v3315_v16  ;;  %vm3337_vm8 = vcmp.ge.f32.partialorder %v3329_v22, 0.0 }
 0x22e   : > { %v3234_v6 = vadd.f32 %v4505_v9, %v6493_v59  ;;  %v4544_v3 = vpop.f32.mrb[95].mxu1 }
 0x22f   : > { %v3308_v1 = vadd.f32 %v4542_v5, %v3231_v2  ;;  %v4545_v23 = vadd.f32 %v4544_v3, %v4543_v37  ;;  %v3346_v52 = vmul.f32 0.01, %v3330_v53  ;;  %vm3338_vm9 = vcmp.ge.f32.partialorder %v3330_v53, 0.0 }
 0x230   : > { %v3353_v36 = vsel %vm3337_vm8, %v3329_v22, %v3345_v57 }
 0x231   : > { %v3316_v34 = vmax.f32 %v6491_v24, %v3308_v1  ;;  %v3309_v60 = vadd.f32 %v4545_v23, %v3234_v6  ;;  %v3354_v26 = vsel %vm3338_vm9, %v3330_v53, %v3346_v52 }
 0x232   : > { %v3359_v0 = vpack.c.bf16 %v3354_v26, %v3353_v36 }
 0x233   : > { %v3331_v48 = vadd.f32 %v6503_v38, %v3316_v34  ;;  %v3317_v11 = vmax.f32 %v6498_v8, %v3309_v60 }
 0x234   : > { %4566 = vmatprep.mubr.msk.bf16.mxu1 %vm1340_vm3, %v3359_v0 }
 0x235   : > { %v3347_v18 = vmul.f32 0.01, %v3331_v48  ;;  %v3332_v59 = vadd.f32 %v6503_v38, %v3317_v11  ;;  %vm3339_vm10 = vcmp.ge.f32.partialorder %v3331_v48, 0.0 }
 0x237   : > { %vm3340_vm11 = vcmp.ge.f32.partialorder %v3332_v59, 0.0  ;;  %v3348_v28 = vmul.f32 0.01, %v3332_v59  ;;  %v3355_v41 = vsel %vm3339_vm10, %v3331_v48, %v3347_v18 }
 0x239   : > { %v3356_v56 = vsel %vm3340_vm11, %v3332_v59, %v3348_v28 }
 0x23a   : > { %v3360_v24 = vpack.c.bf16 %v3356_v56, %v3355_v41 }
 0x23c   : > { %4567 = vmatmul.mubr.msk.bf16.vlgmr.msra.gmra.mrb[96].mxu1 %vm1340_vm3, %v3360_v24 }
 0x2ff   : > { %v4564_v8 = vpop.f32.mrb[96].mxu0 }
 0x300   : > { %v3455_v20 = vadd.f32 %v4564_v8, %v4038_v7  ;;  %v3446_v39 = vpop.f32.mrb[97].mxu0 }
 0x301   : > { %v3447_v31 = vadd.f32 %v4038_v7, %v3446_v39  ;;  %v4565_v38 = vpop.f32.mrb[98].mxu0 }
 0x302   : > { %vm3479_vm12 = vcmp.ge.f32.partialorder %v3455_v20, 0.0  ;;  %v3487_v33 = vmul.f32 0.01, %v3455_v20  ;;  %v3458_v44 = vadd.f32 %v4565_v38, %v4038_v7  ;;  %v3449_v25 = vpop.f32.mrb[99].mxu0 }
 0x303   : > { %vm3477_vm13 = vcmp.ge.f32.partialorder %v3447_v31, 0.0  ;;  %v3485_v63 = vmul.f32 0.01, %v3447_v31  ;;  %v3450_v32 = vadd.f32 %v4038_v7, %v3449_v25 }
 0x304   : > { %v3495_v55 = vsel %vm3479_vm12, %v3455_v20, %v3487_v33  ;;  %vm3480_vm15 = vcmp.ge.f32.partialorder %v3458_v44, 0.0  ;;  %v3488_v43 = vmul.f32 0.01, %v3458_v44 }
 0x305   : > { %v4060_v42 = vpack.c.bf16 %v3495_v55, %v3495_v55  ;;  %v3493_v17 = vsel %vm3477_vm13, %v3447_v31, %v3485_v63  ;;  %vm3478_vm0 = vcmp.ge.f32.partialorder %v3450_v32, 0.0  ;;  %v3486_v46 = vmul.f32 0.01, %v3450_v32 }
 0x306   : > { %v4058_v29 = vpack.c.bf16 %v3493_v17, %v3493_v17  ;;  %v3496_v12 = vsel %vm3480_vm15, %v3458_v44, %v3488_v43 }
 0x307   : > { %3536 = vst.msk [vmem:[%s6538_s21 + $0x8] sm:$0xf] %vm3533_vm14, %v4060_v42  ;;  %v4061_v30 = vpack.c.bf16 %v3496_v12, %v3496_v12  ;;  %v3494_v54 = vsel %vm3478_vm0, %v3450_v32, %v3486_v46 }
 0x308   : > { %3534 = vst.msk [vmem:[%s6538_s21] sm:$0xf] %vm3533_vm14, %v4058_v29  ;;  %v4059_v4 = vpack.c.bf16 %v3494_v54, %v3494_v54 }
 0x309   : > { %3537 = vst.msk [vmem:[%s6538_s21 + $0xc] sm:$0xf] %vm3533_vm14, %v4061_v30 }
 0x30a   : > { %3535 = vst.msk [vmem:[%s6538_s21 + $0x4] sm:$0xf] %vm3533_vm14, %v4059_v4 }
 0x30f   : > { %v4568_v13 = vpop.f32.mrb[96].mxu1 }
 0x310   : > { %v3471_v21 = vadd.f32 %v4568_v13, %v4038_v7  ;;  %v3462_v62 = vpop.f32.mrb[97].mxu1 }
 0x311   : > { %v3463_v19 = vadd.f32 %v4038_v7, %v3462_v62  ;;  %v4569_v15 = vpop.f32.mrb[98].mxu1 }
 0x312   : > { %vm3483_vm1 = vcmp.ge.f32.partialorder %v3471_v21, 0.0  ;;  %v3491_v51 = vmul.f32 0.01, %v3471_v21  ;;  %v3474_v58 = vadd.f32 %v4569_v15, %v4038_v7  ;;  %v3465_v47 = vpop.f32.mrb[99].mxu1 }
 0x313   : > { %vm3481_vm2 = vcmp.ge.f32.partialorder %v3463_v19, 0.0  ;;  %v3489_v61 = vmul.f32 0.01, %v3463_v19  ;;  %v3466_v27 = vadd.f32 %v4038_v7, %v3465_v47 }
 0x314   : > { %v3499_v50 = vsel %vm3483_vm1, %v3471_v21, %v3491_v51  ;;  %vm3484_vm3 = vcmp.ge.f32.partialorder %v3474_v58, 0.0  ;;  %v3492_v45 = vmul.f32 0.01, %v3474_v58 }
 0x315   : > { %v4064_v14 = vpack.c.bf16 %v3499_v50, %v3499_v50  ;;  %v3497_v35 = vsel %vm3481_vm2, %v3463_v19, %v3489_v61  ;;  %vm3482_vm4 = vcmp.ge.f32.partialorder %v3466_v27, 0.0  ;;  %v3490_v22 = vmul.f32 0.01, %v3466_v27 }
 0x316   : > { %v4062_v10 = vpack.c.bf16 %v3497_v35, %v3497_v35  ;;  %v3500_v49 = vsel %vm3484_vm3, %v3474_v58, %v3492_v45 }
 0x317   : > { %3540 = vst.msk [vmem:[%s6538_s21 + $0x18] sm:$0xf] %vm3533_vm14, %v4064_v14  ;;  %v4065_v16 = vpack.c.bf16 %v3500_v49, %v3500_v49  ;;  %v3498_v2 = vsel %vm3482_vm4, %v3466_v27, %v3490_v22 }
 0x318   : > { %3538 = vst.msk [vmem:[%s6538_s21 + $0x10] sm:$0xf] %vm3533_vm14, %v4062_v10  ;;  %v4063_v40 = vpack.c.bf16 %v3498_v2, %v3498_v2 }
 0x319   : > { %3541 = vst.msk [vmem:[%s6538_s21 + $0x1c] sm:$0xf] %vm3533_vm14, %v4065_v16 }
 0x31a   : > { %3539 = vst.msk [vmem:[%s6538_s21 + $0x14] sm:$0xf] %vm3533_vm14, %v4063_v40 }
 0x31b PF: > { %s15_s18 = sadd.s32 1, %s4760_s18  }
 0x31c   : > { %p12_p4 = scmp.ge.s32.totalorder %s15_s18, 4  }
 0x31e   :  { %14 = sbr.rel (!%p12_p4) target bundleno = 1 (0x1), region = 82 }

</bundles_post_ra>
